<compile_context>
chip_gen: v7x
topology: tpu7x:2x2x1
jax: 0.10.0
libtpu: 0.0.40
codegen_flags: <defaults>
</compile_context>

<pallas_src>
import math
import numpy as np
import jax
import jax.numpy as jnp
from jax.experimental import pallas as pl
from jax.experimental.pallas import tpu as pltpu


# ----------------------------------------------------------------------------
# ADQC weight construction (plain-JAX glue; faithful port of the torch code)
# ----------------------------------------------------------------------------
def index_gates_brick_wall_1d(num_qubits, num_layers, starting_gate=0):
    index = []
    n_gate = starting_gate
    for layer in range(num_layers * 2):
        n_qubit = layer % 2
        while n_qubit + 1 < num_qubits:
            index.append([n_gate, n_qubit, n_qubit + 1])
            n_qubit += 2
            n_gate += 1
    return index


def evolve_tensor_one_gate(tensor, gate, pos):
    ndim = tensor.ndim
    tensor = jnp.tensordot(tensor, gate, [pos, [0, 1]])
    order = (list(range(pos[0])) + [ndim - 2]
             + list(range(pos[0], pos[1] - 1)) + [ndim - 1]
             + list(range(pos[1] - 1, ndim - 2)))
    return jnp.transpose(tensor, order)


def adqc_evolve(mps, gates, gates_pos, length):
    mps1 = mps
    for n in range(len(gates_pos)):
        which_gate = gates_pos[n][0]
        where = gates_pos[n][1:]
        mps1 = evolve_tensor_one_gate(mps1, gates[which_gate], where)
        # same condition as ((n+1)/(length-1)).is_integer() and ... in torch
        if ((n + 1) % (length - 1) == 0) and \
                (n + 1) // (length - 1) < len(gates_pos) / (length - 1):
            mps1 = jnp.maximum(mps1, 0.0)  # in-place ReLU in the torch code
    return mps1


def build_adqc_weight(key, in_channels, out_channels, kernel, layers):
    weight_size = in_channels * kernel ** 2 * out_channels
    dims = len(bin(weight_size)) - 3  # floor(log2(weight_size))
    assert 2 ** dims == weight_size, "weight_size must be a power of two"

    idx = index_gates_brick_wall_1d(dims, layers)
    num_gates = len(idx)

    gkeys = jax.random.split(key, num_gates)
    gates = [
        (jnp.eye(4, dtype=jnp.float32)
         + jax.random.normal(gkeys[n], (4, 4), dtype=jnp.float32) * 1e-12
         ).reshape(2, 2, 2, 2)
        for n in range(num_gates)
    ]

    # |0...0> product state of shape [2]*dims
    mps = jnp.zeros((2,) * dims, dtype=jnp.float32)
    mps = mps.at[(0,) * dims].set(1.0)

    mps1 = adqc_evolve(mps, gates, idx, dims)
    return mps1.reshape(out_channels, in_channels, kernel, kernel)


# ----------------------------------------------------------------------------
# Pallas conv2d: batched VPU broadcast-FMA over lane-shifted slabs
# ----------------------------------------------------------------------------
def conv2d_pallas_flat(xf, w_flat, *, cin, cout, ksh, ksw, wt, ho, bsz):
    """xf:     (N, Cin, HR*WT)   padded image flattened with row stride WT
       w_flat: (Cout*KH*KW*Cin,) f32 weight, index order (co, kh, kw, ci)
       returns (N, Cout, Ho*WT) float32 (columns >= Wo of each row = garbage).
    """
    n, cin_, flat = xf.shape
    out_len = ho * wt
    k = ksh * ksw * cin
    assert cin_ == cin and w_flat.shape == (cout * k,)
    assert n % bsz == 0

    def kernel(x_ref, w_ref, o_ref):
        # VPU broadcast-FMA conv: per tap (kh,kw) and input channel ci, load
        # ONE lane-shifted slab covering the whole batch block (source flat
        # index = dest flat index + kh*WT + kw, a purely static lane offset),
        # then FMA it into the Cout accumulators with scalar weights read from
        # SMEM.  No im2col scratch, no MXU fill/drain, no masked tap stores.
        accs = [None] * cout
        t = 0
        for i_kh in range(ksh):
            for i_kw in range(ksw):
                off = i_kh * wt + i_kw
                for ci in range(cin):
                    slab = x_ref[:, ci, off:off + out_len].astype(jnp.float32)
                    base = t * cin + ci
                    for co in range(cout):
                        wv = w_ref[co * k + base]          # scalar from SMEM
                        accs[co] = (wv * slab if accs[co] is None
                                    else accs[co] + wv * slab)
                t += 1
        for co in range(cout):
            o_ref[:, co, :] = accs[co].astype(o_ref.dtype)

    return pl.pallas_call(
        kernel,
        out_shape=jax.ShapeDtypeStruct((n, cout, out_len), jnp.float32),
        grid=(n // bsz,),
        in_specs=[
            pl.BlockSpec((bsz, cin, flat), lambda i: (i, 0, 0)),
            # tiny constant weight lives in SMEM: cheap scalar reads, no
            # per-step VMEM double-buffering of a constant operand
            pl.BlockSpec(memory_space=pltpu.MemorySpace.SMEM),
        ],
        out_specs=pl.BlockSpec((bsz, cout, out_len), lambda i: (i, 0, 0)),
        compiler_params=pltpu.CompilerParams(
            dimension_semantics=("parallel",)),
    )(xf, w_flat)


def _pick_batch_block(n, target, bytes_per_image, vmem_budget=8 << 20):
    """Largest divisor of n that is <= target and fits the VMEM budget,
    while keeping >= 2 grid steps when n >= 2 (feed both v7x TensorCores)."""
    cap = max(1, vmem_budget // max(1, bytes_per_image))
    b = max(1, min(target, cap, n))
    while n % b != 0:
        b -= 1
    if n // b < 2 and n >= 2:
        b = max(1, b // 2)
        while n % b != 0:
            b -= 1
    return b


# ----------------------------------------------------------------------------
# Forward pass (matches adqc_conv2d.forward semantics, NCHW in / NCHW out)
# ----------------------------------------------------------------------------
def adqc_conv2d_forward(x, weight, conv_padding=None,
                        compute_dtype=jnp.float32, batch_block=32):
    n, c, h, w = x.shape
    assert c % 4 == 0
    cout, cin, ksh, ksw = weight.shape
    assert cin == c
    p = int((ksh - 2) / 2) if conv_padding is None else conv_padding

    hp = h + 1 + 2 * p            # height after shifted pad + conv pad
    wp = w + 1 + 2 * p            # width  after shifted pad + conv pad
    ho = hp - ksh + 1
    wo = wp - ksw + 1

    # Row stride WT >= Wp chosen so Ho*WT is a multiple of 128 (lane-dense
    # accumulators + unmasked output stores).  The fallback to Wp is
    # perf-only (masked partial stores), never a correctness issue.
    g = 128 // math.gcd(128, ho)
    wt = ((wp + g - 1) // g) * g
    if wt > wp + 128:
        wt = wp
    hr = hp + 1                   # one extra zero row keeps all taps in-bounds

    q = c // 4
    rpad, bpad = wt - wp, hr - hp

    # Fused padding: shifted per-quarter pad + conv pad + WT/HR alignment pad,
    # one jnp.pad per quarter (single HBM materialization of the activation).
    # TODO(synk): fuse this pad/concat pass into the kernel via per-quarter
    # tap-offset adjustments + boundary masks to save one HBM read+write.
    def pad(a, l, r, t, b):
        return jnp.pad(a, ((0, 0), (0, 0), (t, b + bpad), (l, r + rpad)))

    x1 = pad(x[:, :q],          1 + p, 0 + p, 1 + p, 0 + p)
    x2 = pad(x[:, q:2 * q],     0 + p, 1 + p, 1 + p, 0 + p)
    x3 = pad(x[:, 2 * q:3 * q], 1 + p, 0 + p, 0 + p, 1 + p)
    x4 = pad(x[:, 3 * q:],      0 + p, 1 + p, 0 + p, 1 + p)
    xpad = jnp.concatenate([x1, x2, x3, x4], axis=1)      # (N, C, HR, WT)
    xf = xpad.reshape(n, c, hr * wt).astype(compute_dtype)

    # Flat weight in (co, kh, kw, ci) order to match the in-kernel FMA loop.
    w_flat = jnp.transpose(weight, (0, 2, 3, 1)).reshape(-1).astype(jnp.float32)

    # Batch images per grid step (VMEM budget accounts for double-buffered
    # input/output tiles; conservative enough for v7x's 32 MiB scoped VMEM).
    xbytes = jnp.dtype(compute_dtype).itemsize
    per_image = 2 * c * hr * wt * xbytes + 2 * cout * ho * wt * 4
    bsz = _pick_batch_block(n, batch_block, per_image)

    # TODO(synk): for large Cout/Cin switch to a batched im2col + MXU matmul
    # path; the broadcast-FMA unroll here is sized for the module's tiny 4x4.
    out = conv2d_pallas_flat(xf, w_flat, cin=c, cout=cout, ksh=ksh, ksw=ksw,
                             wt=wt, ho=ho, bsz=bsz)
    # TODO(synk): fold this WT->Wo compaction into the downstream consumer to
    # save an output HBM pass (columns >= Wo are row-wrap garbage).
    out = out.reshape(n, cout, ho, wt)[:, :, :, :wo]
    return out                                            # NCHW


# ----------------------------------------------------------------------------
# Pure-JAX reference (exact port of the module's forward)
# ----------------------------------------------------------------------------
def _shifted_pad_concat(x):
    _, c, _, _ = x.shape
    q = c // 4
    x1, x2 = x[:, :q], x[:, q:2 * q]
    x3, x4 = x[:, 2 * q:3 * q], x[:, 3 * q:]

    def pad(a, l, r, t, b):
        return jnp.pad(a, ((0, 0), (0, 0), (t, b), (l, r)))

    return jnp.concatenate([pad(x1, 1, 0, 1, 0), pad(x2, 0, 1, 1, 0),
                            pad(x3, 1, 0, 0, 1), pad(x4, 0, 1, 0, 1)], axis=1)


def reference_forward(x, weight, conv_padding=1):
    xc = _shifted_pad_concat(x)
    return jax.lax.conv_general_dilated(
        xc, weight, window_strides=(1, 1),
        padding=((conv_padding, conv_padding), (conv_padding, conv_padding)),
        dimension_numbers=("NCHW", "OIHW", "NCHW"))


# ----------------------------------------------------------------------------
if __name__ == "__main__":
    key = jax.random.PRNGKey(0)
    kx, kg = jax.random.split(key)

    # module config: in_channels=4, out_channels=4, kernel=4, layers=3
    #  -> weight_size = 4*16*4 = 256 = 2^8 (required power of two)
    in_channels, out_channels, kernel, layers = 4, 4, 4, 3
    N, C, H, W = 2, in_channels, 16, 16

    x = jax.random.normal(kx, (N, C, H, W), dtype=jnp.float32)
    weight = build_adqc_weight(kg, in_channels, out_channels, kernel, layers)

    out = adqc_conv2d_forward(x, weight)
    out = jax.block_until_ready(out)

    ref = reference_forward(x, weight, conv_padding=1)
    assert out.shape == (N, out_channels, H, W), out.shape
    assert np.allclose(np.asarray(out), np.asarray(ref), rtol=1e-5, atol=1e-5)

    print("KERNEL_OK")
</pallas_src>

<mosaic_0001>
module attributes {stable_mosaic.version = 11 : i64} {
  func.func @kernel(%arg0: i32, %arg1: memref<1x4x480xf32, #tpu.memory_space<vmem>>, %arg2: memref<256xf32, #tpu.memory_space<smem>>, %arg3: memref<1x4x384xf32, #tpu.memory_space<vmem>>) attributes {dimension_semantics = [#tpu.dimension_semantics<parallel>], iteration_bounds = array<i64: 2>, scalar_prefetch = 0 : i64, scratch_operands = 0 : i64, tpu.core_type = #tpu.core_type<tc>, window_params = [{transform_indices = @transform_0, window_bounds = array<i64: 1, 4, 480>}, {transform_indices = @transform_1, window_bounds = array<i64: 256>}, {transform_indices = @transform_2, window_bounds = array<i64: 1, 4, 384>}]} {
    %c0 = arith.constant 0 : index
    %c0_0 = arith.constant 0 : index
    %c0_1 = arith.constant 0 : index
    %0 = vector.load %arg1[%c0, %c0_0, %c0_1] : memref<1x4x480xf32, #tpu.memory_space<vmem>>, vector<1x1x384xf32>
    %1 = vector.shape_cast %0 : vector<1x1x384xf32> to vector<1x384xf32>
    %c0_2 = arith.constant 0 : index
    %2 = memref.load %arg2[%c0_2] : memref<256xf32, #tpu.memory_space<smem>>
    %3 = vector.broadcast %2 : f32 to vector<1x384xf32>
    %4 = arith.mulf %3, %1 : vector<1x384xf32>
    %c64 = arith.constant 64 : index
    %5 = memref.load %arg2[%c64] : memref<256xf32, #tpu.memory_space<smem>>
    %6 = vector.broadcast %5 : f32 to vector<1x384xf32>
    %7 = arith.mulf %6, %1 : vector<1x384xf32>
    %c128 = arith.constant 128 : index
    %8 = memref.load %arg2[%c128] : memref<256xf32, #tpu.memory_space<smem>>
    %9 = vector.broadcast %8 : f32 to vector<1x384xf32>
    %10 = arith.mulf %9, %1 : vector<1x384xf32>
    %c192 = arith.constant 192 : index
    %11 = memref.load %arg2[%c192] : memref<256xf32, #tpu.memory_space<smem>>
    %12 = vector.broadcast %11 : f32 to vector<1x384xf32>
    %13 = arith.mulf %12, %1 : vector<1x384xf32>
    %c0_3 = arith.constant 0 : index
    %c1 = arith.constant 1 : index
    %c0_4 = arith.constant 0 : index
    %14 = vector.load %arg1[%c0_3, %c1, %c0_4] : memref<1x4x480xf32, #tpu.memory_space<vmem>>, vector<1x1x384xf32>
    %15 = vector.shape_cast %14 : vector<1x1x384xf32> to vector<1x384xf32>
    %c1_5 = arith.constant 1 : index
    %16 = memref.load %arg2[%c1_5] : memref<256xf32, #tpu.memory_space<smem>>
    %17 = vector.broadcast %16 : f32 to vector<1x384xf32>
    %18 = arith.mulf %17, %15 : vector<1x384xf32>
    %19 = arith.addf %4, %18 : vector<1x384xf32>
    %c65 = arith.constant 65 : index
    %20 = memref.load %arg2[%c65] : memref<256xf32, #tpu.memory_space<smem>>
    %21 = vector.broadcast %20 : f32 to vector<1x384xf32>
    %22 = arith.mulf %21, %15 : vector<1x384xf32>
    %23 = arith.addf %7, %22 : vector<1x384xf32>
    %c129 = arith.constant 129 : index
    %24 = memref.load %arg2[%c129] : memref<256xf32, #tpu.memory_space<smem>>
    %25 = vector.broadcast %24 : f32 to vector<1x384xf32>
    %26 = arith.mulf %25, %15 : vector<1x384xf32>
    %27 = arith.addf %10, %26 : vector<1x384xf32>
    %c193 = arith.constant 193 : index
    %28 = memref.load %arg2[%c193] : memref<256xf32, #tpu.memory_space<smem>>
    %29 = vector.broadcast %28 : f32 to vector<1x384xf32>
    %30 = arith.mulf %29, %15 : vector<1x384xf32>
    %31 = arith.addf %13, %30 : vector<1x384xf32>
    %c0_6 = arith.constant 0 : index
    %c2 = arith.constant 2 : index
    %c0_7 = arith.constant 0 : index
    %32 = vector.load %arg1[%c0_6, %c2, %c0_7] : memref<1x4x480xf32, #tpu.memory_space<vmem>>, vector<1x1x384xf32>
    %33 = vector.shape_cast %32 : vector<1x1x384xf32> to vector<1x384xf32>
    %c2_8 = arith.constant 2 : index
    %34 = memref.load %arg2[%c2_8] : memref<256xf32, #tpu.memory_space<smem>>
    %35 = vector.broadcast %34 : f32 to vector<1x384xf32>
    %36 = arith.mulf %35, %33 : vector<1x384xf32>
    %37 = arith.addf %19, %36 : vector<1x384xf32>
    %c66 = arith.constant 66 : index
    %38 = memref.load %arg2[%c66] : memref<256xf32, #tpu.memory_space<smem>>
    %39 = vector.broadcast %38 : f32 to vector<1x384xf32>
    %40 = arith.mulf %39, %33 : vector<1x384xf32>
    %41 = arith.addf %23, %40 : vector<1x384xf32>
    %c130 = arith.constant 130 : index
    %42 = memref.load %arg2[%c130] : memref<256xf32, #tpu.memory_space<smem>>
    %43 = vector.broadcast %42 : f32 to vector<1x384xf32>
    %44 = arith.mulf %43, %33 : vector<1x384xf32>
    %45 = arith.addf %27, %44 : vector<1x384xf32>
    %c194 = arith.constant 194 : index
    %46 = memref.load %arg2[%c194] : memref<256xf32, #tpu.memory_space<smem>>
    %47 = vector.broadcast %46 : f32 to vector<1x384xf32>
    %48 = arith.mulf %47, %33 : vector<1x384xf32>
    %49 = arith.addf %31, %48 : vector<1x384xf32>
    %c0_9 = arith.constant 0 : index
    %c3 = arith.constant 3 : index
    %c0_10 = arith.constant 0 : index
    %50 = vector.load %arg1[%c0_9, %c3, %c0_10] : memref<1x4x480xf32, #tpu.memory_space<vmem>>, vector<1x1x384xf32>
    %51 = vector.shape_cast %50 : vector<1x1x384xf32> to vector<1x384xf32>
    %c3_11 = arith.constant 3 : index
    %52 = memref.load %arg2[%c3_11] : memref<256xf32, #tpu.memory_space<smem>>
    %53 = vector.broadcast %52 : f32 to vector<1x384xf32>
    %54 = arith.mulf %53, %51 : vector<1x384xf32>
    %55 = arith.addf %37, %54 : vector<1x384xf32>
    %c67 = arith.constant 67 : index
    %56 = memref.load %arg2[%c67] : memref<256xf32, #tpu.memory_space<smem>>
    %57 = vector.broadcast %56 : f32 to vector<1x384xf32>
    %58 = arith.mulf %57, %51 : vector<1x384xf32>
    %59 = arith.addf %41, %58 : vector<1x384xf32>
    %c131 = arith.constant 131 : index
    %60 = memref.load %arg2[%c131] : memref<256xf32, #tpu.memory_space<smem>>
    %61 = vector.broadcast %60 : f32 to vector<1x384xf32>
    %62 = arith.mulf %61, %51 : vector<1x384xf32>
    %63 = arith.addf %45, %62 : vector<1x384xf32>
    %c195 = arith.constant 195 : index
    %64 = memref.load %arg2[%c195] : memref<256xf32, #tpu.memory_space<smem>>
    %65 = vector.broadcast %64 : f32 to vector<1x384xf32>
    %66 = arith.mulf %65, %51 : vector<1x384xf32>
    %67 = arith.addf %49, %66 : vector<1x384xf32>
    %c0_12 = arith.constant 0 : index
    %c0_13 = arith.constant 0 : index
    %c1_14 = arith.constant 1 : index
    %68 = vector.load %arg1[%c0_12, %c0_13, %c1_14] : memref<1x4x480xf32, #tpu.memory_space<vmem>>, vector<1x1x384xf32>
    %69 = vector.shape_cast %68 : vector<1x1x384xf32> to vector<1x384xf32>
    %c4 = arith.constant 4 : index
    %70 = memref.load %arg2[%c4] : memref<256xf32, #tpu.memory_space<smem>>
    %71 = vector.broadcast %70 : f32 to vector<1x384xf32>
    %72 = arith.mulf %71, %69 : vector<1x384xf32>
    %73 = arith.addf %55, %72 : vector<1x384xf32>
    %c68 = arith.constant 68 : index
    %74 = memref.load %arg2[%c68] : memref<256xf32, #tpu.memory_space<smem>>
    %75 = vector.broadcast %74 : f32 to vector<1x384xf32>
    %76 = arith.mulf %75, %69 : vector<1x384xf32>
    %77 = arith.addf %59, %76 : vector<1x384xf32>
    %c132 = arith.constant 132 : index
    %78 = memref.load %arg2[%c132] : memref<256xf32, #tpu.memory_space<smem>>
    %79 = vector.broadcast %78 : f32 to vector<1x384xf32>
    %80 = arith.mulf %79, %69 : vector<1x384xf32>
    %81 = arith.addf %63, %80 : vector<1x384xf32>
    %c196 = arith.constant 196 : index
    %82 = memref.load %arg2[%c196] : memref<256xf32, #tpu.memory_space<smem>>
    %83 = vector.broadcast %82 : f32 to vector<1x384xf32>
    %84 = arith.mulf %83, %69 : vector<1x384xf32>
    %85 = arith.addf %67, %84 : vector<1x384xf32>
    %c0_15 = arith.constant 0 : index
    %c1_16 = arith.constant 1 : index
    %c1_17 = arith.constant 1 : index
    %86 = vector.load %arg1[%c0_15, %c1_16, %c1_17] : memref<1x4x480xf32, #tpu.memory_space<vmem>>, vector<1x1x384xf32>
    %87 = vector.shape_cast %86 : vector<1x1x384xf32> to vector<1x384xf32>
    %c5 = arith.constant 5 : index
    %88 = memref.load %arg2[%c5] : memref<256xf32, #tpu.memory_space<smem>>
    %89 = vector.broadcast %88 : f32 to vector<1x384xf32>
    %90 = arith.mulf %89, %87 : vector<1x384xf32>
    %91 = arith.addf %73, %90 : vector<1x384xf32>
    %c69 = arith.constant 69 : index
    %92 = memref.load %arg2[%c69] : memref<256xf32, #tpu.memory_space<smem>>
    %93 = vector.broadcast %92 : f32 to vector<1x384xf32>
    %94 = arith.mulf %93, %87 : vector<1x384xf32>
    %95 = arith.addf %77, %94 : vector<1x384xf32>
    %c133 = arith.constant 133 : index
    %96 = memref.load %arg2[%c133] : memref<256xf32, #tpu.memory_space<smem>>
    %97 = vector.broadcast %96 : f32 to vector<1x384xf32>
    %98 = arith.mulf %97, %87 : vector<1x384xf32>
    %99 = arith.addf %81, %98 : vector<1x384xf32>
    %c197 = arith.constant 197 : index
    %100 = memref.load %arg2[%c197] : memref<256xf32, #tpu.memory_space<smem>>
    %101 = vector.broadcast %100 : f32 to vector<1x384xf32>
    %102 = arith.mulf %101, %87 : vector<1x384xf32>
    %103 = arith.addf %85, %102 : vector<1x384xf32>
    %c0_18 = arith.constant 0 : index
    %c2_19 = arith.constant 2 : index
    %c1_20 = arith.constant 1 : index
    %104 = vector.load %arg1[%c0_18, %c2_19, %c1_20] : memref<1x4x480xf32, #tpu.memory_space<vmem>>, vector<1x1x384xf32>
    %105 = vector.shape_cast %104 : vector<1x1x384xf32> to vector<1x384xf32>
    %c6 = arith.constant 6 : index
    %106 = memref.load %arg2[%c6] : memref<256xf32, #tpu.memory_space<smem>>
    %107 = vector.broadcast %106 : f32 to vector<1x384xf32>
    %108 = arith.mulf %107, %105 : vector<1x384xf32>
    %109 = arith.addf %91, %108 : vector<1x384xf32>
    %c70 = arith.constant 70 : index
    %110 = memref.load %arg2[%c70] : memref<256xf32, #tpu.memory_space<smem>>
    %111 = vector.broadcast %110 : f32 to vector<1x384xf32>
    %112 = arith.mulf %111, %105 : vector<1x384xf32>
    %113 = arith.addf %95, %112 : vector<1x384xf32>
    %c134 = arith.constant 134 : index
    %114 = memref.load %arg2[%c134] : memref<256xf32, #tpu.memory_space<smem>>
    %115 = vector.broadcast %114 : f32 to vector<1x384xf32>
    %116 = arith.mulf %115, %105 : vector<1x384xf32>
    %117 = arith.addf %99, %116 : vector<1x384xf32>
    %c198 = arith.constant 198 : index
    %118 = memref.load %arg2[%c198] : memref<256xf32, #tpu.memory_space<smem>>
    %119 = vector.broadcast %118 : f32 to vector<1x384xf32>
    %120 = arith.mulf %119, %105 : vector<1x384xf32>
    %121 = arith.addf %103, %120 : vector<1x384xf32>
    %c0_21 = arith.constant 0 : index
    %c3_22 = arith.constant 3 : index
    %c1_23 = arith.constant 1 : index
    %122 = vector.load %arg1[%c0_21, %c3_22, %c1_23] : memref<1x4x480xf32, #tpu.memory_space<vmem>>, vector<1x1x384xf32>
    %123 = vector.shape_cast %122 : vector<1x1x384xf32> to vector<1x384xf32>
    %c7 = arith.constant 7 : index
    %124 = memref.load %arg2[%c7] : memref<256xf32, #tpu.memory_space<smem>>
    %125 = vector.broadcast %124 : f32 to vector<1x384xf32>
    %126 = arith.mulf %125, %123 : vector<1x384xf32>
    %127 = arith.addf %109, %126 : vector<1x384xf32>
    %c71 = arith.constant 71 : index
    %128 = memref.load %arg2[%c71] : memref<256xf32, #tpu.memory_space<smem>>
    %129 = vector.broadcast %128 : f32 to vector<1x384xf32>
    %130 = arith.mulf %129, %123 : vector<1x384xf32>
    %131 = arith.addf %113, %130 : vector<1x384xf32>
    %c135 = arith.constant 135 : index
    %132 = memref.load %arg2[%c135] : memref<256xf32, #tpu.memory_space<smem>>
    %133 = vector.broadcast %132 : f32 to vector<1x384xf32>
    %134 = arith.mulf %133, %123 : vector<1x384xf32>
    %135 = arith.addf %117, %134 : vector<1x384xf32>
    %c199 = arith.constant 199 : index
    %136 = memref.load %arg2[%c199] : memref<256xf32, #tpu.memory_space<smem>>
    %137 = vector.broadcast %136 : f32 to vector<1x384xf32>
    %138 = arith.mulf %137, %123 : vector<1x384xf32>
    %139 = arith.addf %121, %138 : vector<1x384xf32>
    %c0_24 = arith.constant 0 : index
    %c0_25 = arith.constant 0 : index
    %c2_26 = arith.constant 2 : index
    %140 = vector.load %arg1[%c0_24, %c0_25, %c2_26] : memref<1x4x480xf32, #tpu.memory_space<vmem>>, vector<1x1x384xf32>
    %141 = vector.shape_cast %140 : vector<1x1x384xf32> to vector<1x384xf32>
    %c8 = arith.constant 8 : index
    %142 = memref.load %arg2[%c8] : memref<256xf32, #tpu.memory_space<smem>>
    %143 = vector.broadcast %142 : f32 to vector<1x384xf32>
    %144 = arith.mulf %143, %141 : vector<1x384xf32>
    %145 = arith.addf %127, %144 : vector<1x384xf32>
    %c72 = arith.constant 72 : index
    %146 = memref.load %arg2[%c72] : memref<256xf32, #tpu.memory_space<smem>>
    %147 = vector.broadcast %146 : f32 to vector<1x384xf32>
    %148 = arith.mulf %147, %141 : vector<1x384xf32>
    %149 = arith.addf %131, %148 : vector<1x384xf32>
    %c136 = arith.constant 136 : index
    %150 = memref.load %arg2[%c136] : memref<256xf32, #tpu.memory_space<smem>>
    %151 = vector.broadcast %150 : f32 to vector<1x384xf32>
    %152 = arith.mulf %151, %141 : vector<1x384xf32>
    %153 = arith.addf %135, %152 : vector<1x384xf32>
    %c200 = arith.constant 200 : index
    %154 = memref.load %arg2[%c200] : memref<256xf32, #tpu.memory_space<smem>>
    %155 = vector.broadcast %154 : f32 to vector<1x384xf32>
    %156 = arith.mulf %155, %141 : vector<1x384xf32>
    %157 = arith.addf %139, %156 : vector<1x384xf32>
    %c0_27 = arith.constant 0 : index
    %c1_28 = arith.constant 1 : index
    %c2_29 = arith.constant 2 : index
    %158 = vector.load %arg1[%c0_27, %c1_28, %c2_29] : memref<1x4x480xf32, #tpu.memory_space<vmem>>, vector<1x1x384xf32>
    %159 = vector.shape_cast %158 : vector<1x1x384xf32> to vector<1x384xf32>
    %c9 = arith.constant 9 : index
    %160 = memref.load %arg2[%c9] : memref<256xf32, #tpu.memory_space<smem>>
    %161 = vector.broadcast %160 : f32 to vector<1x384xf32>
    %162 = arith.mulf %161, %159 : vector<1x384xf32>
    %163 = arith.addf %145, %162 : vector<1x384xf32>
    %c73 = arith.constant 73 : index
    %164 = memref.load %arg2[%c73] : memref<256xf32, #tpu.memory_space<smem>>
    %165 = vector.broadcast %164 : f32 to vector<1x384xf32>
    %166 = arith.mulf %165, %159 : vector<1x384xf32>
    %167 = arith.addf %149, %166 : vector<1x384xf32>
    %c137 = arith.constant 137 : index
    %168 = memref.load %arg2[%c137] : memref<256xf32, #tpu.memory_space<smem>>
    %169 = vector.broadcast %168 : f32 to vector<1x384xf32>
    %170 = arith.mulf %169, %159 : vector<1x384xf32>
    %171 = arith.addf %153, %170 : vector<1x384xf32>
    %c201 = arith.constant 201 : index
    %172 = memref.load %arg2[%c201] : memref<256xf32, #tpu.memory_space<smem>>
    %173 = vector.broadcast %172 : f32 to vector<1x384xf32>
    %174 = arith.mulf %173, %159 : vector<1x384xf32>
    %175 = arith.addf %157, %174 : vector<1x384xf32>
    %c0_30 = arith.constant 0 : index
    %c2_31 = arith.constant 2 : index
    %c2_32 = arith.constant 2 : index
    %176 = vector.load %arg1[%c0_30, %c2_31, %c2_32] : memref<1x4x480xf32, #tpu.memory_space<vmem>>, vector<1x1x384xf32>
    %177 = vector.shape_cast %176 : vector<1x1x384xf32> to vector<1x384xf32>
    %c10 = arith.constant 10 : index
    %178 = memref.load %arg2[%c10] : memref<256xf32, #tpu.memory_space<smem>>
    %179 = vector.broadcast %178 : f32 to vector<1x384xf32>
    %180 = arith.mulf %179, %177 : vector<1x384xf32>
    %181 = arith.addf %163, %180 : vector<1x384xf32>
    %c74 = arith.constant 74 : index
    %182 = memref.load %arg2[%c74] : memref<256xf32, #tpu.memory_space<smem>>
    %183 = vector.broadcast %182 : f32 to vector<1x384xf32>
    %184 = arith.mulf %183, %177 : vector<1x384xf32>
    %185 = arith.addf %167, %184 : vector<1x384xf32>
    %c138 = arith.constant 138 : index
    %186 = memref.load %arg2[%c138] : memref<256xf32, #tpu.memory_space<smem>>
    %187 = vector.broadcast %186 : f32 to vector<1x384xf32>
    %188 = arith.mulf %187, %177 : vector<1x384xf32>
    %189 = arith.addf %171, %188 : vector<1x384xf32>
    %c202 = arith.constant 202 : index
    %190 = memref.load %arg2[%c202] : memref<256xf32, #tpu.memory_space<smem>>
    %191 = vector.broadcast %190 : f32 to vector<1x384xf32>
    %192 = arith.mulf %191, %177 : vector<1x384xf32>
    %193 = arith.addf %175, %192 : vector<1x384xf32>
    %c0_33 = arith.constant 0 : index
    %c3_34 = arith.constant 3 : index
    %c2_35 = arith.constant 2 : index
    %194 = vector.load %arg1[%c0_33, %c3_34, %c2_35] : memref<1x4x480xf32, #tpu.memory_space<vmem>>, vector<1x1x384xf32>
    %195 = vector.shape_cast %194 : vector<1x1x384xf32> to vector<1x384xf32>
    %c11 = arith.constant 11 : index
    %196 = memref.load %arg2[%c11] : memref<256xf32, #tpu.memory_space<smem>>
    %197 = vector.broadcast %196 : f32 to vector<1x384xf32>
    %198 = arith.mulf %197, %195 : vector<1x384xf32>
    %199 = arith.addf %181, %198 : vector<1x384xf32>
    %c75 = arith.constant 75 : index
    %200 = memref.load %arg2[%c75] : memref<256xf32, #tpu.memory_space<smem>>
    %201 = vector.broadcast %200 : f32 to vector<1x384xf32>
    %202 = arith.mulf %201, %195 : vector<1x384xf32>
    %203 = arith.addf %185, %202 : vector<1x384xf32>
    %c139 = arith.constant 139 : index
    %204 = memref.load %arg2[%c139] : memref<256xf32, #tpu.memory_space<smem>>
    %205 = vector.broadcast %204 : f32 to vector<1x384xf32>
    %206 = arith.mulf %205, %195 : vector<1x384xf32>
    %207 = arith.addf %189, %206 : vector<1x384xf32>
    %c203 = arith.constant 203 : index
    %208 = memref.load %arg2[%c203] : memref<256xf32, #tpu.memory_space<smem>>
    %209 = vector.broadcast %208 : f32 to vector<1x384xf32>
    %210 = arith.mulf %209, %195 : vector<1x384xf32>
    %211 = arith.addf %193, %210 : vector<1x384xf32>
    %c0_36 = arith.constant 0 : index
    %c0_37 = arith.constant 0 : index
    %c3_38 = arith.constant 3 : index
    %212 = vector.load %arg1[%c0_36, %c0_37, %c3_38] : memref<1x4x480xf32, #tpu.memory_space<vmem>>, vector<1x1x384xf32>
    %213 = vector.shape_cast %212 : vector<1x1x384xf32> to vector<1x384xf32>
    %c12 = arith.constant 12 : index
    %214 = memref.load %arg2[%c12] : memref<256xf32, #tpu.memory_space<smem>>
    %215 = vector.broadcast %214 : f32 to vector<1x384xf32>
    %216 = arith.mulf %215, %213 : vector<1x384xf32>
    %217 = arith.addf %199, %216 : vector<1x384xf32>
    %c76 = arith.constant 76 : index
    %218 = memref.load %arg2[%c76] : memref<256xf32, #tpu.memory_space<smem>>
    %219 = vector.broadcast %218 : f32 to vector<1x384xf32>
    %220 = arith.mulf %219, %213 : vector<1x384xf32>
    %221 = arith.addf %203, %220 : vector<1x384xf32>
    %c140 = arith.constant 140 : index
    %222 = memref.load %arg2[%c140] : memref<256xf32, #tpu.memory_space<smem>>
    %223 = vector.broadcast %222 : f32 to vector<1x384xf32>
    %224 = arith.mulf %223, %213 : vector<1x384xf32>
    %225 = arith.addf %207, %224 : vector<1x384xf32>
    %c204 = arith.constant 204 : index
    %226 = memref.load %arg2[%c204] : memref<256xf32, #tpu.memory_space<smem>>
    %227 = vector.broadcast %226 : f32 to vector<1x384xf32>
    %228 = arith.mulf %227, %213 : vector<1x384xf32>
    %229 = arith.addf %211, %228 : vector<1x384xf32>
    %c0_39 = arith.constant 0 : index
    %c1_40 = arith.constant 1 : index
    %c3_41 = arith.constant 3 : index
    %230 = vector.load %arg1[%c0_39, %c1_40, %c3_41] : memref<1x4x480xf32, #tpu.memory_space<vmem>>, vector<1x1x384xf32>
    %231 = vector.shape_cast %230 : vector<1x1x384xf32> to vector<1x384xf32>
    %c13 = arith.constant 13 : index
    %232 = memref.load %arg2[%c13] : memref<256xf32, #tpu.memory_space<smem>>
    %233 = vector.broadcast %232 : f32 to vector<1x384xf32>
    %234 = arith.mulf %233, %231 : vector<1x384xf32>
    %235 = arith.addf %217, %234 : vector<1x384xf32>
    %c77 = arith.constant 77 : index
    %236 = memref.load %arg2[%c77] : memref<256xf32, #tpu.memory_space<smem>>
    %237 = vector.broadcast %236 : f32 to vector<1x384xf32>
    %238 = arith.mulf %237, %231 : vector<1x384xf32>
    %239 = arith.addf %221, %238 : vector<1x384xf32>
    %c141 = arith.constant 141 : index
    %240 = memref.load %arg2[%c141] : memref<256xf32, #tpu.memory_space<smem>>
    %241 = vector.broadcast %240 : f32 to vector<1x384xf32>
    %242 = arith.mulf %241, %231 : vector<1x384xf32>
    %243 = arith.addf %225, %242 : vector<1x384xf32>
    %c205 = arith.constant 205 : index
    %244 = memref.load %arg2[%c205] : memref<256xf32, #tpu.memory_space<smem>>
    %245 = vector.broadcast %244 : f32 to vector<1x384xf32>
    %246 = arith.mulf %245, %231 : vector<1x384xf32>
    %247 = arith.addf %229, %246 : vector<1x384xf32>
    %c0_42 = arith.constant 0 : index
    %c2_43 = arith.constant 2 : index
    %c3_44 = arith.constant 3 : index
    %248 = vector.load %arg1[%c0_42, %c2_43, %c3_44] : memref<1x4x480xf32, #tpu.memory_space<vmem>>, vector<1x1x384xf32>
    %249 = vector.shape_cast %248 : vector<1x1x384xf32> to vector<1x384xf32>
    %c14 = arith.constant 14 : index
    %250 = memref.load %arg2[%c14] : memref<256xf32, #tpu.memory_space<smem>>
    %251 = vector.broadcast %250 : f32 to vector<1x384xf32>
    %252 = arith.mulf %251, %249 : vector<1x384xf32>
    %253 = arith.addf %235, %252 : vector<1x384xf32>
    %c78 = arith.constant 78 : index
    %254 = memref.load %arg2[%c78] : memref<256xf32, #tpu.memory_space<smem>>
    %255 = vector.broadcast %254 : f32 to vector<1x384xf32>
    %256 = arith.mulf %255, %249 : vector<1x384xf32>
    %257 = arith.addf %239, %256 : vector<1x384xf32>
    %c142 = arith.constant 142 : index
    %258 = memref.load %arg2[%c142] : memref<256xf32, #tpu.memory_space<smem>>
    %259 = vector.broadcast %258 : f32 to vector<1x384xf32>
    %260 = arith.mulf %259, %249 : vector<1x384xf32>
    %261 = arith.addf %243, %260 : vector<1x384xf32>
    %c206 = arith.constant 206 : index
    %262 = memref.load %arg2[%c206] : memref<256xf32, #tpu.memory_space<smem>>
    %263 = vector.broadcast %262 : f32 to vector<1x384xf32>
    %264 = arith.mulf %263, %249 : vector<1x384xf32>
    %265 = arith.addf %247, %264 : vector<1x384xf32>
    %c0_45 = arith.constant 0 : index
    %c3_46 = arith.constant 3 : index
    %c3_47 = arith.constant 3 : index
    %266 = vector.load %arg1[%c0_45, %c3_46, %c3_47] : memref<1x4x480xf32, #tpu.memory_space<vmem>>, vector<1x1x384xf32>
    %267 = vector.shape_cast %266 : vector<1x1x384xf32> to vector<1x384xf32>
    %c15 = arith.constant 15 : index
    %268 = memref.load %arg2[%c15] : memref<256xf32, #tpu.memory_space<smem>>
    %269 = vector.broadcast %268 : f32 to vector<1x384xf32>
    %270 = arith.mulf %269, %267 : vector<1x384xf32>
    %271 = arith.addf %253, %270 : vector<1x384xf32>
    %c79 = arith.constant 79 : index
    %272 = memref.load %arg2[%c79] : memref<256xf32, #tpu.memory_space<smem>>
    %273 = vector.broadcast %272 : f32 to vector<1x384xf32>
    %274 = arith.mulf %273, %267 : vector<1x384xf32>
    %275 = arith.addf %257, %274 : vector<1x384xf32>
    %c143 = arith.constant 143 : index
    %276 = memref.load %arg2[%c143] : memref<256xf32, #tpu.memory_space<smem>>
    %277 = vector.broadcast %276 : f32 to vector<1x384xf32>
    %278 = arith.mulf %277, %267 : vector<1x384xf32>
    %279 = arith.addf %261, %278 : vector<1x384xf32>
    %c207 = arith.constant 207 : index
    %280 = memref.load %arg2[%c207] : memref<256xf32, #tpu.memory_space<smem>>
    %281 = vector.broadcast %280 : f32 to vector<1x384xf32>
    %282 = arith.mulf %281, %267 : vector<1x384xf32>
    %283 = arith.addf %265, %282 : vector<1x384xf32>
    %c0_48 = arith.constant 0 : index
    %c0_49 = arith.constant 0 : index
    %c24 = arith.constant 24 : index
    %284 = vector.load %arg1[%c0_48, %c0_49, %c24] : memref<1x4x480xf32, #tpu.memory_space<vmem>>, vector<1x1x384xf32>
    %285 = vector.shape_cast %284 : vector<1x1x384xf32> to vector<1x384xf32>
    %c16 = arith.constant 16 : index
    %286 = memref.load %arg2[%c16] : memref<256xf32, #tpu.memory_space<smem>>
    %287 = vector.broadcast %286 : f32 to vector<1x384xf32>
    %288 = arith.mulf %287, %285 : vector<1x384xf32>
    %289 = arith.addf %271, %288 : vector<1x384xf32>
    %c80 = arith.constant 80 : index
    %290 = memref.load %arg2[%c80] : memref<256xf32, #tpu.memory_space<smem>>
    %291 = vector.broadcast %290 : f32 to vector<1x384xf32>
    %292 = arith.mulf %291, %285 : vector<1x384xf32>
    %293 = arith.addf %275, %292 : vector<1x384xf32>
    %c144 = arith.constant 144 : index
    %294 = memref.load %arg2[%c144] : memref<256xf32, #tpu.memory_space<smem>>
    %295 = vector.broadcast %294 : f32 to vector<1x384xf32>
    %296 = arith.mulf %295, %285 : vector<1x384xf32>
    %297 = arith.addf %279, %296 : vector<1x384xf32>
    %c208 = arith.constant 208 : index
    %298 = memref.load %arg2[%c208] : memref<256xf32, #tpu.memory_space<smem>>
    %299 = vector.broadcast %298 : f32 to vector<1x384xf32>
    %300 = arith.mulf %299, %285 : vector<1x384xf32>
    %301 = arith.addf %283, %300 : vector<1x384xf32>
    %c0_50 = arith.constant 0 : index
    %c1_51 = arith.constant 1 : index
    %c24_52 = arith.constant 24 : index
    %302 = vector.load %arg1[%c0_50, %c1_51, %c24_52] : memref<1x4x480xf32, #tpu.memory_space<vmem>>, vector<1x1x384xf32>
    %303 = vector.shape_cast %302 : vector<1x1x384xf32> to vector<1x384xf32>
    %c17 = arith.constant 17 : index
    %304 = memref.load %arg2[%c17] : memref<256xf32, #tpu.memory_space<smem>>
    %305 = vector.broadcast %304 : f32 to vector<1x384xf32>
    %306 = arith.mulf %305, %303 : vector<1x384xf32>
    %307 = arith.addf %289, %306 : vector<1x384xf32>
    %c81 = arith.constant 81 : index
    %308 = memref.load %arg2[%c81] : memref<256xf32, #tpu.memory_space<smem>>
    %309 = vector.broadcast %308 : f32 to vector<1x384xf32>
    %310 = arith.mulf %309, %303 : vector<1x384xf32>
    %311 = arith.addf %293, %310 : vector<1x384xf32>
    %c145 = arith.constant 145 : index
    %312 = memref.load %arg2[%c145] : memref<256xf32, #tpu.memory_space<smem>>
    %313 = vector.broadcast %312 : f32 to vector<1x384xf32>
    %314 = arith.mulf %313, %303 : vector<1x384xf32>
    %315 = arith.addf %297, %314 : vector<1x384xf32>
    %c209 = arith.constant 209 : index
    %316 = memref.load %arg2[%c209] : memref<256xf32, #tpu.memory_space<smem>>
    %317 = vector.broadcast %316 : f32 to vector<1x384xf32>
    %318 = arith.mulf %317, %303 : vector<1x384xf32>
    %319 = arith.addf %301, %318 : vector<1x384xf32>
    %c0_53 = arith.constant 0 : index
    %c2_54 = arith.constant 2 : index
    %c24_55 = arith.constant 24 : index
    %320 = vector.load %arg1[%c0_53, %c2_54, %c24_55] : memref<1x4x480xf32, #tpu.memory_space<vmem>>, vector<1x1x384xf32>
    %321 = vector.shape_cast %320 : vector<1x1x384xf32> to vector<1x384xf32>
    %c18 = arith.constant 18 : index
    %322 = memref.load %arg2[%c18] : memref<256xf32, #tpu.memory_space<smem>>
    %323 = vector.broadcast %322 : f32 to vector<1x384xf32>
    %324 = arith.mulf %323, %321 : vector<1x384xf32>
    %325 = arith.addf %307, %324 : vector<1x384xf32>
    %c82 = arith.constant 82 : index
    %326 = memref.load %arg2[%c82] : memref<256xf32, #tpu.memory_space<smem>>
    %327 = vector.broadcast %326 : f32 to vector<1x384xf32>
    %328 = arith.mulf %327, %321 : vector<1x384xf32>
    %329 = arith.addf %311, %328 : vector<1x384xf32>
    %c146 = arith.constant 146 : index
    %330 = memref.load %arg2[%c146] : memref<256xf32, #tpu.memory_space<smem>>
    %331 = vector.broadcast %330 : f32 to vector<1x384xf32>
    %332 = arith.mulf %331, %321 : vector<1x384xf32>
    %333 = arith.addf %315, %332 : vector<1x384xf32>
    %c210 = arith.constant 210 : index
    %334 = memref.load %arg2[%c210] : memref<256xf32, #tpu.memory_space<smem>>
    %335 = vector.broadcast %334 : f32 to vector<1x384xf32>
    %336 = arith.mulf %335, %321 : vector<1x384xf32>
    %337 = arith.addf %319, %336 : vector<1x384xf32>
    %c0_56 = arith.constant 0 : index
    %c3_57 = arith.constant 3 : index
    %c24_58 = arith.constant 24 : index
    %338 = vector.load %arg1[%c0_56, %c3_57, %c24_58] : memref<1x4x480xf32, #tpu.memory_space<vmem>>, vector<1x1x384xf32>
    %339 = vector.shape_cast %338 : vector<1x1x384xf32> to vector<1x384xf32>
    %c19 = arith.constant 19 : index
    %340 = memref.load %arg2[%c19] : memref<256xf32, #tpu.memory_space<smem>>
    %341 = vector.broadcast %340 : f32 to vector<1x384xf32>
    %342 = arith.mulf %341, %339 : vector<1x384xf32>
    %343 = arith.addf %325, %342 : vector<1x384xf32>
    %c83 = arith.constant 83 : index
    %344 = memref.load %arg2[%c83] : memref<256xf32, #tpu.memory_space<smem>>
    %345 = vector.broadcast %344 : f32 to vector<1x384xf32>
    %346 = arith.mulf %345, %339 : vector<1x384xf32>
    %347 = arith.addf %329, %346 : vector<1x384xf32>
    %c147 = arith.constant 147 : index
    %348 = memref.load %arg2[%c147] : memref<256xf32, #tpu.memory_space<smem>>
    %349 = vector.broadcast %348 : f32 to vector<1x384xf32>
    %350 = arith.mulf %349, %339 : vector<1x384xf32>
    %351 = arith.addf %333, %350 : vector<1x384xf32>
    %c211 = arith.constant 211 : index
    %352 = memref.load %arg2[%c211] : memref<256xf32, #tpu.memory_space<smem>>
    %353 = vector.broadcast %352 : f32 to vector<1x384xf32>
    %354 = arith.mulf %353, %339 : vector<1x384xf32>
    %355 = arith.addf %337, %354 : vector<1x384xf32>
    %c0_59 = arith.constant 0 : index
    %c0_60 = arith.constant 0 : index
    %c25 = arith.constant 25 : index
    %356 = vector.load %arg1[%c0_59, %c0_60, %c25] : memref<1x4x480xf32, #tpu.memory_space<vmem>>, vector<1x1x384xf32>
    %357 = vector.shape_cast %356 : vector<1x1x384xf32> to vector<1x384xf32>
    %c20 = arith.constant 20 : index
    %358 = memref.load %arg2[%c20] : memref<256xf32, #tpu.memory_space<smem>>
    %359 = vector.broadcast %358 : f32 to vector<1x384xf32>
    %360 = arith.mulf %359, %357 : vector<1x384xf32>
    %361 = arith.addf %343, %360 : vector<1x384xf32>
    %c84 = arith.constant 84 : index
    %362 = memref.load %arg2[%c84] : memref<256xf32, #tpu.memory_space<smem>>
    %363 = vector.broadcast %362 : f32 to vector<1x384xf32>
    %364 = arith.mulf %363, %357 : vector<1x384xf32>
    %365 = arith.addf %347, %364 : vector<1x384xf32>
    %c148 = arith.constant 148 : index
    %366 = memref.load %arg2[%c148] : memref<256xf32, #tpu.memory_space<smem>>
    %367 = vector.broadcast %366 : f32 to vector<1x384xf32>
    %368 = arith.mulf %367, %357 : vector<1x384xf32>
    %369 = arith.addf %351, %368 : vector<1x384xf32>
    %c212 = arith.constant 212 : index
    %370 = memref.load %arg2[%c212] : memref<256xf32, #tpu.memory_space<smem>>
    %371 = vector.broadcast %370 : f32 to vector<1x384xf32>
    %372 = arith.mulf %371, %357 : vector<1x384xf32>
    %373 = arith.addf %355, %372 : vector<1x384xf32>
    %c0_61 = arith.constant 0 : index
    %c1_62 = arith.constant 1 : index
    %c25_63 = arith.constant 25 : index
    %374 = vector.load %arg1[%c0_61, %c1_62, %c25_63] : memref<1x4x480xf32, #tpu.memory_space<vmem>>, vector<1x1x384xf32>
    %375 = vector.shape_cast %374 : vector<1x1x384xf32> to vector<1x384xf32>
    %c21 = arith.constant 21 : index
    %376 = memref.load %arg2[%c21] : memref<256xf32, #tpu.memory_space<smem>>
    %377 = vector.broadcast %376 : f32 to vector<1x384xf32>
    %378 = arith.mulf %377, %375 : vector<1x384xf32>
    %379 = arith.addf %361, %378 : vector<1x384xf32>
    %c85 = arith.constant 85 : index
    %380 = memref.load %arg2[%c85] : memref<256xf32, #tpu.memory_space<smem>>
    %381 = vector.broadcast %380 : f32 to vector<1x384xf32>
    %382 = arith.mulf %381, %375 : vector<1x384xf32>
    %383 = arith.addf %365, %382 : vector<1x384xf32>
    %c149 = arith.constant 149 : index
    %384 = memref.load %arg2[%c149] : memref<256xf32, #tpu.memory_space<smem>>
    %385 = vector.broadcast %384 : f32 to vector<1x384xf32>
    %386 = arith.mulf %385, %375 : vector<1x384xf32>
    %387 = arith.addf %369, %386 : vector<1x384xf32>
    %c213 = arith.constant 213 : index
    %388 = memref.load %arg2[%c213] : memref<256xf32, #tpu.memory_space<smem>>
    %389 = vector.broadcast %388 : f32 to vector<1x384xf32>
    %390 = arith.mulf %389, %375 : vector<1x384xf32>
    %391 = arith.addf %373, %390 : vector<1x384xf32>
    %c0_64 = arith.constant 0 : index
    %c2_65 = arith.constant 2 : index
    %c25_66 = arith.constant 25 : index
    %392 = vector.load %arg1[%c0_64, %c2_65, %c25_66] : memref<1x4x480xf32, #tpu.memory_space<vmem>>, vector<1x1x384xf32>
    %393 = vector.shape_cast %392 : vector<1x1x384xf32> to vector<1x384xf32>
    %c22 = arith.constant 22 : index
    %394 = memref.load %arg2[%c22] : memref<256xf32, #tpu.memory_space<smem>>
    %395 = vector.broadcast %394 : f32 to vector<1x384xf32>
    %396 = arith.mulf %395, %393 : vector<1x384xf32>
    %397 = arith.addf %379, %396 : vector<1x384xf32>
    %c86 = arith.constant 86 : index
    %398 = memref.load %arg2[%c86] : memref<256xf32, #tpu.memory_space<smem>>
    %399 = vector.broadcast %398 : f32 to vector<1x384xf32>
    %400 = arith.mulf %399, %393 : vector<1x384xf32>
    %401 = arith.addf %383, %400 : vector<1x384xf32>
    %c150 = arith.constant 150 : index
    %402 = memref.load %arg2[%c150] : memref<256xf32, #tpu.memory_space<smem>>
    %403 = vector.broadcast %402 : f32 to vector<1x384xf32>
    %404 = arith.mulf %403, %393 : vector<1x384xf32>
    %405 = arith.addf %387, %404 : vector<1x384xf32>
    %c214 = arith.constant 214 : index
    %406 = memref.load %arg2[%c214] : memref<256xf32, #tpu.memory_space<smem>>
    %407 = vector.broadcast %406 : f32 to vector<1x384xf32>
    %408 = arith.mulf %407, %393 : vector<1x384xf32>
    %409 = arith.addf %391, %408 : vector<1x384xf32>
    %c0_67 = arith.constant 0 : index
    %c3_68 = arith.constant 3 : index
    %c25_69 = arith.constant 25 : index
    %410 = vector.load %arg1[%c0_67, %c3_68, %c25_69] : memref<1x4x480xf32, #tpu.memory_space<vmem>>, vector<1x1x384xf32>
    %411 = vector.shape_cast %410 : vector<1x1x384xf32> to vector<1x384xf32>
    %c23 = arith.constant 23 : index
    %412 = memref.load %arg2[%c23] : memref<256xf32, #tpu.memory_space<smem>>
    %413 = vector.broadcast %412 : f32 to vector<1x384xf32>
    %414 = arith.mulf %413, %411 : vector<1x384xf32>
    %415 = arith.addf %397, %414 : vector<1x384xf32>
    %c87 = arith.constant 87 : index
    %416 = memref.load %arg2[%c87] : memref<256xf32, #tpu.memory_space<smem>>
    %417 = vector.broadcast %416 : f32 to vector<1x384xf32>
    %418 = arith.mulf %417, %411 : vector<1x384xf32>
    %419 = arith.addf %401, %418 : vector<1x384xf32>
    %c151 = arith.constant 151 : index
    %420 = memref.load %arg2[%c151] : memref<256xf32, #tpu.memory_space<smem>>
    %421 = vector.broadcast %420 : f32 to vector<1x384xf32>
    %422 = arith.mulf %421, %411 : vector<1x384xf32>
    %423 = arith.addf %405, %422 : vector<1x384xf32>
    %c215 = arith.constant 215 : index
    %424 = memref.load %arg2[%c215] : memref<256xf32, #tpu.memory_space<smem>>
    %425 = vector.broadcast %424 : f32 to vector<1x384xf32>
    %426 = arith.mulf %425, %411 : vector<1x384xf32>
    %427 = arith.addf %409, %426 : vector<1x384xf32>
    %c0_70 = arith.constant 0 : index
    %c0_71 = arith.constant 0 : index
    %c26 = arith.constant 26 : index
    %428 = vector.load %arg1[%c0_70, %c0_71, %c26] : memref<1x4x480xf32, #tpu.memory_space<vmem>>, vector<1x1x384xf32>
    %429 = vector.shape_cast %428 : vector<1x1x384xf32> to vector<1x384xf32>
    %c24_72 = arith.constant 24 : index
    %430 = memref.load %arg2[%c24_72] : memref<256xf32, #tpu.memory_space<smem>>
    %431 = vector.broadcast %430 : f32 to vector<1x384xf32>
    %432 = arith.mulf %431, %429 : vector<1x384xf32>
    %433 = arith.addf %415, %432 : vector<1x384xf32>
    %c88 = arith.constant 88 : index
    %434 = memref.load %arg2[%c88] : memref<256xf32, #tpu.memory_space<smem>>
    %435 = vector.broadcast %434 : f32 to vector<1x384xf32>
    %436 = arith.mulf %435, %429 : vector<1x384xf32>
    %437 = arith.addf %419, %436 : vector<1x384xf32>
    %c152 = arith.constant 152 : index
    %438 = memref.load %arg2[%c152] : memref<256xf32, #tpu.memory_space<smem>>
    %439 = vector.broadcast %438 : f32 to vector<1x384xf32>
    %440 = arith.mulf %439, %429 : vector<1x384xf32>
    %441 = arith.addf %423, %440 : vector<1x384xf32>
    %c216 = arith.constant 216 : index
    %442 = memref.load %arg2[%c216] : memref<256xf32, #tpu.memory_space<smem>>
    %443 = vector.broadcast %442 : f32 to vector<1x384xf32>
    %444 = arith.mulf %443, %429 : vector<1x384xf32>
    %445 = arith.addf %427, %444 : vector<1x384xf32>
    %c0_73 = arith.constant 0 : index
    %c1_74 = arith.constant 1 : index
    %c26_75 = arith.constant 26 : index
    %446 = vector.load %arg1[%c0_73, %c1_74, %c26_75] : memref<1x4x480xf32, #tpu.memory_space<vmem>>, vector<1x1x384xf32>
    %447 = vector.shape_cast %446 : vector<1x1x384xf32> to vector<1x384xf32>
    %c25_76 = arith.constant 25 : index
    %448 = memref.load %arg2[%c25_76] : memref<256xf32, #tpu.memory_space<smem>>
    %449 = vector.broadcast %448 : f32 to vector<1x384xf32>
    %450 = arith.mulf %449, %447 : vector<1x384xf32>
    %451 = arith.addf %433, %450 : vector<1x384xf32>
    %c89 = arith.constant 89 : index
    %452 = memref.load %arg2[%c89] : memref<256xf32, #tpu.memory_space<smem>>
    %453 = vector.broadcast %452 : f32 to vector<1x384xf32>
    %454 = arith.mulf %453, %447 : vector<1x384xf32>
    %455 = arith.addf %437, %454 : vector<1x384xf32>
    %c153 = arith.constant 153 : index
    %456 = memref.load %arg2[%c153] : memref<256xf32, #tpu.memory_space<smem>>
    %457 = vector.broadcast %456 : f32 to vector<1x384xf32>
    %458 = arith.mulf %457, %447 : vector<1x384xf32>
    %459 = arith.addf %441, %458 : vector<1x384xf32>
    %c217 = arith.constant 217 : index
    %460 = memref.load %arg2[%c217] : memref<256xf32, #tpu.memory_space<smem>>
    %461 = vector.broadcast %460 : f32 to vector<1x384xf32>
    %462 = arith.mulf %461, %447 : vector<1x384xf32>
    %463 = arith.addf %445, %462 : vector<1x384xf32>
    %c0_77 = arith.constant 0 : index
    %c2_78 = arith.constant 2 : index
    %c26_79 = arith.constant 26 : index
    %464 = vector.load %arg1[%c0_77, %c2_78, %c26_79] : memref<1x4x480xf32, #tpu.memory_space<vmem>>, vector<1x1x384xf32>
    %465 = vector.shape_cast %464 : vector<1x1x384xf32> to vector<1x384xf32>
    %c26_80 = arith.constant 26 : index
    %466 = memref.load %arg2[%c26_80] : memref<256xf32, #tpu.memory_space<smem>>
    %467 = vector.broadcast %466 : f32 to vector<1x384xf32>
    %468 = arith.mulf %467, %465 : vector<1x384xf32>
    %469 = arith.addf %451, %468 : vector<1x384xf32>
    %c90 = arith.constant 90 : index
    %470 = memref.load %arg2[%c90] : memref<256xf32, #tpu.memory_space<smem>>
    %471 = vector.broadcast %470 : f32 to vector<1x384xf32>
    %472 = arith.mulf %471, %465 : vector<1x384xf32>
    %473 = arith.addf %455, %472 : vector<1x384xf32>
    %c154 = arith.constant 154 : index
    %474 = memref.load %arg2[%c154] : memref<256xf32, #tpu.memory_space<smem>>
    %475 = vector.broadcast %474 : f32 to vector<1x384xf32>
    %476 = arith.mulf %475, %465 : vector<1x384xf32>
    %477 = arith.addf %459, %476 : vector<1x384xf32>
    %c218 = arith.constant 218 : index
    %478 = memref.load %arg2[%c218] : memref<256xf32, #tpu.memory_space<smem>>
    %479 = vector.broadcast %478 : f32 to vector<1x384xf32>
    %480 = arith.mulf %479, %465 : vector<1x384xf32>
    %481 = arith.addf %463, %480 : vector<1x384xf32>
    %c0_81 = arith.constant 0 : index
    %c3_82 = arith.constant 3 : index
    %c26_83 = arith.constant 26 : index
    %482 = vector.load %arg1[%c0_81, %c3_82, %c26_83] : memref<1x4x480xf32, #tpu.memory_space<vmem>>, vector<1x1x384xf32>
    %483 = vector.shape_cast %482 : vector<1x1x384xf32> to vector<1x384xf32>
    %c27 = arith.constant 27 : index
    %484 = memref.load %arg2[%c27] : memref<256xf32, #tpu.memory_space<smem>>
    %485 = vector.broadcast %484 : f32 to vector<1x384xf32>
    %486 = arith.mulf %485, %483 : vector<1x384xf32>
    %487 = arith.addf %469, %486 : vector<1x384xf32>
    %c91 = arith.constant 91 : index
    %488 = memref.load %arg2[%c91] : memref<256xf32, #tpu.memory_space<smem>>
    %489 = vector.broadcast %488 : f32 to vector<1x384xf32>
    %490 = arith.mulf %489, %483 : vector<1x384xf32>
    %491 = arith.addf %473, %490 : vector<1x384xf32>
    %c155 = arith.constant 155 : index
    %492 = memref.load %arg2[%c155] : memref<256xf32, #tpu.memory_space<smem>>
    %493 = vector.broadcast %492 : f32 to vector<1x384xf32>
    %494 = arith.mulf %493, %483 : vector<1x384xf32>
    %495 = arith.addf %477, %494 : vector<1x384xf32>
    %c219 = arith.constant 219 : index
    %496 = memref.load %arg2[%c219] : memref<256xf32, #tpu.memory_space<smem>>
    %497 = vector.broadcast %496 : f32 to vector<1x384xf32>
    %498 = arith.mulf %497, %483 : vector<1x384xf32>
    %499 = arith.addf %481, %498 : vector<1x384xf32>
    %c0_84 = arith.constant 0 : index
    %c0_85 = arith.constant 0 : index
    %c27_86 = arith.constant 27 : index
    %500 = vector.load %arg1[%c0_84, %c0_85, %c27_86] : memref<1x4x480xf32, #tpu.memory_space<vmem>>, vector<1x1x384xf32>
    %501 = vector.shape_cast %500 : vector<1x1x384xf32> to vector<1x384xf32>
    %c28 = arith.constant 28 : index
    %502 = memref.load %arg2[%c28] : memref<256xf32, #tpu.memory_space<smem>>
    %503 = vector.broadcast %502 : f32 to vector<1x384xf32>
    %504 = arith.mulf %503, %501 : vector<1x384xf32>
    %505 = arith.addf %487, %504 : vector<1x384xf32>
    %c92 = arith.constant 92 : index
    %506 = memref.load %arg2[%c92] : memref<256xf32, #tpu.memory_space<smem>>
    %507 = vector.broadcast %506 : f32 to vector<1x384xf32>
    %508 = arith.mulf %507, %501 : vector<1x384xf32>
    %509 = arith.addf %491, %508 : vector<1x384xf32>
    %c156 = arith.constant 156 : index
    %510 = memref.load %arg2[%c156] : memref<256xf32, #tpu.memory_space<smem>>
    %511 = vector.broadcast %510 : f32 to vector<1x384xf32>
    %512 = arith.mulf %511, %501 : vector<1x384xf32>
    %513 = arith.addf %495, %512 : vector<1x384xf32>
    %c220 = arith.constant 220 : index
    %514 = memref.load %arg2[%c220] : memref<256xf32, #tpu.memory_space<smem>>
    %515 = vector.broadcast %514 : f32 to vector<1x384xf32>
    %516 = arith.mulf %515, %501 : vector<1x384xf32>
    %517 = arith.addf %499, %516 : vector<1x384xf32>
    %c0_87 = arith.constant 0 : index
    %c1_88 = arith.constant 1 : index
    %c27_89 = arith.constant 27 : index
    %518 = vector.load %arg1[%c0_87, %c1_88, %c27_89] : memref<1x4x480xf32, #tpu.memory_space<vmem>>, vector<1x1x384xf32>
    %519 = vector.shape_cast %518 : vector<1x1x384xf32> to vector<1x384xf32>
    %c29 = arith.constant 29 : index
    %520 = memref.load %arg2[%c29] : memref<256xf32, #tpu.memory_space<smem>>
    %521 = vector.broadcast %520 : f32 to vector<1x384xf32>
    %522 = arith.mulf %521, %519 : vector<1x384xf32>
    %523 = arith.addf %505, %522 : vector<1x384xf32>
    %c93 = arith.constant 93 : index
    %524 = memref.load %arg2[%c93] : memref<256xf32, #tpu.memory_space<smem>>
    %525 = vector.broadcast %524 : f32 to vector<1x384xf32>
    %526 = arith.mulf %525, %519 : vector<1x384xf32>
    %527 = arith.addf %509, %526 : vector<1x384xf32>
    %c157 = arith.constant 157 : index
    %528 = memref.load %arg2[%c157] : memref<256xf32, #tpu.memory_space<smem>>
    %529 = vector.broadcast %528 : f32 to vector<1x384xf32>
    %530 = arith.mulf %529, %519 : vector<1x384xf32>
    %531 = arith.addf %513, %530 : vector<1x384xf32>
    %c221 = arith.constant 221 : index
    %532 = memref.load %arg2[%c221] : memref<256xf32, #tpu.memory_space<smem>>
    %533 = vector.broadcast %532 : f32 to vector<1x384xf32>
    %534 = arith.mulf %533, %519 : vector<1x384xf32>
    %535 = arith.addf %517, %534 : vector<1x384xf32>
    %c0_90 = arith.constant 0 : index
    %c2_91 = arith.constant 2 : index
    %c27_92 = arith.constant 27 : index
    %536 = vector.load %arg1[%c0_90, %c2_91, %c27_92] : memref<1x4x480xf32, #tpu.memory_space<vmem>>, vector<1x1x384xf32>
    %537 = vector.shape_cast %536 : vector<1x1x384xf32> to vector<1x384xf32>
    %c30 = arith.constant 30 : index
    %538 = memref.load %arg2[%c30] : memref<256xf32, #tpu.memory_space<smem>>
    %539 = vector.broadcast %538 : f32 to vector<1x384xf32>
    %540 = arith.mulf %539, %537 : vector<1x384xf32>
    %541 = arith.addf %523, %540 : vector<1x384xf32>
    %c94 = arith.constant 94 : index
    %542 = memref.load %arg2[%c94] : memref<256xf32, #tpu.memory_space<smem>>
    %543 = vector.broadcast %542 : f32 to vector<1x384xf32>
    %544 = arith.mulf %543, %537 : vector<1x384xf32>
    %545 = arith.addf %527, %544 : vector<1x384xf32>
    %c158 = arith.constant 158 : index
    %546 = memref.load %arg2[%c158] : memref<256xf32, #tpu.memory_space<smem>>
    %547 = vector.broadcast %546 : f32 to vector<1x384xf32>
    %548 = arith.mulf %547, %537 : vector<1x384xf32>
    %549 = arith.addf %531, %548 : vector<1x384xf32>
    %c222 = arith.constant 222 : index
    %550 = memref.load %arg2[%c222] : memref<256xf32, #tpu.memory_space<smem>>
    %551 = vector.broadcast %550 : f32 to vector<1x384xf32>
    %552 = arith.mulf %551, %537 : vector<1x384xf32>
    %553 = arith.addf %535, %552 : vector<1x384xf32>
    %c0_93 = arith.constant 0 : index
    %c3_94 = arith.constant 3 : index
    %c27_95 = arith.constant 27 : index
    %554 = vector.load %arg1[%c0_93, %c3_94, %c27_95] : memref<1x4x480xf32, #tpu.memory_space<vmem>>, vector<1x1x384xf32>
    %555 = vector.shape_cast %554 : vector<1x1x384xf32> to vector<1x384xf32>
    %c31 = arith.constant 31 : index
    %556 = memref.load %arg2[%c31] : memref<256xf32, #tpu.memory_space<smem>>
    %557 = vector.broadcast %556 : f32 to vector<1x384xf32>
    %558 = arith.mulf %557, %555 : vector<1x384xf32>
    %559 = arith.addf %541, %558 : vector<1x384xf32>
    %c95 = arith.constant 95 : index
    %560 = memref.load %arg2[%c95] : memref<256xf32, #tpu.memory_space<smem>>
    %561 = vector.broadcast %560 : f32 to vector<1x384xf32>
    %562 = arith.mulf %561, %555 : vector<1x384xf32>
    %563 = arith.addf %545, %562 : vector<1x384xf32>
    %c159 = arith.constant 159 : index
    %564 = memref.load %arg2[%c159] : memref<256xf32, #tpu.memory_space<smem>>
    %565 = vector.broadcast %564 : f32 to vector<1x384xf32>
    %566 = arith.mulf %565, %555 : vector<1x384xf32>
    %567 = arith.addf %549, %566 : vector<1x384xf32>
    %c223 = arith.constant 223 : index
    %568 = memref.load %arg2[%c223] : memref<256xf32, #tpu.memory_space<smem>>
    %569 = vector.broadcast %568 : f32 to vector<1x384xf32>
    %570 = arith.mulf %569, %555 : vector<1x384xf32>
    %571 = arith.addf %553, %570 : vector<1x384xf32>
    %c0_96 = arith.constant 0 : index
    %c0_97 = arith.constant 0 : index
    %c48 = arith.constant 48 : index
    %572 = vector.load %arg1[%c0_96, %c0_97, %c48] : memref<1x4x480xf32, #tpu.memory_space<vmem>>, vector<1x1x384xf32>
    %573 = vector.shape_cast %572 : vector<1x1x384xf32> to vector<1x384xf32>
    %c32 = arith.constant 32 : index
    %574 = memref.load %arg2[%c32] : memref<256xf32, #tpu.memory_space<smem>>
    %575 = vector.broadcast %574 : f32 to vector<1x384xf32>
    %576 = arith.mulf %575, %573 : vector<1x384xf32>
    %577 = arith.addf %559, %576 : vector<1x384xf32>
    %c96 = arith.constant 96 : index
    %578 = memref.load %arg2[%c96] : memref<256xf32, #tpu.memory_space<smem>>
    %579 = vector.broadcast %578 : f32 to vector<1x384xf32>
    %580 = arith.mulf %579, %573 : vector<1x384xf32>
    %581 = arith.addf %563, %580 : vector<1x384xf32>
    %c160 = arith.constant 160 : index
    %582 = memref.load %arg2[%c160] : memref<256xf32, #tpu.memory_space<smem>>
    %583 = vector.broadcast %582 : f32 to vector<1x384xf32>
    %584 = arith.mulf %583, %573 : vector<1x384xf32>
    %585 = arith.addf %567, %584 : vector<1x384xf32>
    %c224 = arith.constant 224 : index
    %586 = memref.load %arg2[%c224] : memref<256xf32, #tpu.memory_space<smem>>
    %587 = vector.broadcast %586 : f32 to vector<1x384xf32>
    %588 = arith.mulf %587, %573 : vector<1x384xf32>
    %589 = arith.addf %571, %588 : vector<1x384xf32>
    %c0_98 = arith.constant 0 : index
    %c1_99 = arith.constant 1 : index
    %c48_100 = arith.constant 48 : index
    %590 = vector.load %arg1[%c0_98, %c1_99, %c48_100] : memref<1x4x480xf32, #tpu.memory_space<vmem>>, vector<1x1x384xf32>
    %591 = vector.shape_cast %590 : vector<1x1x384xf32> to vector<1x384xf32>
    %c33 = arith.constant 33 : index
    %592 = memref.load %arg2[%c33] : memref<256xf32, #tpu.memory_space<smem>>
    %593 = vector.broadcast %592 : f32 to vector<1x384xf32>
    %594 = arith.mulf %593, %591 : vector<1x384xf32>
    %595 = arith.addf %577, %594 : vector<1x384xf32>
    %c97 = arith.constant 97 : index
    %596 = memref.load %arg2[%c97] : memref<256xf32, #tpu.memory_space<smem>>
    %597 = vector.broadcast %596 : f32 to vector<1x384xf32>
    %598 = arith.mulf %597, %591 : vector<1x384xf32>
    %599 = arith.addf %581, %598 : vector<1x384xf32>
    %c161 = arith.constant 161 : index
    %600 = memref.load %arg2[%c161] : memref<256xf32, #tpu.memory_space<smem>>
    %601 = vector.broadcast %600 : f32 to vector<1x384xf32>
    %602 = arith.mulf %601, %591 : vector<1x384xf32>
    %603 = arith.addf %585, %602 : vector<1x384xf32>
    %c225 = arith.constant 225 : index
    %604 = memref.load %arg2[%c225] : memref<256xf32, #tpu.memory_space<smem>>
    %605 = vector.broadcast %604 : f32 to vector<1x384xf32>
    %606 = arith.mulf %605, %591 : vector<1x384xf32>
    %607 = arith.addf %589, %606 : vector<1x384xf32>
    %c0_101 = arith.constant 0 : index
    %c2_102 = arith.constant 2 : index
    %c48_103 = arith.constant 48 : index
    %608 = vector.load %arg1[%c0_101, %c2_102, %c48_103] : memref<1x4x480xf32, #tpu.memory_space<vmem>>, vector<1x1x384xf32>
    %609 = vector.shape_cast %608 : vector<1x1x384xf32> to vector<1x384xf32>
    %c34 = arith.constant 34 : index
    %610 = memref.load %arg2[%c34] : memref<256xf32, #tpu.memory_space<smem>>
    %611 = vector.broadcast %610 : f32 to vector<1x384xf32>
    %612 = arith.mulf %611, %609 : vector<1x384xf32>
    %613 = arith.addf %595, %612 : vector<1x384xf32>
    %c98 = arith.constant 98 : index
    %614 = memref.load %arg2[%c98] : memref<256xf32, #tpu.memory_space<smem>>
    %615 = vector.broadcast %614 : f32 to vector<1x384xf32>
    %616 = arith.mulf %615, %609 : vector<1x384xf32>
    %617 = arith.addf %599, %616 : vector<1x384xf32>
    %c162 = arith.constant 162 : index
    %618 = memref.load %arg2[%c162] : memref<256xf32, #tpu.memory_space<smem>>
    %619 = vector.broadcast %618 : f32 to vector<1x384xf32>
    %620 = arith.mulf %619, %609 : vector<1x384xf32>
    %621 = arith.addf %603, %620 : vector<1x384xf32>
    %c226 = arith.constant 226 : index
    %622 = memref.load %arg2[%c226] : memref<256xf32, #tpu.memory_space<smem>>
    %623 = vector.broadcast %622 : f32 to vector<1x384xf32>
    %624 = arith.mulf %623, %609 : vector<1x384xf32>
    %625 = arith.addf %607, %624 : vector<1x384xf32>
    %c0_104 = arith.constant 0 : index
    %c3_105 = arith.constant 3 : index
    %c48_106 = arith.constant 48 : index
    %626 = vector.load %arg1[%c0_104, %c3_105, %c48_106] : memref<1x4x480xf32, #tpu.memory_space<vmem>>, vector<1x1x384xf32>
    %627 = vector.shape_cast %626 : vector<1x1x384xf32> to vector<1x384xf32>
    %c35 = arith.constant 35 : index
    %628 = memref.load %arg2[%c35] : memref<256xf32, #tpu.memory_space<smem>>
    %629 = vector.broadcast %628 : f32 to vector<1x384xf32>
    %630 = arith.mulf %629, %627 : vector<1x384xf32>
    %631 = arith.addf %613, %630 : vector<1x384xf32>
    %c99 = arith.constant 99 : index
    %632 = memref.load %arg2[%c99] : memref<256xf32, #tpu.memory_space<smem>>
    %633 = vector.broadcast %632 : f32 to vector<1x384xf32>
    %634 = arith.mulf %633, %627 : vector<1x384xf32>
    %635 = arith.addf %617, %634 : vector<1x384xf32>
    %c163 = arith.constant 163 : index
    %636 = memref.load %arg2[%c163] : memref<256xf32, #tpu.memory_space<smem>>
    %637 = vector.broadcast %636 : f32 to vector<1x384xf32>
    %638 = arith.mulf %637, %627 : vector<1x384xf32>
    %639 = arith.addf %621, %638 : vector<1x384xf32>
    %c227 = arith.constant 227 : index
    %640 = memref.load %arg2[%c227] : memref<256xf32, #tpu.memory_space<smem>>
    %641 = vector.broadcast %640 : f32 to vector<1x384xf32>
    %642 = arith.mulf %641, %627 : vector<1x384xf32>
    %643 = arith.addf %625, %642 : vector<1x384xf32>
    %c0_107 = arith.constant 0 : index
    %c0_108 = arith.constant 0 : index
    %c49 = arith.constant 49 : index
    %644 = vector.load %arg1[%c0_107, %c0_108, %c49] : memref<1x4x480xf32, #tpu.memory_space<vmem>>, vector<1x1x384xf32>
    %645 = vector.shape_cast %644 : vector<1x1x384xf32> to vector<1x384xf32>
    %c36 = arith.constant 36 : index
    %646 = memref.load %arg2[%c36] : memref<256xf32, #tpu.memory_space<smem>>
    %647 = vector.broadcast %646 : f32 to vector<1x384xf32>
    %648 = arith.mulf %647, %645 : vector<1x384xf32>
    %649 = arith.addf %631, %648 : vector<1x384xf32>
    %c100 = arith.constant 100 : index
    %650 = memref.load %arg2[%c100] : memref<256xf32, #tpu.memory_space<smem>>
    %651 = vector.broadcast %650 : f32 to vector<1x384xf32>
    %652 = arith.mulf %651, %645 : vector<1x384xf32>
    %653 = arith.addf %635, %652 : vector<1x384xf32>
    %c164 = arith.constant 164 : index
    %654 = memref.load %arg2[%c164] : memref<256xf32, #tpu.memory_space<smem>>
    %655 = vector.broadcast %654 : f32 to vector<1x384xf32>
    %656 = arith.mulf %655, %645 : vector<1x384xf32>
    %657 = arith.addf %639, %656 : vector<1x384xf32>
    %c228 = arith.constant 228 : index
    %658 = memref.load %arg2[%c228] : memref<256xf32, #tpu.memory_space<smem>>
    %659 = vector.broadcast %658 : f32 to vector<1x384xf32>
    %660 = arith.mulf %659, %645 : vector<1x384xf32>
    %661 = arith.addf %643, %660 : vector<1x384xf32>
    %c0_109 = arith.constant 0 : index
    %c1_110 = arith.constant 1 : index
    %c49_111 = arith.constant 49 : index
    %662 = vector.load %arg1[%c0_109, %c1_110, %c49_111] : memref<1x4x480xf32, #tpu.memory_space<vmem>>, vector<1x1x384xf32>
    %663 = vector.shape_cast %662 : vector<1x1x384xf32> to vector<1x384xf32>
    %c37 = arith.constant 37 : index
    %664 = memref.load %arg2[%c37] : memref<256xf32, #tpu.memory_space<smem>>
    %665 = vector.broadcast %664 : f32 to vector<1x384xf32>
    %666 = arith.mulf %665, %663 : vector<1x384xf32>
    %667 = arith.addf %649, %666 : vector<1x384xf32>
    %c101 = arith.constant 101 : index
    %668 = memref.load %arg2[%c101] : memref<256xf32, #tpu.memory_space<smem>>
    %669 = vector.broadcast %668 : f32 to vector<1x384xf32>
    %670 = arith.mulf %669, %663 : vector<1x384xf32>
    %671 = arith.addf %653, %670 : vector<1x384xf32>
    %c165 = arith.constant 165 : index
    %672 = memref.load %arg2[%c165] : memref<256xf32, #tpu.memory_space<smem>>
    %673 = vector.broadcast %672 : f32 to vector<1x384xf32>
    %674 = arith.mulf %673, %663 : vector<1x384xf32>
    %675 = arith.addf %657, %674 : vector<1x384xf32>
    %c229 = arith.constant 229 : index
    %676 = memref.load %arg2[%c229] : memref<256xf32, #tpu.memory_space<smem>>
    %677 = vector.broadcast %676 : f32 to vector<1x384xf32>
    %678 = arith.mulf %677, %663 : vector<1x384xf32>
    %679 = arith.addf %661, %678 : vector<1x384xf32>
    %c0_112 = arith.constant 0 : index
    %c2_113 = arith.constant 2 : index
    %c49_114 = arith.constant 49 : index
    %680 = vector.load %arg1[%c0_112, %c2_113, %c49_114] : memref<1x4x480xf32, #tpu.memory_space<vmem>>, vector<1x1x384xf32>
    %681 = vector.shape_cast %680 : vector<1x1x384xf32> to vector<1x384xf32>
    %c38 = arith.constant 38 : index
    %682 = memref.load %arg2[%c38] : memref<256xf32, #tpu.memory_space<smem>>
    %683 = vector.broadcast %682 : f32 to vector<1x384xf32>
    %684 = arith.mulf %683, %681 : vector<1x384xf32>
    %685 = arith.addf %667, %684 : vector<1x384xf32>
    %c102 = arith.constant 102 : index
    %686 = memref.load %arg2[%c102] : memref<256xf32, #tpu.memory_space<smem>>
    %687 = vector.broadcast %686 : f32 to vector<1x384xf32>
    %688 = arith.mulf %687, %681 : vector<1x384xf32>
    %689 = arith.addf %671, %688 : vector<1x384xf32>
    %c166 = arith.constant 166 : index
    %690 = memref.load %arg2[%c166] : memref<256xf32, #tpu.memory_space<smem>>
    %691 = vector.broadcast %690 : f32 to vector<1x384xf32>
    %692 = arith.mulf %691, %681 : vector<1x384xf32>
    %693 = arith.addf %675, %692 : vector<1x384xf32>
    %c230 = arith.constant 230 : index
    %694 = memref.load %arg2[%c230] : memref<256xf32, #tpu.memory_space<smem>>
    %695 = vector.broadcast %694 : f32 to vector<1x384xf32>
    %696 = arith.mulf %695, %681 : vector<1x384xf32>
    %697 = arith.addf %679, %696 : vector<1x384xf32>
    %c0_115 = arith.constant 0 : index
    %c3_116 = arith.constant 3 : index
    %c49_117 = arith.constant 49 : index
    %698 = vector.load %arg1[%c0_115, %c3_116, %c49_117] : memref<1x4x480xf32, #tpu.memory_space<vmem>>, vector<1x1x384xf32>
    %699 = vector.shape_cast %698 : vector<1x1x384xf32> to vector<1x384xf32>
    %c39 = arith.constant 39 : index
    %700 = memref.load %arg2[%c39] : memref<256xf32, #tpu.memory_space<smem>>
    %701 = vector.broadcast %700 : f32 to vector<1x384xf32>
    %702 = arith.mulf %701, %699 : vector<1x384xf32>
    %703 = arith.addf %685, %702 : vector<1x384xf32>
    %c103 = arith.constant 103 : index
    %704 = memref.load %arg2[%c103] : memref<256xf32, #tpu.memory_space<smem>>
    %705 = vector.broadcast %704 : f32 to vector<1x384xf32>
    %706 = arith.mulf %705, %699 : vector<1x384xf32>
    %707 = arith.addf %689, %706 : vector<1x384xf32>
    %c167 = arith.constant 167 : index
    %708 = memref.load %arg2[%c167] : memref<256xf32, #tpu.memory_space<smem>>
    %709 = vector.broadcast %708 : f32 to vector<1x384xf32>
    %710 = arith.mulf %709, %699 : vector<1x384xf32>
    %711 = arith.addf %693, %710 : vector<1x384xf32>
    %c231 = arith.constant 231 : index
    %712 = memref.load %arg2[%c231] : memref<256xf32, #tpu.memory_space<smem>>
    %713 = vector.broadcast %712 : f32 to vector<1x384xf32>
    %714 = arith.mulf %713, %699 : vector<1x384xf32>
    %715 = arith.addf %697, %714 : vector<1x384xf32>
    %c0_118 = arith.constant 0 : index
    %c0_119 = arith.constant 0 : index
    %c50 = arith.constant 50 : index
    %716 = vector.load %arg1[%c0_118, %c0_119, %c50] : memref<1x4x480xf32, #tpu.memory_space<vmem>>, vector<1x1x384xf32>
    %717 = vector.shape_cast %716 : vector<1x1x384xf32> to vector<1x384xf32>
    %c40 = arith.constant 40 : index
    %718 = memref.load %arg2[%c40] : memref<256xf32, #tpu.memory_space<smem>>
    %719 = vector.broadcast %718 : f32 to vector<1x384xf32>
    %720 = arith.mulf %719, %717 : vector<1x384xf32>
    %721 = arith.addf %703, %720 : vector<1x384xf32>
    %c104 = arith.constant 104 : index
    %722 = memref.load %arg2[%c104] : memref<256xf32, #tpu.memory_space<smem>>
    %723 = vector.broadcast %722 : f32 to vector<1x384xf32>
    %724 = arith.mulf %723, %717 : vector<1x384xf32>
    %725 = arith.addf %707, %724 : vector<1x384xf32>
    %c168 = arith.constant 168 : index
    %726 = memref.load %arg2[%c168] : memref<256xf32, #tpu.memory_space<smem>>
    %727 = vector.broadcast %726 : f32 to vector<1x384xf32>
    %728 = arith.mulf %727, %717 : vector<1x384xf32>
    %729 = arith.addf %711, %728 : vector<1x384xf32>
    %c232 = arith.constant 232 : index
    %730 = memref.load %arg2[%c232] : memref<256xf32, #tpu.memory_space<smem>>
    %731 = vector.broadcast %730 : f32 to vector<1x384xf32>
    %732 = arith.mulf %731, %717 : vector<1x384xf32>
    %733 = arith.addf %715, %732 : vector<1x384xf32>
    %c0_120 = arith.constant 0 : index
    %c1_121 = arith.constant 1 : index
    %c50_122 = arith.constant 50 : index
    %734 = vector.load %arg1[%c0_120, %c1_121, %c50_122] : memref<1x4x480xf32, #tpu.memory_space<vmem>>, vector<1x1x384xf32>
    %735 = vector.shape_cast %734 : vector<1x1x384xf32> to vector<1x384xf32>
    %c41 = arith.constant 41 : index
    %736 = memref.load %arg2[%c41] : memref<256xf32, #tpu.memory_space<smem>>
    %737 = vector.broadcast %736 : f32 to vector<1x384xf32>
    %738 = arith.mulf %737, %735 : vector<1x384xf32>
    %739 = arith.addf %721, %738 : vector<1x384xf32>
    %c105 = arith.constant 105 : index
    %740 = memref.load %arg2[%c105] : memref<256xf32, #tpu.memory_space<smem>>
    %741 = vector.broadcast %740 : f32 to vector<1x384xf32>
    %742 = arith.mulf %741, %735 : vector<1x384xf32>
    %743 = arith.addf %725, %742 : vector<1x384xf32>
    %c169 = arith.constant 169 : index
    %744 = memref.load %arg2[%c169] : memref<256xf32, #tpu.memory_space<smem>>
    %745 = vector.broadcast %744 : f32 to vector<1x384xf32>
    %746 = arith.mulf %745, %735 : vector<1x384xf32>
    %747 = arith.addf %729, %746 : vector<1x384xf32>
    %c233 = arith.constant 233 : index
    %748 = memref.load %arg2[%c233] : memref<256xf32, #tpu.memory_space<smem>>
    %749 = vector.broadcast %748 : f32 to vector<1x384xf32>
    %750 = arith.mulf %749, %735 : vector<1x384xf32>
    %751 = arith.addf %733, %750 : vector<1x384xf32>
    %c0_123 = arith.constant 0 : index
    %c2_124 = arith.constant 2 : index
    %c50_125 = arith.constant 50 : index
    %752 = vector.load %arg1[%c0_123, %c2_124, %c50_125] : memref<1x4x480xf32, #tpu.memory_space<vmem>>, vector<1x1x384xf32>
    %753 = vector.shape_cast %752 : vector<1x1x384xf32> to vector<1x384xf32>
    %c42 = arith.constant 42 : index
    %754 = memref.load %arg2[%c42] : memref<256xf32, #tpu.memory_space<smem>>
    %755 = vector.broadcast %754 : f32 to vector<1x384xf32>
    %756 = arith.mulf %755, %753 : vector<1x384xf32>
    %757 = arith.addf %739, %756 : vector<1x384xf32>
    %c106 = arith.constant 106 : index
    %758 = memref.load %arg2[%c106] : memref<256xf32, #tpu.memory_space<smem>>
    %759 = vector.broadcast %758 : f32 to vector<1x384xf32>
    %760 = arith.mulf %759, %753 : vector<1x384xf32>
    %761 = arith.addf %743, %760 : vector<1x384xf32>
    %c170 = arith.constant 170 : index
    %762 = memref.load %arg2[%c170] : memref<256xf32, #tpu.memory_space<smem>>
    %763 = vector.broadcast %762 : f32 to vector<1x384xf32>
    %764 = arith.mulf %763, %753 : vector<1x384xf32>
    %765 = arith.addf %747, %764 : vector<1x384xf32>
    %c234 = arith.constant 234 : index
    %766 = memref.load %arg2[%c234] : memref<256xf32, #tpu.memory_space<smem>>
    %767 = vector.broadcast %766 : f32 to vector<1x384xf32>
    %768 = arith.mulf %767, %753 : vector<1x384xf32>
    %769 = arith.addf %751, %768 : vector<1x384xf32>
    %c0_126 = arith.constant 0 : index
    %c3_127 = arith.constant 3 : index
    %c50_128 = arith.constant 50 : index
    %770 = vector.load %arg1[%c0_126, %c3_127, %c50_128] : memref<1x4x480xf32, #tpu.memory_space<vmem>>, vector<1x1x384xf32>
    %771 = vector.shape_cast %770 : vector<1x1x384xf32> to vector<1x384xf32>
    %c43 = arith.constant 43 : index
    %772 = memref.load %arg2[%c43] : memref<256xf32, #tpu.memory_space<smem>>
    %773 = vector.broadcast %772 : f32 to vector<1x384xf32>
    %774 = arith.mulf %773, %771 : vector<1x384xf32>
    %775 = arith.addf %757, %774 : vector<1x384xf32>
    %c107 = arith.constant 107 : index
    %776 = memref.load %arg2[%c107] : memref<256xf32, #tpu.memory_space<smem>>
    %777 = vector.broadcast %776 : f32 to vector<1x384xf32>
    %778 = arith.mulf %777, %771 : vector<1x384xf32>
    %779 = arith.addf %761, %778 : vector<1x384xf32>
    %c171 = arith.constant 171 : index
    %780 = memref.load %arg2[%c171] : memref<256xf32, #tpu.memory_space<smem>>
    %781 = vector.broadcast %780 : f32 to vector<1x384xf32>
    %782 = arith.mulf %781, %771 : vector<1x384xf32>
    %783 = arith.addf %765, %782 : vector<1x384xf32>
    %c235 = arith.constant 235 : index
    %784 = memref.load %arg2[%c235] : memref<256xf32, #tpu.memory_space<smem>>
    %785 = vector.broadcast %784 : f32 to vector<1x384xf32>
    %786 = arith.mulf %785, %771 : vector<1x384xf32>
    %787 = arith.addf %769, %786 : vector<1x384xf32>
    %c0_129 = arith.constant 0 : index
    %c0_130 = arith.constant 0 : index
    %c51 = arith.constant 51 : index
    %788 = vector.load %arg1[%c0_129, %c0_130, %c51] : memref<1x4x480xf32, #tpu.memory_space<vmem>>, vector<1x1x384xf32>
    %789 = vector.shape_cast %788 : vector<1x1x384xf32> to vector<1x384xf32>
    %c44 = arith.constant 44 : index
    %790 = memref.load %arg2[%c44] : memref<256xf32, #tpu.memory_space<smem>>
    %791 = vector.broadcast %790 : f32 to vector<1x384xf32>
    %792 = arith.mulf %791, %789 : vector<1x384xf32>
    %793 = arith.addf %775, %792 : vector<1x384xf32>
    %c108 = arith.constant 108 : index
    %794 = memref.load %arg2[%c108] : memref<256xf32, #tpu.memory_space<smem>>
    %795 = vector.broadcast %794 : f32 to vector<1x384xf32>
    %796 = arith.mulf %795, %789 : vector<1x384xf32>
    %797 = arith.addf %779, %796 : vector<1x384xf32>
    %c172 = arith.constant 172 : index
    %798 = memref.load %arg2[%c172] : memref<256xf32, #tpu.memory_space<smem>>
    %799 = vector.broadcast %798 : f32 to vector<1x384xf32>
    %800 = arith.mulf %799, %789 : vector<1x384xf32>
    %801 = arith.addf %783, %800 : vector<1x384xf32>
    %c236 = arith.constant 236 : index
    %802 = memref.load %arg2[%c236] : memref<256xf32, #tpu.memory_space<smem>>
    %803 = vector.broadcast %802 : f32 to vector<1x384xf32>
    %804 = arith.mulf %803, %789 : vector<1x384xf32>
    %805 = arith.addf %787, %804 : vector<1x384xf32>
    %c0_131 = arith.constant 0 : index
    %c1_132 = arith.constant 1 : index
    %c51_133 = arith.constant 51 : index
    %806 = vector.load %arg1[%c0_131, %c1_132, %c51_133] : memref<1x4x480xf32, #tpu.memory_space<vmem>>, vector<1x1x384xf32>
    %807 = vector.shape_cast %806 : vector<1x1x384xf32> to vector<1x384xf32>
    %c45 = arith.constant 45 : index
    %808 = memref.load %arg2[%c45] : memref<256xf32, #tpu.memory_space<smem>>
    %809 = vector.broadcast %808 : f32 to vector<1x384xf32>
    %810 = arith.mulf %809, %807 : vector<1x384xf32>
    %811 = arith.addf %793, %810 : vector<1x384xf32>
    %c109 = arith.constant 109 : index
    %812 = memref.load %arg2[%c109] : memref<256xf32, #tpu.memory_space<smem>>
    %813 = vector.broadcast %812 : f32 to vector<1x384xf32>
    %814 = arith.mulf %813, %807 : vector<1x384xf32>
    %815 = arith.addf %797, %814 : vector<1x384xf32>
    %c173 = arith.constant 173 : index
    %816 = memref.load %arg2[%c173] : memref<256xf32, #tpu.memory_space<smem>>
    %817 = vector.broadcast %816 : f32 to vector<1x384xf32>
    %818 = arith.mulf %817, %807 : vector<1x384xf32>
    %819 = arith.addf %801, %818 : vector<1x384xf32>
    %c237 = arith.constant 237 : index
    %820 = memref.load %arg2[%c237] : memref<256xf32, #tpu.memory_space<smem>>
    %821 = vector.broadcast %820 : f32 to vector<1x384xf32>
    %822 = arith.mulf %821, %807 : vector<1x384xf32>
    %823 = arith.addf %805, %822 : vector<1x384xf32>
    %c0_134 = arith.constant 0 : index
    %c2_135 = arith.constant 2 : index
    %c51_136 = arith.constant 51 : index
    %824 = vector.load %arg1[%c0_134, %c2_135, %c51_136] : memref<1x4x480xf32, #tpu.memory_space<vmem>>, vector<1x1x384xf32>
    %825 = vector.shape_cast %824 : vector<1x1x384xf32> to vector<1x384xf32>
    %c46 = arith.constant 46 : index
    %826 = memref.load %arg2[%c46] : memref<256xf32, #tpu.memory_space<smem>>
    %827 = vector.broadcast %826 : f32 to vector<1x384xf32>
    %828 = arith.mulf %827, %825 : vector<1x384xf32>
    %829 = arith.addf %811, %828 : vector<1x384xf32>
    %c110 = arith.constant 110 : index
    %830 = memref.load %arg2[%c110] : memref<256xf32, #tpu.memory_space<smem>>
    %831 = vector.broadcast %830 : f32 to vector<1x384xf32>
    %832 = arith.mulf %831, %825 : vector<1x384xf32>
    %833 = arith.addf %815, %832 : vector<1x384xf32>
    %c174 = arith.constant 174 : index
    %834 = memref.load %arg2[%c174] : memref<256xf32, #tpu.memory_space<smem>>
    %835 = vector.broadcast %834 : f32 to vector<1x384xf32>
    %836 = arith.mulf %835, %825 : vector<1x384xf32>
    %837 = arith.addf %819, %836 : vector<1x384xf32>
    %c238 = arith.constant 238 : index
    %838 = memref.load %arg2[%c238] : memref<256xf32, #tpu.memory_space<smem>>
    %839 = vector.broadcast %838 : f32 to vector<1x384xf32>
    %840 = arith.mulf %839, %825 : vector<1x384xf32>
    %841 = arith.addf %823, %840 : vector<1x384xf32>
    %c0_137 = arith.constant 0 : index
    %c3_138 = arith.constant 3 : index
    %c51_139 = arith.constant 51 : index
    %842 = vector.load %arg1[%c0_137, %c3_138, %c51_139] : memref<1x4x480xf32, #tpu.memory_space<vmem>>, vector<1x1x384xf32>
    %843 = vector.shape_cast %842 : vector<1x1x384xf32> to vector<1x384xf32>
    %c47 = arith.constant 47 : index
    %844 = memref.load %arg2[%c47] : memref<256xf32, #tpu.memory_space<smem>>
    %845 = vector.broadcast %844 : f32 to vector<1x384xf32>
    %846 = arith.mulf %845, %843 : vector<1x384xf32>
    %847 = arith.addf %829, %846 : vector<1x384xf32>
    %c111 = arith.constant 111 : index
    %848 = memref.load %arg2[%c111] : memref<256xf32, #tpu.memory_space<smem>>
    %849 = vector.broadcast %848 : f32 to vector<1x384xf32>
    %850 = arith.mulf %849, %843 : vector<1x384xf32>
    %851 = arith.addf %833, %850 : vector<1x384xf32>
    %c175 = arith.constant 175 : index
    %852 = memref.load %arg2[%c175] : memref<256xf32, #tpu.memory_space<smem>>
    %853 = vector.broadcast %852 : f32 to vector<1x384xf32>
    %854 = arith.mulf %853, %843 : vector<1x384xf32>
    %855 = arith.addf %837, %854 : vector<1x384xf32>
    %c239 = arith.constant 239 : index
    %856 = memref.load %arg2[%c239] : memref<256xf32, #tpu.memory_space<smem>>
    %857 = vector.broadcast %856 : f32 to vector<1x384xf32>
    %858 = arith.mulf %857, %843 : vector<1x384xf32>
    %859 = arith.addf %841, %858 : vector<1x384xf32>
    %c0_140 = arith.constant 0 : index
    %c0_141 = arith.constant 0 : index
    %c72_142 = arith.constant 72 : index
    %860 = vector.load %arg1[%c0_140, %c0_141, %c72_142] : memref<1x4x480xf32, #tpu.memory_space<vmem>>, vector<1x1x384xf32>
    %861 = vector.shape_cast %860 : vector<1x1x384xf32> to vector<1x384xf32>
    %c48_143 = arith.constant 48 : index
    %862 = memref.load %arg2[%c48_143] : memref<256xf32, #tpu.memory_space<smem>>
    %863 = vector.broadcast %862 : f32 to vector<1x384xf32>
    %864 = arith.mulf %863, %861 : vector<1x384xf32>
    %865 = arith.addf %847, %864 : vector<1x384xf32>
    %c112 = arith.constant 112 : index
    %866 = memref.load %arg2[%c112] : memref<256xf32, #tpu.memory_space<smem>>
    %867 = vector.broadcast %866 : f32 to vector<1x384xf32>
    %868 = arith.mulf %867, %861 : vector<1x384xf32>
    %869 = arith.addf %851, %868 : vector<1x384xf32>
    %c176 = arith.constant 176 : index
    %870 = memref.load %arg2[%c176] : memref<256xf32, #tpu.memory_space<smem>>
    %871 = vector.broadcast %870 : f32 to vector<1x384xf32>
    %872 = arith.mulf %871, %861 : vector<1x384xf32>
    %873 = arith.addf %855, %872 : vector<1x384xf32>
    %c240 = arith.constant 240 : index
    %874 = memref.load %arg2[%c240] : memref<256xf32, #tpu.memory_space<smem>>
    %875 = vector.broadcast %874 : f32 to vector<1x384xf32>
    %876 = arith.mulf %875, %861 : vector<1x384xf32>
    %877 = arith.addf %859, %876 : vector<1x384xf32>
    %c0_144 = arith.constant 0 : index
    %c1_145 = arith.constant 1 : index
    %c72_146 = arith.constant 72 : index
    %878 = vector.load %arg1[%c0_144, %c1_145, %c72_146] : memref<1x4x480xf32, #tpu.memory_space<vmem>>, vector<1x1x384xf32>
    %879 = vector.shape_cast %878 : vector<1x1x384xf32> to vector<1x384xf32>
    %c49_147 = arith.constant 49 : index
    %880 = memref.load %arg2[%c49_147] : memref<256xf32, #tpu.memory_space<smem>>
    %881 = vector.broadcast %880 : f32 to vector<1x384xf32>
    %882 = arith.mulf %881, %879 : vector<1x384xf32>
    %883 = arith.addf %865, %882 : vector<1x384xf32>
    %c113 = arith.constant 113 : index
    %884 = memref.load %arg2[%c113] : memref<256xf32, #tpu.memory_space<smem>>
    %885 = vector.broadcast %884 : f32 to vector<1x384xf32>
    %886 = arith.mulf %885, %879 : vector<1x384xf32>
    %887 = arith.addf %869, %886 : vector<1x384xf32>
    %c177 = arith.constant 177 : index
    %888 = memref.load %arg2[%c177] : memref<256xf32, #tpu.memory_space<smem>>
    %889 = vector.broadcast %888 : f32 to vector<1x384xf32>
    %890 = arith.mulf %889, %879 : vector<1x384xf32>
    %891 = arith.addf %873, %890 : vector<1x384xf32>
    %c241 = arith.constant 241 : index
    %892 = memref.load %arg2[%c241] : memref<256xf32, #tpu.memory_space<smem>>
    %893 = vector.broadcast %892 : f32 to vector<1x384xf32>
    %894 = arith.mulf %893, %879 : vector<1x384xf32>
    %895 = arith.addf %877, %894 : vector<1x384xf32>
    %c0_148 = arith.constant 0 : index
    %c2_149 = arith.constant 2 : index
    %c72_150 = arith.constant 72 : index
    %896 = vector.load %arg1[%c0_148, %c2_149, %c72_150] : memref<1x4x480xf32, #tpu.memory_space<vmem>>, vector<1x1x384xf32>
    %897 = vector.shape_cast %896 : vector<1x1x384xf32> to vector<1x384xf32>
    %c50_151 = arith.constant 50 : index
    %898 = memref.load %arg2[%c50_151] : memref<256xf32, #tpu.memory_space<smem>>
    %899 = vector.broadcast %898 : f32 to vector<1x384xf32>
    %900 = arith.mulf %899, %897 : vector<1x384xf32>
    %901 = arith.addf %883, %900 : vector<1x384xf32>
    %c114 = arith.constant 114 : index
    %902 = memref.load %arg2[%c114] : memref<256xf32, #tpu.memory_space<smem>>
    %903 = vector.broadcast %902 : f32 to vector<1x384xf32>
    %904 = arith.mulf %903, %897 : vector<1x384xf32>
    %905 = arith.addf %887, %904 : vector<1x384xf32>
    %c178 = arith.constant 178 : index
    %906 = memref.load %arg2[%c178] : memref<256xf32, #tpu.memory_space<smem>>
    %907 = vector.broadcast %906 : f32 to vector<1x384xf32>
    %908 = arith.mulf %907, %897 : vector<1x384xf32>
    %909 = arith.addf %891, %908 : vector<1x384xf32>
    %c242 = arith.constant 242 : index
    %910 = memref.load %arg2[%c242] : memref<256xf32, #tpu.memory_space<smem>>
    %911 = vector.broadcast %910 : f32 to vector<1x384xf32>
    %912 = arith.mulf %911, %897 : vector<1x384xf32>
    %913 = arith.addf %895, %912 : vector<1x384xf32>
    %c0_152 = arith.constant 0 : index
    %c3_153 = arith.constant 3 : index
    %c72_154 = arith.constant 72 : index
    %914 = vector.load %arg1[%c0_152, %c3_153, %c72_154] : memref<1x4x480xf32, #tpu.memory_space<vmem>>, vector<1x1x384xf32>
    %915 = vector.shape_cast %914 : vector<1x1x384xf32> to vector<1x384xf32>
    %c51_155 = arith.constant 51 : index
    %916 = memref.load %arg2[%c51_155] : memref<256xf32, #tpu.memory_space<smem>>
    %917 = vector.broadcast %916 : f32 to vector<1x384xf32>
    %918 = arith.mulf %917, %915 : vector<1x384xf32>
    %919 = arith.addf %901, %918 : vector<1x384xf32>
    %c115 = arith.constant 115 : index
    %920 = memref.load %arg2[%c115] : memref<256xf32, #tpu.memory_space<smem>>
    %921 = vector.broadcast %920 : f32 to vector<1x384xf32>
    %922 = arith.mulf %921, %915 : vector<1x384xf32>
    %923 = arith.addf %905, %922 : vector<1x384xf32>
    %c179 = arith.constant 179 : index
    %924 = memref.load %arg2[%c179] : memref<256xf32, #tpu.memory_space<smem>>
    %925 = vector.broadcast %924 : f32 to vector<1x384xf32>
    %926 = arith.mulf %925, %915 : vector<1x384xf32>
    %927 = arith.addf %909, %926 : vector<1x384xf32>
    %c243 = arith.constant 243 : index
    %928 = memref.load %arg2[%c243] : memref<256xf32, #tpu.memory_space<smem>>
    %929 = vector.broadcast %928 : f32 to vector<1x384xf32>
    %930 = arith.mulf %929, %915 : vector<1x384xf32>
    %931 = arith.addf %913, %930 : vector<1x384xf32>
    %c0_156 = arith.constant 0 : index
    %c0_157 = arith.constant 0 : index
    %c73_158 = arith.constant 73 : index
    %932 = vector.load %arg1[%c0_156, %c0_157, %c73_158] : memref<1x4x480xf32, #tpu.memory_space<vmem>>, vector<1x1x384xf32>
    %933 = vector.shape_cast %932 : vector<1x1x384xf32> to vector<1x384xf32>
    %c52 = arith.constant 52 : index
    %934 = memref.load %arg2[%c52] : memref<256xf32, #tpu.memory_space<smem>>
    %935 = vector.broadcast %934 : f32 to vector<1x384xf32>
    %936 = arith.mulf %935, %933 : vector<1x384xf32>
    %937 = arith.addf %919, %936 : vector<1x384xf32>
    %c116 = arith.constant 116 : index
    %938 = memref.load %arg2[%c116] : memref<256xf32, #tpu.memory_space<smem>>
    %939 = vector.broadcast %938 : f32 to vector<1x384xf32>
    %940 = arith.mulf %939, %933 : vector<1x384xf32>
    %941 = arith.addf %923, %940 : vector<1x384xf32>
    %c180 = arith.constant 180 : index
    %942 = memref.load %arg2[%c180] : memref<256xf32, #tpu.memory_space<smem>>
    %943 = vector.broadcast %942 : f32 to vector<1x384xf32>
    %944 = arith.mulf %943, %933 : vector<1x384xf32>
    %945 = arith.addf %927, %944 : vector<1x384xf32>
    %c244 = arith.constant 244 : index
    %946 = memref.load %arg2[%c244] : memref<256xf32, #tpu.memory_space<smem>>
    %947 = vector.broadcast %946 : f32 to vector<1x384xf32>
    %948 = arith.mulf %947, %933 : vector<1x384xf32>
    %949 = arith.addf %931, %948 : vector<1x384xf32>
    %c0_159 = arith.constant 0 : index
    %c1_160 = arith.constant 1 : index
    %c73_161 = arith.constant 73 : index
    %950 = vector.load %arg1[%c0_159, %c1_160, %c73_161] : memref<1x4x480xf32, #tpu.memory_space<vmem>>, vector<1x1x384xf32>
    %951 = vector.shape_cast %950 : vector<1x1x384xf32> to vector<1x384xf32>
    %c53 = arith.constant 53 : index
    %952 = memref.load %arg2[%c53] : memref<256xf32, #tpu.memory_space<smem>>
    %953 = vector.broadcast %952 : f32 to vector<1x384xf32>
    %954 = arith.mulf %953, %951 : vector<1x384xf32>
    %955 = arith.addf %937, %954 : vector<1x384xf32>
    %c117 = arith.constant 117 : index
    %956 = memref.load %arg2[%c117] : memref<256xf32, #tpu.memory_space<smem>>
    %957 = vector.broadcast %956 : f32 to vector<1x384xf32>
    %958 = arith.mulf %957, %951 : vector<1x384xf32>
    %959 = arith.addf %941, %958 : vector<1x384xf32>
    %c181 = arith.constant 181 : index
    %960 = memref.load %arg2[%c181] : memref<256xf32, #tpu.memory_space<smem>>
    %961 = vector.broadcast %960 : f32 to vector<1x384xf32>
    %962 = arith.mulf %961, %951 : vector<1x384xf32>
    %963 = arith.addf %945, %962 : vector<1x384xf32>
    %c245 = arith.constant 245 : index
    %964 = memref.load %arg2[%c245] : memref<256xf32, #tpu.memory_space<smem>>
    %965 = vector.broadcast %964 : f32 to vector<1x384xf32>
    %966 = arith.mulf %965, %951 : vector<1x384xf32>
    %967 = arith.addf %949, %966 : vector<1x384xf32>
    %c0_162 = arith.constant 0 : index
    %c2_163 = arith.constant 2 : index
    %c73_164 = arith.constant 73 : index
    %968 = vector.load %arg1[%c0_162, %c2_163, %c73_164] : memref<1x4x480xf32, #tpu.memory_space<vmem>>, vector<1x1x384xf32>
    %969 = vector.shape_cast %968 : vector<1x1x384xf32> to vector<1x384xf32>
    %c54 = arith.constant 54 : index
    %970 = memref.load %arg2[%c54] : memref<256xf32, #tpu.memory_space<smem>>
    %971 = vector.broadcast %970 : f32 to vector<1x384xf32>
    %972 = arith.mulf %971, %969 : vector<1x384xf32>
    %973 = arith.addf %955, %972 : vector<1x384xf32>
    %c118 = arith.constant 118 : index
    %974 = memref.load %arg2[%c118] : memref<256xf32, #tpu.memory_space<smem>>
    %975 = vector.broadcast %974 : f32 to vector<1x384xf32>
    %976 = arith.mulf %975, %969 : vector<1x384xf32>
    %977 = arith.addf %959, %976 : vector<1x384xf32>
    %c182 = arith.constant 182 : index
    %978 = memref.load %arg2[%c182] : memref<256xf32, #tpu.memory_space<smem>>
    %979 = vector.broadcast %978 : f32 to vector<1x384xf32>
    %980 = arith.mulf %979, %969 : vector<1x384xf32>
    %981 = arith.addf %963, %980 : vector<1x384xf32>
    %c246 = arith.constant 246 : index
    %982 = memref.load %arg2[%c246] : memref<256xf32, #tpu.memory_space<smem>>
    %983 = vector.broadcast %982 : f32 to vector<1x384xf32>
    %984 = arith.mulf %983, %969 : vector<1x384xf32>
    %985 = arith.addf %967, %984 : vector<1x384xf32>
    %c0_165 = arith.constant 0 : index
    %c3_166 = arith.constant 3 : index
    %c73_167 = arith.constant 73 : index
    %986 = vector.load %arg1[%c0_165, %c3_166, %c73_167] : memref<1x4x480xf32, #tpu.memory_space<vmem>>, vector<1x1x384xf32>
    %987 = vector.shape_cast %986 : vector<1x1x384xf32> to vector<1x384xf32>
    %c55 = arith.constant 55 : index
    %988 = memref.load %arg2[%c55] : memref<256xf32, #tpu.memory_space<smem>>
    %989 = vector.broadcast %988 : f32 to vector<1x384xf32>
    %990 = arith.mulf %989, %987 : vector<1x384xf32>
    %991 = arith.addf %973, %990 : vector<1x384xf32>
    %c119 = arith.constant 119 : index
    %992 = memref.load %arg2[%c119] : memref<256xf32, #tpu.memory_space<smem>>
    %993 = vector.broadcast %992 : f32 to vector<1x384xf32>
    %994 = arith.mulf %993, %987 : vector<1x384xf32>
    %995 = arith.addf %977, %994 : vector<1x384xf32>
    %c183 = arith.constant 183 : index
    %996 = memref.load %arg2[%c183] : memref<256xf32, #tpu.memory_space<smem>>
    %997 = vector.broadcast %996 : f32 to vector<1x384xf32>
    %998 = arith.mulf %997, %987 : vector<1x384xf32>
    %999 = arith.addf %981, %998 : vector<1x384xf32>
    %c247 = arith.constant 247 : index
    %1000 = memref.load %arg2[%c247] : memref<256xf32, #tpu.memory_space<smem>>
    %1001 = vector.broadcast %1000 : f32 to vector<1x384xf32>
    %1002 = arith.mulf %1001, %987 : vector<1x384xf32>
    %1003 = arith.addf %985, %1002 : vector<1x384xf32>
    %c0_168 = arith.constant 0 : index
    %c0_169 = arith.constant 0 : index
    %c74_170 = arith.constant 74 : index
    %1004 = vector.load %arg1[%c0_168, %c0_169, %c74_170] : memref<1x4x480xf32, #tpu.memory_space<vmem>>, vector<1x1x384xf32>
    %1005 = vector.shape_cast %1004 : vector<1x1x384xf32> to vector<1x384xf32>
    %c56 = arith.constant 56 : index
    %1006 = memref.load %arg2[%c56] : memref<256xf32, #tpu.memory_space<smem>>
    %1007 = vector.broadcast %1006 : f32 to vector<1x384xf32>
    %1008 = arith.mulf %1007, %1005 : vector<1x384xf32>
    %1009 = arith.addf %991, %1008 : vector<1x384xf32>
    %c120 = arith.constant 120 : index
    %1010 = memref.load %arg2[%c120] : memref<256xf32, #tpu.memory_space<smem>>
    %1011 = vector.broadcast %1010 : f32 to vector<1x384xf32>
    %1012 = arith.mulf %1011, %1005 : vector<1x384xf32>
    %1013 = arith.addf %995, %1012 : vector<1x384xf32>
    %c184 = arith.constant 184 : index
    %1014 = memref.load %arg2[%c184] : memref<256xf32, #tpu.memory_space<smem>>
    %1015 = vector.broadcast %1014 : f32 to vector<1x384xf32>
    %1016 = arith.mulf %1015, %1005 : vector<1x384xf32>
    %1017 = arith.addf %999, %1016 : vector<1x384xf32>
    %c248 = arith.constant 248 : index
    %1018 = memref.load %arg2[%c248] : memref<256xf32, #tpu.memory_space<smem>>
    %1019 = vector.broadcast %1018 : f32 to vector<1x384xf32>
    %1020 = arith.mulf %1019, %1005 : vector<1x384xf32>
    %1021 = arith.addf %1003, %1020 : vector<1x384xf32>
    %c0_171 = arith.constant 0 : index
    %c1_172 = arith.constant 1 : index
    %c74_173 = arith.constant 74 : index
    %1022 = vector.load %arg1[%c0_171, %c1_172, %c74_173] : memref<1x4x480xf32, #tpu.memory_space<vmem>>, vector<1x1x384xf32>
    %1023 = vector.shape_cast %1022 : vector<1x1x384xf32> to vector<1x384xf32>
    %c57 = arith.constant 57 : index
    %1024 = memref.load %arg2[%c57] : memref<256xf32, #tpu.memory_space<smem>>
    %1025 = vector.broadcast %1024 : f32 to vector<1x384xf32>
    %1026 = arith.mulf %1025, %1023 : vector<1x384xf32>
    %1027 = arith.addf %1009, %1026 : vector<1x384xf32>
    %c121 = arith.constant 121 : index
    %1028 = memref.load %arg2[%c121] : memref<256xf32, #tpu.memory_space<smem>>
    %1029 = vector.broadcast %1028 : f32 to vector<1x384xf32>
    %1030 = arith.mulf %1029, %1023 : vector<1x384xf32>
    %1031 = arith.addf %1013, %1030 : vector<1x384xf32>
    %c185 = arith.constant 185 : index
    %1032 = memref.load %arg2[%c185] : memref<256xf32, #tpu.memory_space<smem>>
    %1033 = vector.broadcast %1032 : f32 to vector<1x384xf32>
    %1034 = arith.mulf %1033, %1023 : vector<1x384xf32>
    %1035 = arith.addf %1017, %1034 : vector<1x384xf32>
    %c249 = arith.constant 249 : index
    %1036 = memref.load %arg2[%c249] : memref<256xf32, #tpu.memory_space<smem>>
    %1037 = vector.broadcast %1036 : f32 to vector<1x384xf32>
    %1038 = arith.mulf %1037, %1023 : vector<1x384xf32>
    %1039 = arith.addf %1021, %1038 : vector<1x384xf32>
    %c0_174 = arith.constant 0 : index
    %c2_175 = arith.constant 2 : index
    %c74_176 = arith.constant 74 : index
    %1040 = vector.load %arg1[%c0_174, %c2_175, %c74_176] : memref<1x4x480xf32, #tpu.memory_space<vmem>>, vector<1x1x384xf32>
    %1041 = vector.shape_cast %1040 : vector<1x1x384xf32> to vector<1x384xf32>
    %c58 = arith.constant 58 : index
    %1042 = memref.load %arg2[%c58] : memref<256xf32, #tpu.memory_space<smem>>
    %1043 = vector.broadcast %1042 : f32 to vector<1x384xf32>
    %1044 = arith.mulf %1043, %1041 : vector<1x384xf32>
    %1045 = arith.addf %1027, %1044 : vector<1x384xf32>
    %c122 = arith.constant 122 : index
    %1046 = memref.load %arg2[%c122] : memref<256xf32, #tpu.memory_space<smem>>
    %1047 = vector.broadcast %1046 : f32 to vector<1x384xf32>
    %1048 = arith.mulf %1047, %1041 : vector<1x384xf32>
    %1049 = arith.addf %1031, %1048 : vector<1x384xf32>
    %c186 = arith.constant 186 : index
    %1050 = memref.load %arg2[%c186] : memref<256xf32, #tpu.memory_space<smem>>
    %1051 = vector.broadcast %1050 : f32 to vector<1x384xf32>
    %1052 = arith.mulf %1051, %1041 : vector<1x384xf32>
    %1053 = arith.addf %1035, %1052 : vector<1x384xf32>
    %c250 = arith.constant 250 : index
    %1054 = memref.load %arg2[%c250] : memref<256xf32, #tpu.memory_space<smem>>
    %1055 = vector.broadcast %1054 : f32 to vector<1x384xf32>
    %1056 = arith.mulf %1055, %1041 : vector<1x384xf32>
    %1057 = arith.addf %1039, %1056 : vector<1x384xf32>
    %c0_177 = arith.constant 0 : index
    %c3_178 = arith.constant 3 : index
    %c74_179 = arith.constant 74 : index
    %1058 = vector.load %arg1[%c0_177, %c3_178, %c74_179] : memref<1x4x480xf32, #tpu.memory_space<vmem>>, vector<1x1x384xf32>
    %1059 = vector.shape_cast %1058 : vector<1x1x384xf32> to vector<1x384xf32>
    %c59 = arith.constant 59 : index
    %1060 = memref.load %arg2[%c59] : memref<256xf32, #tpu.memory_space<smem>>
    %1061 = vector.broadcast %1060 : f32 to vector<1x384xf32>
    %1062 = arith.mulf %1061, %1059 : vector<1x384xf32>
    %1063 = arith.addf %1045, %1062 : vector<1x384xf32>
    %c123 = arith.constant 123 : index
    %1064 = memref.load %arg2[%c123] : memref<256xf32, #tpu.memory_space<smem>>
    %1065 = vector.broadcast %1064 : f32 to vector<1x384xf32>
    %1066 = arith.mulf %1065, %1059 : vector<1x384xf32>
    %1067 = arith.addf %1049, %1066 : vector<1x384xf32>
    %c187 = arith.constant 187 : index
    %1068 = memref.load %arg2[%c187] : memref<256xf32, #tpu.memory_space<smem>>
    %1069 = vector.broadcast %1068 : f32 to vector<1x384xf32>
    %1070 = arith.mulf %1069, %1059 : vector<1x384xf32>
    %1071 = arith.addf %1053, %1070 : vector<1x384xf32>
    %c251 = arith.constant 251 : index
    %1072 = memref.load %arg2[%c251] : memref<256xf32, #tpu.memory_space<smem>>
    %1073 = vector.broadcast %1072 : f32 to vector<1x384xf32>
    %1074 = arith.mulf %1073, %1059 : vector<1x384xf32>
    %1075 = arith.addf %1057, %1074 : vector<1x384xf32>
    %c0_180 = arith.constant 0 : index
    %c0_181 = arith.constant 0 : index
    %c75_182 = arith.constant 75 : index
    %1076 = vector.load %arg1[%c0_180, %c0_181, %c75_182] : memref<1x4x480xf32, #tpu.memory_space<vmem>>, vector<1x1x384xf32>
    %1077 = vector.shape_cast %1076 : vector<1x1x384xf32> to vector<1x384xf32>
    %c60 = arith.constant 60 : index
    %1078 = memref.load %arg2[%c60] : memref<256xf32, #tpu.memory_space<smem>>
    %1079 = vector.broadcast %1078 : f32 to vector<1x384xf32>
    %1080 = arith.mulf %1079, %1077 : vector<1x384xf32>
    %1081 = arith.addf %1063, %1080 : vector<1x384xf32>
    %c124 = arith.constant 124 : index
    %1082 = memref.load %arg2[%c124] : memref<256xf32, #tpu.memory_space<smem>>
    %1083 = vector.broadcast %1082 : f32 to vector<1x384xf32>
    %1084 = arith.mulf %1083, %1077 : vector<1x384xf32>
    %1085 = arith.addf %1067, %1084 : vector<1x384xf32>
    %c188 = arith.constant 188 : index
    %1086 = memref.load %arg2[%c188] : memref<256xf32, #tpu.memory_space<smem>>
    %1087 = vector.broadcast %1086 : f32 to vector<1x384xf32>
    %1088 = arith.mulf %1087, %1077 : vector<1x384xf32>
    %1089 = arith.addf %1071, %1088 : vector<1x384xf32>
    %c252 = arith.constant 252 : index
    %1090 = memref.load %arg2[%c252] : memref<256xf32, #tpu.memory_space<smem>>
    %1091 = vector.broadcast %1090 : f32 to vector<1x384xf32>
    %1092 = arith.mulf %1091, %1077 : vector<1x384xf32>
    %1093 = arith.addf %1075, %1092 : vector<1x384xf32>
    %c0_183 = arith.constant 0 : index
    %c1_184 = arith.constant 1 : index
    %c75_185 = arith.constant 75 : index
    %1094 = vector.load %arg1[%c0_183, %c1_184, %c75_185] : memref<1x4x480xf32, #tpu.memory_space<vmem>>, vector<1x1x384xf32>
    %1095 = vector.shape_cast %1094 : vector<1x1x384xf32> to vector<1x384xf32>
    %c61 = arith.constant 61 : index
    %1096 = memref.load %arg2[%c61] : memref<256xf32, #tpu.memory_space<smem>>
    %1097 = vector.broadcast %1096 : f32 to vector<1x384xf32>
    %1098 = arith.mulf %1097, %1095 : vector<1x384xf32>
    %1099 = arith.addf %1081, %1098 : vector<1x384xf32>
    %c125 = arith.constant 125 : index
    %1100 = memref.load %arg2[%c125] : memref<256xf32, #tpu.memory_space<smem>>
    %1101 = vector.broadcast %1100 : f32 to vector<1x384xf32>
    %1102 = arith.mulf %1101, %1095 : vector<1x384xf32>
    %1103 = arith.addf %1085, %1102 : vector<1x384xf32>
    %c189 = arith.constant 189 : index
    %1104 = memref.load %arg2[%c189] : memref<256xf32, #tpu.memory_space<smem>>
    %1105 = vector.broadcast %1104 : f32 to vector<1x384xf32>
    %1106 = arith.mulf %1105, %1095 : vector<1x384xf32>
    %1107 = arith.addf %1089, %1106 : vector<1x384xf32>
    %c253 = arith.constant 253 : index
    %1108 = memref.load %arg2[%c253] : memref<256xf32, #tpu.memory_space<smem>>
    %1109 = vector.broadcast %1108 : f32 to vector<1x384xf32>
    %1110 = arith.mulf %1109, %1095 : vector<1x384xf32>
    %1111 = arith.addf %1093, %1110 : vector<1x384xf32>
    %c0_186 = arith.constant 0 : index
    %c2_187 = arith.constant 2 : index
    %c75_188 = arith.constant 75 : index
    %1112 = vector.load %arg1[%c0_186, %c2_187, %c75_188] : memref<1x4x480xf32, #tpu.memory_space<vmem>>, vector<1x1x384xf32>
    %1113 = vector.shape_cast %1112 : vector<1x1x384xf32> to vector<1x384xf32>
    %c62 = arith.constant 62 : index
    %1114 = memref.load %arg2[%c62] : memref<256xf32, #tpu.memory_space<smem>>
    %1115 = vector.broadcast %1114 : f32 to vector<1x384xf32>
    %1116 = arith.mulf %1115, %1113 : vector<1x384xf32>
    %1117 = arith.addf %1099, %1116 : vector<1x384xf32>
    %c126 = arith.constant 126 : index
    %1118 = memref.load %arg2[%c126] : memref<256xf32, #tpu.memory_space<smem>>
    %1119 = vector.broadcast %1118 : f32 to vector<1x384xf32>
    %1120 = arith.mulf %1119, %1113 : vector<1x384xf32>
    %1121 = arith.addf %1103, %1120 : vector<1x384xf32>
    %c190 = arith.constant 190 : index
    %1122 = memref.load %arg2[%c190] : memref<256xf32, #tpu.memory_space<smem>>
    %1123 = vector.broadcast %1122 : f32 to vector<1x384xf32>
    %1124 = arith.mulf %1123, %1113 : vector<1x384xf32>
    %1125 = arith.addf %1107, %1124 : vector<1x384xf32>
    %c254 = arith.constant 254 : index
    %1126 = memref.load %arg2[%c254] : memref<256xf32, #tpu.memory_space<smem>>
    %1127 = vector.broadcast %1126 : f32 to vector<1x384xf32>
    %1128 = arith.mulf %1127, %1113 : vector<1x384xf32>
    %1129 = arith.addf %1111, %1128 : vector<1x384xf32>
    %c0_189 = arith.constant 0 : index
    %c3_190 = arith.constant 3 : index
    %c75_191 = arith.constant 75 : index
    %1130 = vector.load %arg1[%c0_189, %c3_190, %c75_191] : memref<1x4x480xf32, #tpu.memory_space<vmem>>, vector<1x1x384xf32>
    %1131 = vector.shape_cast %1130 : vector<1x1x384xf32> to vector<1x384xf32>
    %c63 = arith.constant 63 : index
    %1132 = memref.load %arg2[%c63] : memref<256xf32, #tpu.memory_space<smem>>
    %1133 = vector.broadcast %1132 : f32 to vector<1x384xf32>
    %1134 = arith.mulf %1133, %1131 : vector<1x384xf32>
    %1135 = arith.addf %1117, %1134 : vector<1x384xf32>
    %c127 = arith.constant 127 : index
    %1136 = memref.load %arg2[%c127] : memref<256xf32, #tpu.memory_space<smem>>
    %1137 = vector.broadcast %1136 : f32 to vector<1x384xf32>
    %1138 = arith.mulf %1137, %1131 : vector<1x384xf32>
    %1139 = arith.addf %1121, %1138 : vector<1x384xf32>
    %c191 = arith.constant 191 : index
    %1140 = memref.load %arg2[%c191] : memref<256xf32, #tpu.memory_space<smem>>
    %1141 = vector.broadcast %1140 : f32 to vector<1x384xf32>
    %1142 = arith.mulf %1141, %1131 : vector<1x384xf32>
    %1143 = arith.addf %1125, %1142 : vector<1x384xf32>
    %c255 = arith.constant 255 : index
    %1144 = memref.load %arg2[%c255] : memref<256xf32, #tpu.memory_space<smem>>
    %1145 = vector.broadcast %1144 : f32 to vector<1x384xf32>
    %1146 = arith.mulf %1145, %1131 : vector<1x384xf32>
    %1147 = arith.addf %1129, %1146 : vector<1x384xf32>
    %c0_192 = arith.constant 0 : index
    %c0_193 = arith.constant 0 : index
    %c0_194 = arith.constant 0 : index
    %1148 = vector.load %arg3[%c0_192, %c0_193, %c0_194] : memref<1x4x384xf32, #tpu.memory_space<vmem>>, vector<1x1x384xf32>
    %1149 = vector.shape_cast %1148 : vector<1x1x384xf32> to vector<1x384xf32>
    %1150 = vector.shape_cast %1135 : vector<1x384xf32> to vector<1x1x384xf32>
    tpu.vector_store %arg3[%c0_192, %c0_193, %c0_194], %1150 {strides = array<i32>} : memref<1x4x384xf32, #tpu.memory_space<vmem>>, vector<1x1x384xf32>,
    %c0_195 = arith.constant 0 : index
    %c1_196 = arith.constant 1 : index
    %c0_197 = arith.constant 0 : index
    %1151 = vector.load %arg3[%c0_195, %c1_196, %c0_197] : memref<1x4x384xf32, #tpu.memory_space<vmem>>, vector<1x1x384xf32>
    %1152 = vector.shape_cast %1151 : vector<1x1x384xf32> to vector<1x384xf32>
    %1153 = vector.shape_cast %1139 : vector<1x384xf32> to vector<1x1x384xf32>
    tpu.vector_store %arg3[%c0_195, %c1_196, %c0_197], %1153 {strides = array<i32>} : memref<1x4x384xf32, #tpu.memory_space<vmem>>, vector<1x1x384xf32>,
    %c0_198 = arith.constant 0 : index
    %c2_199 = arith.constant 2 : index
    %c0_200 = arith.constant 0 : index
    %1154 = vector.load %arg3[%c0_198, %c2_199, %c0_200] : memref<1x4x384xf32, #tpu.memory_space<vmem>>, vector<1x1x384xf32>
    %1155 = vector.shape_cast %1154 : vector<1x1x384xf32> to vector<1x384xf32>
    %1156 = vector.shape_cast %1143 : vector<1x384xf32> to vector<1x1x384xf32>
    tpu.vector_store %arg3[%c0_198, %c2_199, %c0_200], %1156 {strides = array<i32>} : memref<1x4x384xf32, #tpu.memory_space<vmem>>, vector<1x1x384xf32>,
    %c0_201 = arith.constant 0 : index
    %c3_202 = arith.constant 3 : index
    %c0_203 = arith.constant 0 : index
    %1157 = vector.load %arg3[%c0_201, %c3_202, %c0_203] : memref<1x4x384xf32, #tpu.memory_space<vmem>>, vector<1x1x384xf32>
    %1158 = vector.shape_cast %1157 : vector<1x1x384xf32> to vector<1x384xf32>
    %1159 = vector.shape_cast %1147 : vector<1x384xf32> to vector<1x1x384xf32>
    tpu.vector_store %arg3[%c0_201, %c3_202, %c0_203], %1159 {strides = array<i32>} : memref<1x4x384xf32, #tpu.memory_space<vmem>>, vector<1x1x384xf32>,
    return
  }
  func.func @transform_0(%arg0: i32) -> (i32, i32, i32) {
    %c0_i32 = arith.constant 0 : i32
    %c0_i32_0 = arith.constant 0 : i32
    %c0_i32_1 = arith.constant 0 : i32
    return %arg0, %c0_i32, %c0_i32_0 : i32, i32, i32
  }
  func.func @transform_1(%arg0: i32) -> i32 {
    %c0_i32 = arith.constant 0 : i32
    %c0_i32_0 = arith.constant 0 : i32
    return %c0_i32 : i32
  }
  func.func @transform_2(%arg0: i32) -> (i32, i32, i32) {
    %c0_i32 = arith.constant 0 : i32
    %c0_i32_0 = arith.constant 0 : i32
    %c0_i32_1 = arith.constant 0 : i32
    return %arg0, %c0_i32, %c0_i32_0 : i32, i32, i32
  }
}

</mosaic_0001>

<bundles_post_ra>
// kernel: tpu_custom_call.1
= control target key start
LH: loop header
LB: loop body
LE: loop exit
PB: predicated region body
PF: predicated region fallthrough
CT: control target
= control target key end

     0   :  { %s5447_s0 = inlined_call_operand.hbm [shape: f32[2,4,480], index: 0, kind: input, shape index: {}]   ;;  %s5448_s1 = inlined_call_operand.vmem [shape: f32[256], index: 1, kind: input, shape index: {}]   ;;  %s5449_s2 = inlined_call_operand.hbm [shape: f32[2,4,384], index: 2, kind: output, shape index: {}]  }
   0x1   :  { %5521 = sst [smem:[#allocation52_spill]] %s5447_s0 }
   0x2   :  { %5522 = sst [smem:[#allocation53_spill]] %s5448_s1 }
   0x3   :  { %7 = vsyncpa [#allocation3], 0 }
   0x4   :  { %9 = vsyncpa [#allocation3 + $0x1], 0 }
   0x5   :  { %10 = vsyncpa [#allocation5], 0 }
   0x6   :  { %11 = vsyncpa [#allocation4], 0 }
   0x7   :  { %13 = vsyncpa [#allocation4 + $0x1], 0  ;;  %s3282_s9 = smov 0   ;;  %s3284_s10 = smov 0  }
   0x8   :  { %s3286_s11 = smov 0   ;;  %s3288_s12 = smov 0  }
   0x9 LB: > { %s3303_s13 = sadd.s32 4294967295, %s3247_s12   ;;  %s2768_s14 = sadd.s32 4294967294, %s3247_s12   ;;  %s3247_s12 = sphi %s3288_s12, %s5688_s12   ;;  %s3243_s11 = sphi %s3286_s11, %s5687_s11   ;;  %s3239_s10 = sphi %s3284_s10, %s5686_s10   ;;  %s3235_s9 = sphi %s3282_s9, %s5685_s9  }
   0xa   : > { %p39_p0 = scmp.ne.s32.totalorder %s3239_s10, %s3235_s9  ;;  %p5450_p1 = scmp.eq.s32.totalorder %s3303_s13, 0 }
   0xb   : > { %p90_p3 = scmp.eq.s32.totalorder %s2768_s14, 1  ;;  %p2769_p5 = scmp.ge.s32.totalorder %s3247_s12, 1 }
   0xc   : > { %p3312_p4 = por %p5450_p1, %p39_p0  ;;  %p97_p7 = scmp.lt.s32.totalorder %s3247_s12, 3 }
   0xd   : > { %p3317_p6 = por %p90_p3, %p39_p0  ;;  %s5525_s1 = sld [smem:[#allocation53_spill]] }
   0xe   : > { %s5523_s15 = scalar_select %p3312_p4, 1, 0 }
   0xf   : > { %s5524_s16 = scalar_select %p3317_p6, 1, 0 }
  0x10   : > { %p3325_p8 = pnand %p2769_p5, %p97_p7  ;;  %s3333_s21 = sadd.s32 1, %s3247_s12  }
  0x11   : > { %s23_s23 = ssub.s32 %s3247_s12, %s3333_s21  ;;  %s26_s25 = sadd.s32 1, %s3243_s11 }
  0x12   : > { %p3056_p10 = pneg %p3325_p8  ;;  %p3343_p12 = scmp.eq.s32.totalorder %s23_s23, 0 }
  0x13   : > { %s110_s19 = sshll.u32 %s5525_s1, 4  ;;  %p33_p13 = scmp.ne.s32.totalorder %s3243_s11, %s3239_s10  ;;  %s111_s19 = int_to_ptr.vmem [resolvable:$true] %s110_s19 }
  0x14   : > { %p3337_p11 = pnand %p3056_p10, %p5450_p1  ;;  %s3132_s26 = scalar_lea.vmem %s111_s19, 32 }
  0x15   : > { %p3133_p0 = scmp.ne.s32.totalorder %s111_s19, %s3132_s26  ;;  %p3140_p9 = scmp.lt.s32.totalorder %s111_s19, %s111_s19 }
  0x16   : > { %p3134_p3 = pneg %p3337_p11  ;;  %p3141_p2 = scmp.lt.s32.totalorder %s3132_s26, %s3132_s26 }
  0x18   : > { %p3135_p5 = pnand %p3134_p3, %p3133_p0  ;;  %p3142_p10 = por %p3141_p2, %p3140_p9 }
  0x1a   : > { %p3136_p7 = pneg %p3135_p5 }
  0x1c   : > { %p3143_p1 = pnand %p3142_p10, %p3136_p7 }
  0x1e   : > { %3146 = shalt.err (!%p3143_p1)
}
  0x1f   : > { %s3249_s27 = smov [#allocation6]   ;;  %p34_p2 = scmp.eq.s32.totalorder %s3247_s12, 0 }
  0x20   : > { %3059 = dma.vmem_to_smem (!%p3337_p11), %s111_s19, 32, %s3249_s27, [#allocation5]  }
  0x21   : > { %s3357_s28 = scalar_select %p3343_p12, %s3243_s11, %s26_s25  }
  0x22   : > { %p5530_p1 = scmp.eq.s32.totalorder %s3303_s13, 1  ;;  %p3069_p0 = scmp.lt.s32.totalorder %s3247_s12, 2 }
  0x23   : > { %5529 = sst [smem:[#allocation11_spill]] %s3357_s28  ;;  %s121_s30 = sand.u32 1, %s3243_s11  }
  0x24   : > { %p3365_p9 = por %p5530_p1, %p33_p13  ;;  %p35_p3 = por %p34_p2, %p33_p13 }
  0x25   : > { %s2772_s3 = sshll.u32 %s121_s30, 4  ;;  %s3045_s4 = sshll.u32 %s3247_s12, 8 }
  0x26   : > { %s5531_s29 = scalar_select %p3365_p9, 1, 0 }
  0x27   : > { %s5532_s0 = sld [smem:[#allocation52_spill]]  ;;  %s125_s8 = scalar_lea.vmem [#allocation2], %s2772_s3 }
  0x28   : > { %s133_s14 = sshll.u32 %s125_s8, 4  ;;  %p3380_p11 = pnand %p3069_p0, %p35_p3  ;;  %s3384_s14 = int_to_ptr.vmem [resolvable:$true] %s133_s14 }
  0x29   : > { %s122_s18 = scalar_lea.sflag [#allocation3], %s121_s30 }
  0x2a   : > { %p3149_p13 = pneg %p3380_p11 }
  0x2d   : > { %s3378_s7 = scalar_lea.hbm %s5532_s0, %s3045_s4  ;;  %s3152_s24 = scalar_lea.hbm %s5532_s0, 512 }
  0x2e   : > { %s3147_s19 = scalar_lea.hbm %s3378_s7, 256  ;;  %p3153_p10 = scmp.lt.u32.totalorder %s3378_s7, %s5532_s0 }
  0x2f   : > { %p3148_p12 = scmp.ne.s32.totalorder %s3378_s7, %s3147_s19  ;;  %p3154_p2 = scmp.lt.u32.totalorder %s3152_s24, %s3147_s19 }
  0x30   : > { %p3156_p0 = scmp.lt.u32.totalorder %s3147_s19, %s3378_s7 }
  0x31   : > { %p3150_p5 = pnand %p3149_p13, %p3148_p12  ;;  %p3155_p1 = por %p3154_p2, %p3153_p10 }
  0x33   : > { %p3151_p7 = pneg %p3150_p5  ;;  %p3157_p3 = por %p3156_p0, %p3155_p1 }
  0x35   : > { %p3158_p6 = pnand %p3157_p3, %p3151_p7 }
  0x37   : > { %3161 = shalt.err (!%p3158_p6)
}
  0x38   : > { %s3162_s27 = scalar_lea.vmem %s3384_s14, 256  ;;  %s3250_s30 = smov [#allocation2]  }
  0x39   : > { %p3163_p12 = scmp.ne.s32.totalorder %s3384_s14, %s3162_s27  ;;  %s3167_s3 = sshll.u32 %s3250_s30, 4  ;;  %s3168_s3 = int_to_ptr.vmem [resolvable:$false] %s3167_s3 }
  0x3a   : > { %s3169_s4 = scalar_lea.vmem %s3168_s3, 512  ;;  %p3170_p4 = scmp.lt.s32.totalorder %s3384_s14, %s3168_s3 }
  0x3b   : > { %p3165_p5 = pnand %p3163_p12, %p3149_p13  ;;  %p3171_p10 = scmp.lt.s32.totalorder %s3169_s4, %s3162_s27 }
  0x3d   : > { %p3166_p9 = pneg %p3165_p5  ;;  %p3172_p2 = por %p3171_p10, %p3170_p4 }
  0x3f   : > { %p3173_p1 = pnand %p3172_p2, %p3166_p9 }
  0x41   : > { %3176 = shalt.err (!%p3173_p1)
}
  0x42   : > { %3063 = dma.hbm_to_vmem [thread:$0]  (!%p3380_p11), %s3378_s7, 256, %s3384_s14, %s122_s18  }
  0x43   : > { %142 = sbr.rel (%p3325_p8) target bundleno = 704 (0x2c0), region = 28 }
  0x4a   : > { %s3414_s5 = sand.u32 1, %s3239_s10   ;;  %p5534_p4 = scmp.ne.s32.totalorder %s5523_s15, 0 }
  0x4b   : > { %s2776_s6 = sshll.u32 %s3414_s5, 4  ;;  %s145_s8 = scalar_lea.sflag [#allocation3], %s3414_s5 }
  0x4c   : > { %s3418_s19 = scalar_lea.vmem [#allocation2], %s2776_s6 }
  0x4d   : > { %3222 = dma.done.wait (%p5534_p4), %s145_s8, 256  }
  0x4e   : > { %3224 = vsyncadd (%p5534_p4), %s145_s8, 4294967040  ;;  %p5535_p6 = scmp.eq.s32.totalorder %s3303_s13, 0 }
  0x50   : > { %3226 = dma.done.wait (%p5535_p6), [#allocation5], 32   ;;  %p5536_p8 = pmov %p5535_p6 }
  0x52   : > { %3228 = vsyncadd (%p5536_p8), [#allocation5], 4294967264 }
  0x53   : > { %157 = sfence }
  0x54   : > { %s2798_s20 = sld [smem:[#allocation6 + $0x84]]  ;;  %s2802_s18 = sld [smem:[#allocation6 + $0x45]]  ;;  %v3429_v0 = vld [vmem:[%s3418_s19] ss:$4 sm:$0xf]  ;;  %vm249_vm0 = vcmask 1039360  }
  0x55   : > { %s2796_s7 = sld [smem:[#allocation6 + $0x4]]  ;;  %s2801_s22 = sld [smem:[#allocation6 + $0x5]]  ;;  %v3438_v9 = vld [vmem:[%s3418_s19 + $0x1] ss:$4 sm:$0xf]  ;;  %vm413_vm1 = vcmask 1031168  }
  0x56   : > { %s2799_s14 = sld [smem:[#allocation6 + $0xc4]]  ;;  %s2804_s15 = sld [smem:[#allocation6 + $0xc5]]  ;;  %v3449_v18 = vld [vmem:[%s3418_s19 + $0x2] ss:$4 sm:$0xf]  ;;  %vm574_vm2 = vcmask 1022976  }
  0x57   : > { %s2797_s17 = sld [smem:[#allocation6 + $0x44]]  ;;  %s2803_s23 = sld [smem:[#allocation6 + $0x85]]  ;;  %v3460_v27 = vld [vmem:[%s3418_s19 + $0x3] ss:$4 sm:$0xf]  ;;  %vm735_vm3 = vcmask 850944  }
  0x58   : > { %s3251_s24 = smov 127   ;;  %s2807_s25 = sld [smem:[#allocation6 + $0x46]]  ;;  %vm896_vm4 = vcmask 842752   ;;  %vm1057_vm5 = vcmask 834560   ;;  %vm1218_vm6 = vcmask 826368   ;;  %vm1379_vm7 = vcmask 654336  }
  0x59   : > { %s2806_s26 = sld [smem:[#allocation6 + $0x6]]  ;;  %s2812_s3 = sld [smem:[#allocation6 + $0x47]]  ;;  %vm1540_vm8 = vcmask 646144   ;;  %vm1701_vm9 = vcmask 637952   ;;  %vm1862_vm10 = vcmask 629760   ;;  %vm2023_vm11 = vcmask 457728  }
  0x5a   : > { %v264_v1 = vstv %s2798_s20  ;;  %v295_v10 = vstv %s2802_s18  ;;  %s2809_s27 = sld [smem:[#allocation6 + $0xc6]]  ;;  %s2811_s4 = sld [smem:[#allocation6 + $0x7]]  ;;  %vm2184_vm12 = vcmask 449536   ;;  %vm2345_vm13 = vcmask 441344  }
  0x5b   : > { %v265_v2 = vmul.f32 %v264_v1, %v3429_v0  ;;  %v243_v3 = vstv %s2796_s7  ;;  %v285_v11 = vstv %s2801_s22  ;;  %v296_v12 = vmul.f32 %v3438_v9, %v295_v10  ;;  %s2808_s30 = sld [smem:[#allocation6 + $0x86]]  ;;  %s2814_s6 = sld [smem:[#allocation6 + $0xc7]] }
  0x5c   : > { %v274_v4 = vstv %s2799_s14  ;;  %v244_v5 = vmul.f32 %v243_v3, %v3429_v0  ;;  %v286_v13 = vmul.f32 %v3438_v9, %v285_v11  ;;  %v315_v14 = vstv %s2804_s15  ;;  %s2813_s8 = sld [smem:[#allocation6 + $0x87]]  ;;  %s2816_s20 = sld [smem:[#allocation6 + $0x48]] }
  0x5d   : > { %v254_v6 = vstv %s2797_s17  ;;  %267 = vrot.lane.b32.xlu1 %v265_v2, %s3251_s24  ;;  %v275_v7 = vmul.f32 %v274_v4, %v3429_v0  ;;  %v305_v15 = vstv %s2803_s23  ;;  %v316_v16 = vmul.f32 %v3438_v9, %v315_v14  ;;  %s2815_s7 = sld [smem:[#allocation6 + $0x8]]  ;;  %s2820_s18 = sld [smem:[#allocation6 + $0x49]] }
  0x5e   : > { %246 = vrot.lane.b32.xlu0 %v244_v5, %s3251_s24  ;;  %v255_v8 = vmul.f32 %v254_v6, %v3429_v0  ;;  %v306_v17 = vmul.f32 %v3438_v9, %v305_v15  ;;  %v336_v19 = vstv %s2807_s25  ;;  %s2818_s14 = sld [smem:[#allocation6 + $0xc8]]  ;;  %s2819_s22 = sld [smem:[#allocation6 + $0x9]]  ;;  %vm2506_vm14 = vcmask 433152  }
  0x5f   : > { %v326_v20 = vstv %s2806_s26  ;;  %v337_v21 = vmul.f32 %v3449_v18, %v336_v19  ;;  %v377_v28 = vstv %s2812_s3  ;;  %s2817_s17 = sld [smem:[#allocation6 + $0x88]]  ;;  %s2822_s15 = sld [smem:[#allocation6 + $0xc9]] }
  0x60   : > { %v327_v22 = vmul.f32 %v3449_v18, %v326_v20  ;;  %v356_v23 = vstv %s2809_s27  ;;  %v367_v29 = vstv %s2811_s4  ;;  %v378_v30 = vmul.f32 %v3460_v27, %v377_v28  ;;  %s2821_s23 = sld [smem:[#allocation6 + $0x89]]  ;;  %s3252_s25 = smov 126  }
  0x61   : > { %277 = vrot.lane.b32.xlu1 %v275_v7, %s3251_s24  ;;  %v346_v24 = vstv %s2808_s30  ;;  %v357_v25 = vmul.f32 %v3449_v18, %v356_v23  ;;  %v368_v31 = vmul.f32 %v3460_v27, %v367_v29  ;;  %v397_v32 = vstv %s2814_s6  ;;  %s2824_s26 = sld [smem:[#allocation6 + $0x4a]]  ;;  %s2828_s3 = sld [smem:[#allocation6 + $0x4b]] }
  0x62   : > { %257 = vrot.lane.b32.xlu0 %v255_v8, %s3251_s24  ;;  %v347_v26 = vmul.f32 %v3449_v18, %v346_v24  ;;  %v387_v33 = vstv %s2813_s8  ;;  %v398_v34 = vmul.f32 %v3460_v27, %v397_v32  ;;  %v418_v36 = vstv %s2816_s20  ;;  %s2823_s27 = sld [smem:[#allocation6 + $0xa]]  ;;  %s2827_s4 = sld [smem:[#allocation6 + $0xb]] }
  0x63   : > { %v388_v35 = vmul.f32 %v3460_v27, %v387_v33  ;;  %v407_v37 = vstv %s2815_s7  ;;  %v419_v38 = vmul.f32 %v418_v36, %v3429_v0  ;;  %v458_v44 = vstv %s2820_s18  ;;  %s2825_s30 = sld [smem:[#allocation6 + $0x8a]]  ;;  %s2830_s6 = sld [smem:[#allocation6 + $0xcb]] }
  0x64   : > { %v408_v39 = vmul.f32 %v407_v37, %v3429_v0  ;;  %v438_v40 = vstv %s2818_s14  ;;  %v448_v45 = vstv %s2819_s22  ;;  %v459_v46 = vmul.f32 %v3438_v9, %v458_v44  ;;  %s2829_s8 = sld [smem:[#allocation6 + $0x8b]]  ;;  %s2832_s20 = sld [smem:[#allocation6 + $0x4c]] }
  0x65   : > { %298 = vrot.lane.b32.xlu1 %v296_v12, %s3251_s24  ;;  %v428_v41 = vstv %s2817_s17  ;;  %v439_v42 = vmul.f32 %v438_v40, %v3429_v0  ;;  %v449_v47 = vmul.f32 %v3438_v9, %v448_v45  ;;  %v478_v48 = vstv %s2822_s15  ;;  %s2831_s7 = sld [smem:[#allocation6 + $0xc]]  ;;  %s2836_s18 = sld [smem:[#allocation6 + $0x4d]] }
  0x66   : > { %288 = vrot.lane.b32.xlu0 %v286_v13, %s3251_s24  ;;  %v429_v43 = vmul.f32 %v428_v41, %v3429_v0  ;;  %v468_v49 = vstv %s2821_s23  ;;  %v479_v50 = vmul.f32 %v3438_v9, %v478_v48  ;;  %s2834_s14 = sld [smem:[#allocation6 + $0xcc]]  ;;  %s2835_s22 = sld [smem:[#allocation6 + $0xd]] }
  0x67   : > { %v469_v51 = vmul.f32 %v3438_v9, %v468_v49  ;;  %v498_v52 = vstv %s2824_s26  ;;  %v538_v60 = vstv %s2828_s3  ;;  %s2833_s17 = sld [smem:[#allocation6 + $0x8c]]  ;;  %s2838_s15 = sld [smem:[#allocation6 + $0xcd]] }
  0x68   : > { %v488_v53 = vstv %s2823_s27  ;;  %v499_v54 = vmul.f32 %v3449_v18, %v498_v52  ;;  %v528_v61 = vstv %s2827_s4  ;;  %v539_v62 = vmul.f32 %v3460_v27, %v538_v60  ;;  %s2837_s23 = sld [smem:[#allocation6 + $0x8d]]  ;;  %s3253_s26 = smov 125  }
  0x69   : > { %318 = vrot.lane.b32.xlu1 %v316_v16, %s3251_s24  ;;  %v489_v55 = vmul.f32 %v3449_v18, %v488_v53  ;;  %v508_v57 = vstv %s2825_s30  ;;  %v529_v63 = vmul.f32 %v3460_v27, %v528_v61  ;;  %v558_v1 = vstv %s2830_s6  ;;  %s2840_s27 = sld [smem:[#allocation6 + $0x4e]]  ;;  %s2844_s3 = sld [smem:[#allocation6 + $0x4f]] }
  0x6a   : > { %308 = vrot.lane.b32.xlu0 %v306_v17, %s3251_s24  ;;  %v509_v59 = vmul.f32 %v3449_v18, %v508_v57  ;;  %v548_v2 = vstv %s2829_s8  ;;  %v559_v3 = vmul.f32 %v3460_v27, %v558_v1  ;;  %v579_v5 = vstv %s2832_s20  ;;  %s2841_s30 = sld [smem:[#allocation6 + $0x8e]]  ;;  %s2843_s4 = sld [smem:[#allocation6 + $0xf]] }
  0x6b   : > { %v549_v4 = vmul.f32 %v3460_v27, %v548_v2  ;;  %v568_v6 = vstv %s2831_s7  ;;  %v580_v7 = vmul.f32 %v579_v5, %v3429_v0  ;;  %v619_v14 = vstv %s2836_s18  ;;  %s2846_s6 = sld [smem:[#allocation6 + $0xcf]]  ;;  %s2848_s20 = sld [smem:[#allocation6 + $0x50]] }
  0x6c   : > { %v569_v8 = vmul.f32 %v568_v6, %v3429_v0  ;;  %v599_v10 = vstv %s2834_s14  ;;  %v609_v15 = vstv %s2835_s22  ;;  %v620_v16 = vmul.f32 %v3438_v9, %v619_v14  ;;  %s2845_s8 = sld [smem:[#allocation6 + $0x8f]]  ;;  %s2847_s7 = sld [smem:[#allocation6 + $0x10]] }
  0x6d   : > { %339 = vrot.lane.b32.xlu1 %v337_v21, %s3251_s24  ;;  %v589_v11 = vstv %s2833_s17  ;;  %v600_v12 = vmul.f32 %v599_v10, %v3429_v0  ;;  %v610_v17 = vmul.f32 %v3438_v9, %v609_v15  ;;  %v639_v19 = vstv %s2838_s15  ;;  %s2850_s14 = sld [smem:[#allocation6 + $0xd0]]  ;;  %s2852_s18 = sld [smem:[#allocation6 + $0x51]] }
  0x6e   : > { %329 = vrot.lane.b32.xlu0 %v327_v22, %s3251_s24  ;;  %v590_v13 = vmul.f32 %v589_v11, %v3429_v0  ;;  %v629_v20 = vstv %s2837_s23  ;;  %v640_v21 = vmul.f32 %v3438_v9, %v639_v19  ;;  %s2849_s17 = sld [smem:[#allocation6 + $0x90]]  ;;  %s2851_s22 = sld [smem:[#allocation6 + $0x11]] }
  0x6f   : > { %v630_v22 = vmul.f32 %v3438_v9, %v629_v20  ;;  %v659_v23 = vstv %s2840_s27  ;;  %v699_v32 = vstv %s2844_s3  ;;  %s2854_s15 = sld [smem:[#allocation6 + $0xd1]]  ;;  %s3254_s27 = smov 104  }
  0x70   : > { %v669_v29 = vstv %s2841_s30  ;;  %v689_v33 = vstv %s2843_s4  ;;  %s2853_s23 = sld [smem:[#allocation6 + $0x91]]  ;;  %s2857_s30 = sld [smem:[#allocation6 + $0x92]] }
  0x71   : > { %359 = vrot.lane.b32.xlu1 %v357_v25, %s3251_s24  ;;  %v660_v25 = vmul.f32 %v3449_v18, %v659_v23  ;;  %v719_v36 = vstv %s2846_s6  ;;  %v740_v40 = vstv %s2848_s20  ;;  %s2860_s3 = sld [smem:[#allocation6 + $0x53]]  ;;  %s2864_s20 = sld [smem:[#allocation6 + $0x54]] }
  0x72   : > { %349 = vrot.lane.b32.xlu0 %v347_v26, %s3251_s24  ;;  %v709_v37 = vstv %s2845_s8  ;;  %v729_v41 = vstv %s2847_s7  ;;  %s2859_s4 = sld [smem:[#allocation6 + $0x13]]  ;;  %s2863_s7 = sld [smem:[#allocation6 + $0x14]] }
  0x73   : > { %v760_v44 = vstv %s2850_s14  ;;  %v780_v48 = vstv %s2852_s18  ;;  %s2862_s6 = sld [smem:[#allocation6 + $0xd3]]  ;;  %s2866_s14 = sld [smem:[#allocation6 + $0xd4]] }
  0x74   : > { %v750_v45 = vstv %s2849_s17  ;;  %v770_v49 = vstv %s2851_s22  ;;  %s2861_s8 = sld [smem:[#allocation6 + $0x93]]  ;;  %s2865_s17 = sld [smem:[#allocation6 + $0x94]] }
  0x75   : > { %380 = vrot.lane.b32.xlu1 %v378_v30, %s3251_s24  ;;  %v800_v52 = vstv %s2854_s15  ;;  %s2868_s18 = sld [smem:[#allocation6 + $0x55]]  ;;  %s3885_s0 = sld [smem:[#allocation6 + $0xe4]] }
  0x76   : > { %370 = vrot.lane.b32.xlu0 %v368_v31, %s3251_s24  ;;  %v670_v31 = vmul.f32 %v3449_v18, %v669_v29  ;;  %v790_v53 = vstv %s2853_s23  ;;  %v830_v61 = vstv %s2857_s30  ;;  %s2867_s22 = sld [smem:[#allocation6 + $0x15]]  ;;  %s2873_s30 = sld [smem:[#allocation6 + $0x96]] }
  0x77   : > { %v860_v1 = vstv %s2860_s3  ;;  %v901_v14 = vstv %s2864_s20  ;;  %s2870_s15 = sld [smem:[#allocation6 + $0xd5]]  ;;  %s2876_s3 = sld [smem:[#allocation6 + $0x57]] }
  0x78   : > { %v861_v5 = vmul.f32 %v3460_v27, %v860_v1  ;;  %v902_v19 = vmul.f32 %v901_v14, %v3429_v0  ;;  %s2869_s23 = sld [smem:[#allocation6 + $0x95]]  ;;  %s2880_s20 = sld [smem:[#allocation6 + $0x58]] }
  0x79   : > { %400 = vrot.lane.b32.xlu1 %v398_v34, %s3251_s24  ;;  %v700_v34 = vmul.f32 %v3460_v27, %v699_v32  ;;  %s3889_s1 = sld [smem:[#allocation6 + $0x3]]  ;;  %s3894_s28 = sld [smem:[#allocation6 + $0xa4]] }
  0x7a   : > { %390 = vrot.lane.b32.xlu0 %v388_v35, %s3251_s24  ;;  %s2826_s24 = sld [smem:[#allocation6 + $0xca]]  ;;  %v690_v35 = vmul.f32 %v3460_v27, %v689_v33  ;;  %v870_v10 = vstv %s2861_s8  ;;  %v911_v23 = vstv %s2865_s17  ;;  %s2877_s8 = sld [smem:[#allocation6 + $0x97]] }
  0x7b   : > { %s2881_s17 = sld [smem:[#allocation6 + $0x98]]  ;;  %p5681_p11 = scmp.ne.s32.totalorder %s5531_s29, 0 }
  0x7d   : > { %421 = vrot.lane.b32.xlu1 %v419_v38, %s3252_s25  ;;  %v720_v38 = vmul.f32 %v3460_v27, %v719_v36 }
  0x7e   : > { %410 = vrot.lane.b32.xlu0 %v408_v39, %s3252_s25  ;;  %v710_v39 = vmul.f32 %v3460_v27, %v709_v37  ;;  %v951_v36 = vstv %s2869_s23  ;;  %v1062_v1 = vstv %s2880_s20  ;;  %s2885_s23 = sld [smem:[#allocation6 + $0x99]]  ;;  %s2896_s20 = sld [smem:[#allocation6 + $0x5c]] }
  0x80   : > { %v518_v56 = vstv %s2826_s24  ;;  %s2839_s24 = sld [smem:[#allocation6 + $0xe]] }
  0x81   : > { %441 = vrot.lane.b32.xlu1 %v439_v42, %s3252_s25  ;;  %v519_v58 = vmul.f32 %v3449_v18, %v518_v56  ;;  %v741_v42 = vmul.f32 %v740_v40, %v3429_v0  ;;  %v1072_v14 = vstv %s2881_s17  ;;  %s2897_s17 = sld [smem:[#allocation6 + $0x9c]] }
  0x82   : > { %431 = vrot.lane.b32.xlu0 %v429_v43, %s3252_s25  ;;  %v730_v43 = vmul.f32 %v729_v41, %v3429_v0 }
  0x85   : > { %461 = vrot.lane.b32.xlu1 %v459_v46, %s3252_s25  ;;  %v761_v46 = vmul.f32 %v760_v44, %v3429_v0 }
  0x86   : > { %451 = vrot.lane.b32.xlu0 %v449_v47, %s3252_s25  ;;  %v649_v24 = vstv %s2839_s24  ;;  %v751_v47 = vmul.f32 %v750_v45, %v3429_v0  ;;  %s2856_s24 = sld [smem:[#allocation6 + $0x52]] }
  0x87   : > { %v650_v26 = vmul.f32 %v3449_v18, %v649_v24 }
  0x89   : > { %481 = vrot.lane.b32.xlu1 %v479_v50, %s3252_s25  ;;  %v781_v50 = vmul.f32 %v3438_v9, %v780_v48  ;;  %v991_v48 = vstv %s2873_s30  ;;  %s2889_s30 = sld [smem:[#allocation6 + $0x9a]] }
  0x8a   : > { %471 = vrot.lane.b32.xlu0 %v469_v51, %s3252_s25  ;;  %v771_v51 = vmul.f32 %v3438_v9, %v770_v49 }
  0x8c   : > { %v820_v56 = vstv %s2856_s24  ;;  %s3255_s24 = smov 103  }
  0x8d   : > { %501 = vrot.lane.b32.xlu1 %v499_v54, %s3252_s25  ;;  %v801_v54 = vmul.f32 %v3438_v9, %v800_v52  ;;  %v1021_v52 = vstv %s2876_s3  ;;  %s2892_s3 = sld [smem:[#allocation6 + $0x5b]] }
  0x8e   : > { %491 = vrot.lane.b32.xlu0 %v489_v55, %s3252_s25  ;;  %v791_v55 = vmul.f32 %v3438_v9, %v790_v53 }
  0x91   : > { %521 = vrot.lane.b32.xlu1 %v519_v58, %s3252_s25  ;;  %v821_v58 = vmul.f32 %v3449_v18, %v820_v56  ;;  %v1022_v56 = vmul.f32 %v3460_v27, %v1021_v52  ;;  %v1152_v52 = vstv %s2889_s30  ;;  %s2905_s30 = sld [smem:[#allocation6 + $0x9e]] }
  0x92   : > { %511 = vrot.lane.b32.xlu0 %v509_v59, %s3252_s25 }
  0x95   : > { %541 = vrot.lane.b32.xlu1 %v539_v62, %s3252_s25 }
  0x96   : > { %531 = vrot.lane.b32.xlu0 %v529_v63, %s3252_s25  ;;  %v831_v63 = vmul.f32 %v3449_v18, %v830_v61 }
  0x99   : > { %561 = vrot.lane.b32.xlu1 %v559_v3, %s3252_s25  ;;  %v850_v3 = vstv %s2859_s4  ;;  %s2875_s4 = sld [smem:[#allocation6 + $0x17]] }
  0x9a   : > { %551 = vrot.lane.b32.xlu0 %v549_v4, %s3252_s25  ;;  %s2842_s25 = sld [smem:[#allocation6 + $0xce]]  ;;  %v851_v6 = vmul.f32 %v3460_v27, %v850_v3 }
  0x9d   : > { %582 = vrot.lane.b32.xlu1 %v580_v7, %s3253_s26  ;;  %v880_v7 = vstv %s2862_s6  ;;  %s2878_s6 = sld [smem:[#allocation6 + $0xd7]] }
  0x9e   : > { %571 = vrot.lane.b32.xlu0 %v569_v8, %s3253_s26 }
  0xa0   : > { %v679_v28 = vstv %s2842_s25  ;;  %s2855_s25 = sld [smem:[#allocation6 + $0x12]] }
  0xa1   : > { %602 = vrot.lane.b32.xlu1 %v600_v12, %s3253_s26  ;;  %v680_v30 = vmul.f32 %v3449_v18, %v679_v28  ;;  %v881_v12 = vmul.f32 %v3460_v27, %v880_v7  ;;  %v941_v28 = vstv %s2868_s18  ;;  %s2884_s18 = sld [smem:[#allocation6 + $0x59]]  ;;  %v1063_v7 = vmul.f32 %v1062_v1, %v3429_v0 }
  0xa2   : > { %592 = vrot.lane.b32.xlu0 %v590_v13, %s3253_s26  ;;  %v871_v13 = vmul.f32 %v3460_v27, %v870_v10  ;;  %v942_v32 = vmul.f32 %v3438_v9, %v941_v28 }
  0xa5   : > { %622 = vrot.lane.b32.xlu1 %v620_v16, %s3253_s26  ;;  %v890_v16 = vstv %s2863_s7  ;;  %s2879_s7 = sld [smem:[#allocation6 + $0x18]] }
  0xa6   : > { %612 = vrot.lane.b32.xlu0 %v610_v17, %s3253_s26  ;;  %v810_v57 = vstv %s2855_s25  ;;  %v891_v20 = vmul.f32 %v890_v16, %v3429_v0  ;;  %s2871_s25 = sld [smem:[#allocation6 + $0x16]] }
  0xa7   : > { %v811_v59 = vmul.f32 %v3449_v18, %v810_v57 }
  0xa9   : > { %642 = vrot.lane.b32.xlu1 %v640_v21, %s3253_s26  ;;  %v921_v21 = vstv %s2866_s14  ;;  %s2882_s14 = sld [smem:[#allocation6 + $0xd8]] }
  0xaa   : > { %632 = vrot.lane.b32.xlu0 %v630_v22, %s3253_s26 }
  0xad   : > { %662 = vrot.lane.b32.xlu1 %v660_v25, %s3253_s26  ;;  %v922_v25 = vmul.f32 %v921_v21, %v3429_v0  ;;  %v1102_v21 = vstv %s2884_s18  ;;  %s2900_s18 = sld [smem:[#allocation6 + $0x5d]] }
  0xae   : > { %652 = vrot.lane.b32.xlu0 %v650_v26, %s3253_s26  ;;  %v912_v26 = vmul.f32 %v911_v23, %v3429_v0  ;;  %v1103_v28 = vmul.f32 %v3438_v9, %v1102_v21  ;;  %v1223_v21 = vstv %s2896_s20  ;;  %s2912_s20 = sld [smem:[#allocation6 + $0x60]] }
  0xb1   : > { %682 = vrot.lane.b32.xlu1 %v680_v30, %s3253_s26  ;;  %v931_v30 = vstv %s2867_s22  ;;  %s2883_s22 = sld [smem:[#allocation6 + $0x19]] }
  0xb2   : > { %672 = vrot.lane.b32.xlu0 %v670_v31, %s3253_s26  ;;  %v932_v33 = vmul.f32 %v3438_v9, %v931_v30 }
  0xb5   : > { %702 = vrot.lane.b32.xlu1 %v700_v34, %s3253_s26  ;;  %v961_v34 = vstv %s2870_s15  ;;  %s2886_s15 = sld [smem:[#allocation6 + $0xd9]] }
  0xb6   : > { %692 = vrot.lane.b32.xlu0 %v690_v35, %s3253_s26 }
  0xb9   : > { %722 = vrot.lane.b32.xlu1 %v720_v38, %s3253_s26  ;;  %v962_v38 = vmul.f32 %v3438_v9, %v961_v34  ;;  %v1112_v34 = vstv %s2885_s23  ;;  %s2901_s23 = sld [smem:[#allocation6 + $0x9d]] }
  0xba   : > { %712 = vrot.lane.b32.xlu0 %v710_v39, %s3253_s26  ;;  %s2858_s26 = sld [smem:[#allocation6 + $0xd2]]  ;;  %v952_v39 = vmul.f32 %v3438_v9, %v951_v36 }
  0xbd   : > { %743 = vrot.lane.b32.xlu1 %v741_v42, %s3254_s27  ;;  %v971_v42 = vstv %s2871_s25  ;;  %s2887_s25 = sld [smem:[#allocation6 + $0x1a]] }
  0xbe   : > { %732 = vrot.lane.b32.xlu0 %v730_v43, %s3254_s27  ;;  %v972_v45 = vmul.f32 %v3449_v18, %v971_v42 }
  0xc0   : > { %v840_v60 = vstv %s2858_s26  ;;  %s2874_s26 = sld [smem:[#allocation6 + $0xd6]] }
  0xc1   : > { %763 = vrot.lane.b32.xlu1 %v761_v46, %s3254_s27  ;;  %v841_v62 = vmul.f32 %v3449_v18, %v840_v60  ;;  %v1031_v60 = vstv %s2877_s8  ;;  %s2893_s8 = sld [smem:[#allocation6 + $0x9b]] }
  0xc2   : > { %753 = vrot.lane.b32.xlu0 %v751_v47, %s3254_s27 }
  0xc5   : > { %783 = vrot.lane.b32.xlu1 %v781_v50, %s3254_s27 }
  0xc6   : > { %773 = vrot.lane.b32.xlu0 %v771_v51, %s3254_s27  ;;  %v1001_v46 = vstv %s2874_s26  ;;  %v992_v51 = vmul.f32 %v3449_v18, %v991_v48  ;;  %s2890_s26 = sld [smem:[#allocation6 + $0xda]] }
  0xc7   : > { %v1002_v50 = vmul.f32 %v3449_v18, %v1001_v46 }
  0xc9   : > { %803 = vrot.lane.b32.xlu1 %v801_v54, %s3254_s27  ;;  %v1011_v54 = vstv %s2875_s4  ;;  %s2891_s4 = sld [smem:[#allocation6 + $0x1b]] }
  0xca   : > { %793 = vrot.lane.b32.xlu0 %v791_v55, %s3254_s27  ;;  %v1012_v57 = vmul.f32 %v3460_v27, %v1011_v54 }
  0xcd   : > { %823 = vrot.lane.b32.xlu1 %v821_v58, %s3254_s27  ;;  %v1041_v58 = vstv %s2878_s6  ;;  %s2894_s6 = sld [smem:[#allocation6 + $0xdb]] }
  0xce   : > { %813 = vrot.lane.b32.xlu0 %v811_v59, %s3254_s27 }
  0xcf   : > { %v3558_v2 = vpop.permute.xlu1 %267 }
  0xd0   : > { %v3560_v4 = vpop.permute.xlu0 %246 }
  0xd1   : > { %843 = vrot.lane.b32.xlu1 %v841_v62, %s3254_s27  ;;  %v1042_v62 = vmul.f32 %v3460_v27, %v1041_v58  ;;  %v1182_v58 = vstv %s2892_s3  ;;  %s2908_s3 = sld [smem:[#allocation6 + $0x5f]] }
  0xd2   : > { %833 = vrot.lane.b32.xlu0 %v831_v63, %s3254_s27  ;;  %v1032_v63 = vmul.f32 %v3460_v27, %v1031_v60  ;;  %v1183_v1 = vmul.f32 %v3460_v27, %v1182_v58 }
  0xd3   : > { %v3566_v8 = vpop.permute.xlu1 %277 }
  0xd4   : > { %v3568_v11 = vpop.permute.xlu0 %257 }
  0xd5   : > { %863 = vrot.lane.b32.xlu1 %v861_v5, %s3254_s27  ;;  %v1051_v5 = vstv %s2879_s7  ;;  %s2895_s7 = sld [smem:[#allocation6 + $0x1c]] }
  0xd6   : > { %853 = vrot.lane.b32.xlu0 %v851_v6, %s3254_s27  ;;  %v1052_v10 = vmul.f32 %v1051_v5, %v3429_v0 }
  0xd7   : > { %v3574_v15 = vpop.permute.xlu1 %298 }
  0xd8   : > { %v3576_v17 = vpop.permute.xlu0 %288 }
  0xd9   : > { %883 = vrot.lane.b32.xlu1 %v881_v12, %s3254_s27  ;;  %v1082_v12 = vstv %s2882_s14  ;;  %s2898_s14 = sld [smem:[#allocation6 + $0xdc]] }
  0xda   : > { %873 = vrot.lane.b32.xlu0 %v871_v13, %s3254_s27  ;;  %s2872_s27 = sld [smem:[#allocation6 + $0x56]] }
  0xdb   : > { %v3582_v22 = vpop.permute.xlu1 %318 }
  0xdc   : > { %v3584_v24 = vpop.permute.xlu0 %308 }
  0xdd   : > { %904 = vrot.lane.b32.xlu1 %v902_v19, %s3255_s24  ;;  %v1083_v19 = vmul.f32 %v1082_v12, %v3429_v0  ;;  %v1192_v12 = vstv %s2893_s8  ;;  %s2909_s8 = sld [smem:[#allocation6 + $0x9f]] }
  0xde   : > { %893 = vrot.lane.b32.xlu0 %v891_v20, %s3255_s24  ;;  %v1073_v20 = vmul.f32 %v1072_v14, %v3429_v0 }
  0xdf   : > { %v3590_v29 = vpop.permute.xlu1 %339 }
  0xe0   : > { %v3592_v31 = vpop.permute.xlu0 %329  ;;  %v981_v40 = vstv %s2872_s27  ;;  %s3256_s27 = smov 102  }
  0xe1   : > { %924 = vrot.lane.b32.xlu1 %v922_v25, %s3255_s24  ;;  %v982_v44 = vmul.f32 %v3449_v18, %v981_v40  ;;  %v1092_v25 = vstv %s2883_s22  ;;  %s2899_s22 = sld [smem:[#allocation6 + $0x1d]] }
  0xe2   : > { %914 = vrot.lane.b32.xlu0 %v912_v26, %s3255_s24  ;;  %v1093_v30 = vmul.f32 %v3438_v9, %v1092_v25 }
  0xe3   : > { %v3598_v35 = vpop.permute.xlu1 %359 }
  0xe4   : > { %v3600_v37 = vpop.permute.xlu0 %349 }
  0xe5   : > { %944 = vrot.lane.b32.xlu1 %v942_v32, %s3255_s24  ;;  %v1122_v32 = vstv %s2886_s15  ;;  %s2902_s15 = sld [smem:[#allocation6 + $0xdd]] }
  0xe6   : > { %934 = vrot.lane.b32.xlu0 %v932_v33, %s3255_s24 }
  0xe7   : > { %v3606_v41 = vpop.permute.xlu1 %380 }
  0xe8   : > { %v3608_v43 = vpop.permute.xlu0 %370 }
  0xe9   : > { %964 = vrot.lane.b32.xlu1 %v962_v38, %s3255_s24  ;;  %v1123_v38 = vmul.f32 %v3438_v9, %v1122_v32  ;;  %v1224_v32 = vmul.f32 %v1223_v21, %v3429_v0 }
  0xea   : > { %954 = vrot.lane.b32.xlu0 %v952_v39, %s3255_s24  ;;  %v1113_v39 = vmul.f32 %v3438_v9, %v1112_v34 }
  0xeb   : > { %v3614_v47 = vpop.permute.xlu1 %400 }
  0xec   : > { %v3616_v49 = vpop.permute.xlu0 %390 }
  0xed   : > { %984 = vrot.lane.b32.xlu1 %v982_v44, %s3255_s24  ;;  %v1132_v44 = vstv %s2887_s25  ;;  %s2903_s25 = sld [smem:[#allocation6 + $0x1e]] }
  0xee   : > { %974 = vrot.lane.b32.xlu0 %v972_v45, %s3255_s24  ;;  %v1133_v48 = vmul.f32 %v3449_v18, %v1132_v44 }
  0xef   : > { %v3622_v53 = vpop.permute.xlu1 %421 }
  0xf0   : > { %v3624_v55 = vpop.permute.xlu0 %410 }
  0xf1   : > { %1004 = vrot.lane.b32.xlu1 %v1002_v50, %s3255_s24  ;;  %v1162_v50 = vstv %s2890_s26  ;;  %s2906_s26 = sld [smem:[#allocation6 + $0xde]] }
  0xf2   : > { %994 = vrot.lane.b32.xlu0 %v992_v51, %s3255_s24 }
  0xf3   : > { %v3630_v59 = vpop.permute.xlu1 %441 }
  0xf4   : > { %v3632_v61 = vpop.permute.xlu0 %431 }
  0xf5   : > { %1024 = vrot.lane.b32.xlu1 %v1022_v56, %s3255_s24  ;;  %v1163_v56 = vmul.f32 %v3449_v18, %v1162_v50  ;;  %v1263_v50 = vstv %s2900_s18  ;;  %s2916_s18 = sld [smem:[#allocation6 + $0x61]] }
  0xf6   : > { %1014 = vrot.lane.b32.xlu0 %v1012_v57, %s3255_s24  ;;  %v1153_v57 = vmul.f32 %v3449_v18, %v1152_v52  ;;  %v1264_v58 = vmul.f32 %v3438_v9, %v1263_v50 }
  0xf7   : > { %v3638_v3 = vpop.permute.xlu1 %461 }
  0xf8   : > { %v3640_v6 = vpop.permute.xlu0 %451 }
  0xf9   : > { %1044 = vrot.lane.b32.xlu1 %v1042_v62, %s3255_s24  ;;  %v1172_v62 = vstv %s2891_s4  ;;  %s2907_s4 = sld [smem:[#allocation6 + $0x1f]] }
  0xfa   : > { %1034 = vrot.lane.b32.xlu0 %v1032_v63, %s3255_s24  ;;  %s2888_s24 = sld [smem:[#allocation6 + $0x5a]]  ;;  %v1173_v5 = vmul.f32 %v3460_v27, %v1172_v62 }
  0xfb   : > { %v3646_v13 = vpop.permute.xlu1 %481 }
  0xfc   : > { %v3648_v16 = vpop.permute.xlu0 %471 }
  0xfd   : > { %1065 = vrot.lane.b32.xlu1 %v1063_v7, %s3256_s27  ;;  %v1202_v7 = vstv %s2894_s6  ;;  %s2910_s6 = sld [smem:[#allocation6 + $0xdf]] }
  0xfe   : > { %1054 = vrot.lane.b32.xlu0 %v1052_v10, %s3256_s27 }
  0xff   : > { %v3654_v23 = vpop.permute.xlu1 %501 }
 0x100   : > { %v3656_v26 = vpop.permute.xlu0 %491  ;;  %v1142_v40 = vstv %s2888_s24  ;;  %s3257_s24 = smov 101  }
 0x101   : > { %1085 = vrot.lane.b32.xlu1 %v1083_v19, %s3256_s27  ;;  %v1143_v46 = vmul.f32 %v3449_v18, %v1142_v40  ;;  %v1203_v19 = vmul.f32 %v3460_v27, %v1202_v7  ;;  %v1233_v40 = vstv %s2897_s17  ;;  %s2913_s17 = sld [smem:[#allocation6 + $0xa0]] }
 0x102   : > { %1075 = vrot.lane.b32.xlu0 %v1073_v20, %s3256_s27  ;;  %v1193_v20 = vmul.f32 %v3460_v27, %v1192_v12 }
 0x103   : > { %v3662_v33 = vpop.permute.xlu1 %521 }
 0x104   : > { %v3664_v36 = vpop.permute.xlu0 %511 }
 0x105   : > { %1105 = vrot.lane.b32.xlu1 %v1103_v28, %s3256_s27  ;;  %v1212_v28 = vstv %s2895_s7  ;;  %s2911_s7 = sld [smem:[#allocation6 + $0x20]] }
 0x106   : > { %1095 = vrot.lane.b32.xlu0 %v1093_v30, %s3256_s27  ;;  %v1213_v34 = vmul.f32 %v1212_v28, %v3429_v0  ;;  %v1293_v28 = vstv %s2903_s25  ;;  %s2919_s25 = sld [smem:[#allocation6 + $0x22]] }
 0x107   : > { %v3670_v42 = vpop.permute.xlu1 %541 }
 0x108   : > { %v3672_v45 = vpop.permute.xlu0 %531 }
 0x109   : > { %1125 = vrot.lane.b32.xlu1 %v1123_v38, %s3256_s27  ;;  %v1243_v38 = vstv %s2898_s14  ;;  %s2914_s14 = sld [smem:[#allocation6 + $0xe0]] }
 0x10a   : > { %1115 = vrot.lane.b32.xlu0 %v1113_v39, %s3256_s27 }
 0x10b   : > { %v3678_v51 = vpop.permute.xlu1 %561 }
 0x10c   : > { %v3680_v54 = vpop.permute.xlu0 %551 }
 0x10d   : > { %1145 = vrot.lane.b32.xlu1 %v1143_v46, %s3256_s27  ;;  %v1244_v46 = vmul.f32 %v1243_v38, %v3429_v0  ;;  %v1294_v38 = vmul.f32 %v3449_v18, %v1293_v28  ;;  %v1353_v28 = vstv %s2909_s8  ;;  %s3823_s8 = sld [smem:[#allocation6 + $0x81]] }
 0x10e   : > { %1135 = vrot.lane.b32.xlu0 %v1133_v48, %s3256_s27  ;;  %v1234_v48 = vmul.f32 %v1233_v40, %v3429_v0  ;;  %v1273_v0 = vstv %s2901_s23  ;;  %v1323_v40 = vstv %s2906_s26  ;;  %s2917_s23 = sld [smem:[#allocation6 + $0xa1]]  ;;  %s3796_s26 = sld [smem:[#allocation6 + $0xe2]] }
 0x10f   : > { %v3686_v60 = vpop.permute.xlu1 %582  ;;  %v1324_v50 = vmul.f32 %v3449_v18, %v1323_v40  ;;  %v1354_v40 = vmul.f32 %v3460_v27, %v1353_v28  ;;  %v1394_v28 = vstv %s2913_s17  ;;  %s3837_s17 = sld [smem:[#allocation6]] }
 0x110   : > { %5537 = vst [vmem:[#allocation12_spill] sm:$0xff] %v3686_v60  ;;  %v3688_v63 = vpop.permute.xlu0 %571 }
 0x111   : > { %5538 = vst [vmem:[#allocation13_spill] sm:$0xff] %v3688_v63  ;;  %1165 = vrot.lane.b32.xlu1 %v1163_v56, %s3256_s27  ;;  %v1253_v56 = vstv %s2899_s22  ;;  %s2915_s22 = sld [smem:[#allocation6 + $0x21]]  ;;  %v226_v63 = vstv %s3889_s1  ;;  %s3965_s1 = sld [smem:[#allocation6 + $0x66]] }
 0x112   : > { %1155 = vrot.lane.b32.xlu0 %v1153_v57, %s3256_s27  ;;  %v1254_v62 = vmul.f32 %v3438_v9, %v1253_v56 }
 0x113   : > { %v3694_v10 = vpop.permute.xlu1 %602 }
 0x114   : > { %5539 = vst [vmem:[#allocation14_spill] sm:$0xff] %v3694_v10  ;;  %v3696_v14 = vpop.permute.xlu0 %592 }
 0x115   : > { %5540 = vst [vmem:[#allocation15_spill] sm:$0xff] %v3696_v14  ;;  %1185 = vrot.lane.b32.xlu1 %v1183_v1, %s3256_s27  ;;  %v1283_v1 = vstv %s2902_s15  ;;  %s2918_s15 = sld [smem:[#allocation6 + $0xe1]] }
 0x116   : > { %1175 = vrot.lane.b32.xlu0 %v1173_v5, %s3256_s27  ;;  %v1284_v12 = vmul.f32 %v3438_v9, %v1283_v1  ;;  %v1333_v1 = vstv %s2907_s4  ;;  %s3812_s4 = sld [smem:[#allocation6 + $0x23]] }
 0x117   : > { %v3702_v25 = vpop.permute.xlu1 %622 }
 0x118   : > { %5541 = vst [vmem:[#allocation16_spill] sm:$0xff] %v3702_v25  ;;  %v3704_v30 = vpop.permute.xlu0 %612 }
 0x119   : > { %5542 = vst [vmem:[#allocation17_spill] sm:$0xff] %v3704_v30  ;;  %1205 = vrot.lane.b32.xlu1 %v1203_v19, %s3256_s27  ;;  %v1274_v19 = vmul.f32 %v3438_v9, %v1273_v0  ;;  %v1313_v9 = vstv %s2905_s30  ;;  %s3800_s30 = sld [smem:[#allocation6 + $0xa2]] }
 0x11a   : > { %1195 = vrot.lane.b32.xlu0 %v1193_v20, %s3256_s27  ;;  %s2904_s27 = sld [smem:[#allocation6 + $0x5e]]  ;;  %v1314_v56 = vmul.f32 %v3449_v18, %v1313_v9  ;;  %v1384_v9 = vstv %s2912_s20  ;;  %s3828_s20 = sld [smem:[#allocation6 + $0xe3]] }
 0x11b   : > { %v3710_v39 = vpop.permute.xlu1 %642 }
 0x11c   : > { %5543 = vst [vmem:[#allocation18_spill] sm:$0xff] %v3710_v39  ;;  %v3712_v44 = vpop.permute.xlu0 %632 }
 0x11d   : > { %5544 = vst [vmem:[#allocation19_spill] sm:$0xff] %v3712_v44  ;;  %1226 = vrot.lane.b32.xlu1 %v1224_v32, %s3257_s24 }
 0x11e   : > { %1215 = vrot.lane.b32.xlu0 %v1213_v34, %s3257_s24 }
 0x11f   : > { %v3718_v52 = vpop.permute.xlu1 %662 }
 0x120   : > { %5545 = vst [vmem:[#allocation20_spill] sm:$0xff] %v3718_v52  ;;  %v3720_v57 = vpop.permute.xlu0 %652  ;;  %v1303_v20 = vstv %s2904_s27  ;;  %s3258_s27 = smov 80  }
 0x121   : > { %5546 = vst [vmem:[#allocation21_spill] sm:$0xff] %v3720_v57  ;;  %1246 = vrot.lane.b32.xlu1 %v1244_v46, %s3257_s24  ;;  %v1304_v34 = vmul.f32 %v3449_v18, %v1303_v20  ;;  %v1363_v20 = vstv %s2910_s6  ;;  %s3816_s6 = sld [smem:[#allocation6 + $0x80]] }
 0x122   : > { %1236 = vrot.lane.b32.xlu0 %v1234_v48, %s3257_s24 }
 0x123   : > { %v3726_v5 = vpop.permute.xlu1 %682 }
 0x124   : > { %5547 = vst [vmem:[#allocation22_spill] sm:$0xff] %v3726_v5  ;;  %v3728_v7 = vpop.permute.xlu0 %672 }
 0x125   : > { %5548 = vst [vmem:[#allocation23_spill] sm:$0xff] %v3728_v7  ;;  %1266 = vrot.lane.b32.xlu1 %v1264_v58, %s3257_s24  ;;  %v1343_v58 = vstv %s2908_s3  ;;  %s3808_s3 = sld [smem:[#allocation6 + $0x63]] }
 0x126   : > { %1256 = vrot.lane.b32.xlu0 %v1254_v62, %s3257_s24 }
 0x127   : > { %v3734_v21 = vpop.permute.xlu1 %702 }
 0x128   : > { %5549 = vst [vmem:[#allocation24_spill] sm:$0xff] %v3734_v21  ;;  %v3736_v32 = vpop.permute.xlu0 %692 }
 0x129   : > { %5550 = vst [vmem:[#allocation25_spill] sm:$0xff] %v3736_v32  ;;  %1286 = vrot.lane.b32.xlu1 %v1284_v12, %s3257_s24  ;;  %v1344_v12 = vmul.f32 %v3460_v27, %v1343_v58 }
 0x12a   : > { %1276 = vrot.lane.b32.xlu0 %v1274_v19, %s3257_s24  ;;  %v1334_v19 = vmul.f32 %v3460_v27, %v1333_v1  ;;  %v3772_v1 = vld [vmem:[%s3418_s19] ss:$4 sm:$0xf] }
 0x12b   : > { %v3742_v46 = vpop.permute.xlu1 %722 }
 0x12c   : > { %5551 = vst [vmem:[#allocation26_spill] sm:$0xff] %v3742_v46  ;;  %v3744_v48 = vpop.permute.xlu0 %712 }
 0x12d   : > { %5552 = vst [vmem:[#allocation27_spill] sm:$0xff] %v3744_v48  ;;  %1306 = vrot.lane.b32.xlu1 %v1304_v34, %s3257_s24 }
 0x12e   : > { %1296 = vrot.lane.b32.xlu0 %v1294_v38, %s3257_s24  ;;  %v1364_v38 = vmul.f32 %v3460_v27, %v1363_v20  ;;  %v1404_v20 = vstv %s2914_s14  ;;  %s3835_s14 = sld [smem:[#allocation6 + $0xa3]] }
 0x12f   : > { %v3750_v62 = vpop.permute.xlu1 %743 }
 0x130   : > { %5553 = vst [vmem:[#allocation28_spill] sm:$0xff] %v3750_v62  ;;  %v3752_v0 = vpop.permute.xlu0 %732 }
 0x131   : > { %5554 = vst [vmem:[#allocation29_spill] sm:$0xff] %v3752_v0  ;;  %1326 = vrot.lane.b32.xlu1 %v1324_v50, %s3257_s24  ;;  %v198_v0 = vstv %s3823_s8  ;;  %s3917_s8 = sld [smem:[#allocation6 + $0x65]] }
 0x132   : > { %1316 = vrot.lane.b32.xlu0 %v1314_v56, %s3257_s24  ;;  %v1373_v56 = vstv %s2911_s7  ;;  %s3830_s7 = sld [smem:[#allocation6 + $0x82]] }
 0x133   : > { %v3758_v18 = vpop.permute.xlu1 %763 }
 0x134   : > { %5555 = vst [vmem:[#allocation30_spill] sm:$0xff] %v3758_v18  ;;  %v3760_v34 = vpop.permute.xlu0 %753  ;;  %v182_v18 = vstv %s3816_s6  ;;  %v1514_v62 = vstv %s3835_s14  ;;  %s3908_s6 = sld [smem:[#allocation6 + $0x43]] }
 0x135   : > { %5556 = vst [vmem:[#allocation31_spill] sm:$0xff] %v3760_v34  ;;  %1346 = vrot.lane.b32.xlu1 %v1344_v12, %s3257_s24  ;;  %v1385_v12 = vmul.f32 %v3772_v1, %v1384_v9  ;;  %v1424_v9 = vstv %s2916_s18  ;;  %s3839_s18 = sld [smem:[#allocation6 + $0x1]]  ;;  %s3934_s14 = sld [smem:[#allocation6 + $0xc3]] }
 0x136   : > { %1336 = vrot.lane.b32.xlu0 %v1334_v19, %s3257_s24  ;;  %v1374_v19 = vmul.f32 %v3772_v1, %v1373_v56 }
 0x137   : > { %v3766_v50 = vpop.permute.xlu1 %783 }
 0x138   : > { %5557 = vst [vmem:[#allocation32_spill] sm:$0xff] %v3766_v50  ;;  %v3768_v58 = vpop.permute.xlu0 %773 }
 0x139   : > { %5558 = vst [vmem:[#allocation33_spill] sm:$0xff] %v3768_v58  ;;  %1366 = vrot.lane.b32.xlu1 %v1364_v38, %s3257_s24  ;;  %v1405_v38 = vmul.f32 %v3772_v1, %v1404_v20  ;;  %v1414_v58 = vstv %s2915_s22  ;;  %v1444_v20 = vstv %s2918_s15  ;;  %s3843_s22 = sld [smem:[#allocation6 + $0x40]]  ;;  %s3845_s15 = sld [smem:[#allocation6 + $0x41]] }
 0x13a   : > { %1356 = vrot.lane.b32.xlu0 %v1354_v40, %s3257_s24  ;;  %v1395_v40 = vmul.f32 %v3772_v1, %v1394_v28  ;;  %s2920_s24 = sld [smem:[#allocation6 + $0x62]] }
 0x13b   : > { %v3777_v27 = vpop.permute.xlu1 %803  ;;  %v190_v48 = vstv %s3839_s18  ;;  %s3951_s18 = sld [smem:[#allocation6 + $0xa5]] }
 0x13c   : > { %5559 = vst [vmem:[#allocation34_spill] sm:$0xff] %v3777_v27  ;;  %v3779_v50 = vpop.permute.xlu0 %793 }
 0x13d   : > { %5560 = vst [vmem:[#allocation35_spill] sm:$0xff] %v3779_v50  ;;  %1387 = vrot.lane.b32.xlu1 %v1385_v12, %s3258_s27  ;;  %v3791_v50 = vld [vmem:[%s3418_s19 + $0x1] ss:$4 sm:$0xf] }
 0x13e   : > { %1376 = vrot.lane.b32.xlu0 %v1374_v19, %s3258_s27  ;;  %v1425_v12 = vmul.f32 %v3791_v50, %v1424_v9  ;;  %v1415_v19 = vmul.f32 %v3791_v50, %v1414_v58 }
 0x13f   : > { %v3785_v56 = vpop.permute.xlu1 %823  ;;  %v179_v32 = vstv %s3843_s22  ;;  %v194_v21 = vstv %s3845_s15  ;;  %s3989_s22 = sld [smem:[#allocation6 + $0xa6]]  ;;  %s4006_s15 = sld [smem:[#allocation6 + $0x67]] }
 0x140   : > { %5561 = vst [vmem:[#allocation36_spill] sm:$0xff] %v3785_v56  ;;  %v3787_v27 = vpop.permute.xlu0 %813  ;;  %v1434_v56 = vstv %s2917_s23  ;;  %s3852_s23 = sld [smem:[#allocation6 + $0x64]] }
 0x141   : > { %5562 = vst [vmem:[#allocation37_spill] sm:$0xff] %v3787_v27  ;;  %1407 = vrot.lane.b32.xlu1 %v1405_v38, %s3258_s27  ;;  %v1445_v38 = vmul.f32 %v3791_v50, %v1444_v20  ;;  %v1435_v58 = vmul.f32 %v3791_v50, %v1434_v56  ;;  %v1484_v20 = vstv %s3796_s26  ;;  %s3861_s26 = sld [smem:[#allocation6 + $0xc0]] }
 0x142   : > { %1397 = vrot.lane.b32.xlu0 %v1395_v40, %s3258_s27  ;;  %v1464_v40 = vstv %s2920_s24  ;;  %s3857_s24 = sld [smem:[#allocation6 + $0x24]] }
 0x143   : > { %v3798_v28 = vpop.permute.xlu1 %843 }
 0x144   : > { %5563 = vst [vmem:[#allocation38_spill] sm:$0xff] %v3798_v28  ;;  %v3802_v27 = vpop.permute.xlu0 %833  ;;  %v1454_v28 = vstv %s2919_s25  ;;  %s3859_s25 = sld [smem:[#allocation6 + $0x2]] }
 0x145   : > { %5564 = vst [vmem:[#allocation39_spill] sm:$0xff] %v3802_v27  ;;  %1427 = vrot.lane.b32.xlu1 %v1425_v12, %s3258_s27  ;;  %v3820_v12 = vld [vmem:[%s3418_s19 + $0x2] ss:$4 sm:$0xf]  ;;  %v1524_v27 = vstv %s3828_s20  ;;  %s3904_s20 = sld [smem:[#allocation6 + $0xc2]] }
 0x146   : > { %1417 = vrot.lane.b32.xlu0 %v1415_v19, %s3258_s27  ;;  %v1465_v19 = vmul.f32 %v3820_v12, %v1464_v40  ;;  %v1455_v56 = vmul.f32 %v3820_v12, %v1454_v28  ;;  %v1485_v28 = vmul.f32 %v3820_v12, %v1484_v20  ;;  %v3869_v20 = vld [vmem:[%s3418_s19 + $0x1] ss:$4 sm:$0x7]  ;;  %v1545_v57 = vstv %s3852_s23  ;;  %s4014_s23 = sld [smem:[#allocation6 + $0x27]] }
 0x147   : > { %v3810_v9 = vpop.permute.xlu1 %863  ;;  %v199_v5 = vmul.f32 %v3869_v20, %v198_v0  ;;  %v195_v44 = vmul.f32 %v3869_v20, %v194_v21  ;;  %v1546_v30 = vmul.f32 %v3772_v1, %v1545_v57  ;;  %v1555_v57 = vstv %s3894_s28  ;;  %s3970_s28 = sld [smem:[#allocation6 + $0x26]] }
 0x148   : > { %5565 = vst [vmem:[#allocation40_spill] sm:$0xff] %v3810_v9  ;;  %v3814_v34 = vpop.permute.xlu0 %853 }
 0x149   : > { %5566 = vst [vmem:[#allocation41_spill] sm:$0xff] %v3814_v34  ;;  %1447 = vrot.lane.b32.xlu1 %v1445_v38, %s3258_s27  ;;  %v1474_v38 = vstv %s3800_s30  ;;  %s3871_s30 = sld [smem:[#allocation6 + $0xc1]] }
 0x14a   : > { %1437 = vrot.lane.b32.xlu0 %v1435_v58, %s3258_s27  ;;  %v1475_v40 = vmul.f32 %v3820_v12, %v1474_v38  ;;  %v3877_v38 = vld [vmem:[%s3418_s19 + $0x3] ss:$4 sm:$0xf] }
 0x14b   : > { %v3832_v34 = vpop.permute.xlu1 %883 }
 0x14c   : > { %5567 = vst [vmem:[#allocation42_spill] sm:$0xff] %v3832_v34  ;;  %v3841_v58 = vpop.permute.xlu0 %873  ;;  %v1504_v34 = vstv %s3808_s3  ;;  %s3873_s3 = sld [smem:[#allocation6 + $0x42]] }
 0x14d   : > { %5568 = vst [vmem:[#allocation43_spill] sm:$0xff] %v3841_v58  ;;  %1467 = vrot.lane.b32.xlu1 %v1465_v19, %s3258_s27  ;;  %v1494_v58 = vstv %s3812_s4  ;;  %s3880_s4 = sld [smem:[#allocation6 + $0x83]] }
 0x14e   : > { %1457 = vrot.lane.b32.xlu0 %v1455_v56, %s3258_s27  ;;  %v3866_v56 = vld [vmem:[%s3418_s19] ss:$4 sm:$0x7] }
 0x14f   : > { %v3854_v9 = vpop.permute.xlu1 %904  ;;  %v183_v7 = vmul.f32 %v182_v18, %v3866_v56  ;;  %v1534_v18 = vstv %s3857_s24  ;;  %s4028_s24 = sld [smem:[#allocation6 + $0xe7]] }
 0x150   : > { %5569 = vst [vmem:[#allocation44_spill] sm:$0xff] %v3854_v9  ;;  %v3863_v19 = vpop.permute.xlu0 %893  ;;  %v1505_v9 = vmul.f32 %v3877_v38, %v1504_v34  ;;  %v3897_v34 = vld [vmem:[%s3418_s19 + $0x2] ss:$4 sm:$0x7]  ;;  %v1535_v21 = vmul.f32 %v3772_v1, %v1534_v18 }
 0x151   : > { %5570 = vst [vmem:[#allocation45_spill] sm:$0xff] %v3863_v19  ;;  %1487 = vrot.lane.b32.xlu1 %v1485_v28, %s3258_s27  ;;  %v1495_v19 = vmul.f32 %v3877_v38, %v1494_v58  ;;  %v216_v58 = vstv %s3830_s7  ;;  %s3924_s7 = sld [smem:[#allocation6 + $0x25]] }
 0x152   : > { %1477 = vrot.lane.b32.xlu0 %v1475_v40, %s3258_s27  ;;  %v176_v40 = vstv %s3837_s17  ;;  %v217_v0 = vmul.f32 %v3897_v34, %v216_v58  ;;  %v200_v58 = vadd.f32 %v199_v5, %v183_v7  ;;  %s3943_s17 = sld [smem:[#allocation6 + $0xe5]] }
 0x153   : > { %v3891_v28 = vpop.permute.xlu1 %924  ;;  %v177_v52 = vmul.f32 %v176_v40, %v3866_v56  ;;  %v185_v40 = vstv %s3861_s26  ;;  %v234_v25 = vstv %s3880_s4  ;;  %s4055_s26 = sld [smem:[#allocation6 + $0x68]] }
 0x154   : > { %5571 = vst [vmem:[#allocation46_spill] sm:$0xff] %v3891_v28  ;;  %v3901_v46 = vpop.permute.xlu0 %914  ;;  %v1525_v28 = vmul.f32 %v3877_v38, %v1524_v27  ;;  %v186_v5 = vmul.f32 %v185_v40, %v3866_v56  ;;  %s4089_s4 = sld [smem:[#allocation6 + $0xa8]] }
 0x155   : > { %5572 = vst [vmem:[#allocation47_spill] sm:$0xff] %v3901_v46  ;;  %1507 = vrot.lane.b32.xlu1 %v1505_v9, %s3258_s27  ;;  %v1515_v46 = vmul.f32 %v3877_v38, %v1514_v62  ;;  %v191_v9 = vmul.f32 %v3869_v20, %v190_v48  ;;  %v180_v62 = vmul.f32 %v179_v32, %v3866_v56  ;;  %v202_v48 = vstv %s3871_s30  ;;  %s4060_s30 = sld [smem:[#allocation6 + $0x28]] }
 0x156   : > { %1497 = vrot.lane.b32.xlu0 %v1495_v19, %s3258_s27  ;;  %v208_v19 = vstv %s3859_s25  ;;  %v1565_v32 = vstv %s3885_s0  ;;  %v203_v7 = vmul.f32 %v3869_v20, %v202_v48  ;;  %s3259_s0 = smov 79   ;;  %v1556_v56 = vmul.f32 %v3772_v1, %v1555_v57  ;;  %s4039_s25 = sld [smem:[#allocation6 + $0xa7]] }
 0x157   : > { %v3921_v27 = vpop.permute.xlu1 %944  ;;  %v192_v14 = vadd.f32 %v191_v9, %v177_v52  ;;  %v209_v10 = vmul.f32 %v3897_v34, %v208_v19  ;;  %v220_v52 = vstv %s3904_s20  ;;  %v230_v9 = vstv %s3908_s6  ;;  %s4102_s20 = sld [smem:[#allocation6 + $0x69]] }
 0x158   : > { %5573 = vst [vmem:[#allocation48_spill] sm:$0xff] %v3921_v27  ;;  %v3930_v39 = vpop.permute.xlu0 %934  ;;  %v212_v27 = vstv %s3873_s3  ;;  %v1566_v19 = vmul.f32 %v3772_v1, %v1565_v32  ;;  %v1585_v20 = vstv %s3917_s8  ;;  %v1575_v48 = vstv %s3924_s7  ;;  %s4083_s3 = sld [smem:[#allocation6 + $0xe8]]  ;;  %s4116_s6 = sld [smem:[#allocation6 + $0x29]] }
 0x159   : > { %5574 = vst [vmem:[#allocation49_spill] sm:$0xff] %v3930_v39  ;;  %1527 = vrot.lane.b32.xlu1 %v1525_v28, %s3258_s27  ;;  %v2791_v39 = vld [vmem:[%s3418_s19 + $0x3] ss:$4 sm:$0x7]  ;;  %v213_v28 = vmul.f32 %v3897_v34, %v212_v27  ;;  %v210_v27 = vadd.f32 %v209_v10, %v192_v14  ;;  %v238_v10 = vstv %s3934_s14  ;;  %v259_v14 = vrot.slane %v3568_v11, 1  ;;  %s4127_s8 = sld [smem:[#allocation6 + $0xe9]] }
 0x15a   : > { %1517 = vrot.lane.b32.xlu0 %v1515_v46, %s3258_s27  ;;  %v196_v46 = vadd.f32 %v195_v44, %v180_v62  ;;  %v218_v44 = vadd.f32 %v217_v0, %v200_v58  ;;  %v227_v62 = vmul.f32 %v2791_v39, %v226_v63  ;;  %v248_v0 = vrot.slane %v3560_v4, 1  ;;  %s3984_s27 = sld [smem:[#allocation6 + $0xe6]]  ;;  %s4129_s7 = sld [smem:[#allocation6 + $0xa9]] }
 0x15b   : > { %v3948_v60 = vpop.permute.xlu1 %964  ;;  %v1586_v63 = vmul.f32 %v3791_v50, %v1585_v20  ;;  %v1605_v58 = vstv %s3943_s17  ;;  %s4150_s14 = sld [smem:[#allocation6 + $0x6a]] }
 0x15c   : > { %5575 = vst [vmem:[#allocation50_spill] sm:$0xff] %v3948_v60  ;;  %v3956_v18 = vpop.permute.xlu0 %954  ;;  %v235_v60 = vmul.f32 %v2791_v39, %v234_v25  ;;  %v221_v25 = vmul.f32 %v3897_v34, %v220_v52  ;;  %v214_v32 = vadd.f32 %v213_v28, %v196_v46  ;;  %v1576_v34 = vmul.f32 %v3791_v50, %v1575_v48  ;;  %s4152_s17 = sld [smem:[#allocation6 + $0x2a]] }
 0x15d   : > { %5576 = vst [vmem:[#allocation51_spill] sm:$0xff] %v3956_v18  ;;  %1548 = vrot.lane.b32.xlu1 %v1546_v30, %s3259_s0  ;;  %v204_v30 = vadd.f32 %v203_v7, %v186_v5  ;;  %v269_v18 = vrot.slane %v3558_v2, 1  ;;  %v1595_v46 = vstv %s3951_s18  ;;  %v228_v28 = vadd.f32 %v227_v62, %v210_v27  ;;  %s3260_s18 = smov 78  }
 0x15e   : > { %1537 = vrot.lane.b32.xlu0 %v1535_v21, %s3259_s0  ;;  %v231_v21 = vmul.f32 %v2791_v39, %v230_v9  ;;  %v236_v5 = vadd.f32 %v235_v60, %v218_v44  ;;  %v239_v9 = vmul.f32 %v2791_v39, %v238_v10  ;;  %v250_v48 = vsel %vm249_vm0, %v3560_v4, %v248_v0 }
 0x15f   : > { %v3967_v40 = vpop.permute.xlu1 %984  ;;  %v222_v52 = vadd.f32 %v221_v25, %v204_v30  ;;  %v279_v60 = vrot.slane %v3566_v8, 1  ;;  %v1606_v44 = vmul.f32 %v3791_v50, %v1605_v58  ;;  %v260_v27 = vsel %vm249_vm0, %v3568_v11, %v259_v14 }
 0x160   : > { %v3973_v57 = vpop.permute.xlu0 %974  ;;  %v300_v39 = vrot.slane %v3574_v15, 1  ;;  %v1596_v62 = vmul.f32 %v3791_v50, %v1595_v46  ;;  %v1625_v30 = vstv %s3965_s1  ;;  %v320_v4 = vrot.slane %v3582_v22, 1  ;;  %s4165_s1 = sld [smem:[#allocation6 + $0xaa]] }
 0x161   : > { %1568 = vrot.lane.b32.xlu1 %v1566_v19, %s3259_s0  ;;  %v232_v19 = vadd.f32 %v231_v21, %v214_v32  ;;  %v1615_v32 = vstv %s3970_s28  ;;  %v240_v11 = vadd.f32 %v239_v9, %v222_v52  ;;  %v341_v21 = vrot.slane %v3590_v29, 1  ;;  %s4184_s28 = sld [smem:[#allocation6 + $0x6b]] }
 0x162   : > { %1558 = vrot.lane.b32.xlu0 %v1556_v56, %s3259_s0  ;;  %v270_v56 = vsel %vm249_vm0, %v3558_v2, %v269_v18  ;;  %v290_v2 = vrot.slane %v3576_v17, 1  ;;  %v310_v18 = vrot.slane %v3584_v24, 1  ;;  %v280_v14 = vsel %vm249_vm0, %v3566_v8, %v279_v60 }
 0x163   : > { %v3986_v7 = vpop.permute.xlu1 %1004  ;;  %v272_v10 = vadd.f32 %v270_v56, %v236_v5  ;;  %v262_v58 = vadd.f32 %v260_v27, %v232_v19  ;;  %v301_v46 = vsel %vm249_vm0, %v3574_v15, %v300_v39  ;;  %v1616_v52 = vmul.f32 %v3820_v12, %v1615_v32 }
 0x164   : > { %v3991_v20 = vpop.permute.xlu0 %994  ;;  %v1645_v9 = vstv %s3984_s27  ;;  %v291_v5 = vsel %vm249_vm0, %v3576_v17, %v290_v2  ;;  %v321_v8 = vsel %vm249_vm0, %v3582_v22, %v320_v4  ;;  %v1635_v15 = vstv %s3989_s22  ;;  %s4186_s27 = sld [smem:[#allocation6 + $0x2b]] }
 0x165   : > { %1588 = vrot.lane.b32.xlu1 %v1586_v63, %s3259_s0  ;;  %v252_v63 = vadd.f32 %v250_v48, %v228_v28  ;;  %v311_v28 = vsel %vm249_vm0, %v3584_v24, %v310_v18  ;;  %v342_v56 = vsel %vm249_vm0, %v3590_v29, %v341_v21  ;;  %v331_v48 = vrot.slane %v3592_v31, 1  ;;  %s4198_s22 = sld [smem:[#allocation6 + $0xeb]] }
 0x166   : > { %1578 = vrot.lane.b32.xlu0 %v1576_v34, %s3259_s0  ;;  %v1626_v34 = vmul.f32 %v3820_v12, %v1625_v30  ;;  %v361_v60 = vrot.slane %v3598_v35, 1  ;;  %v351_v17 = vrot.slane %v3600_v37, 1  ;;  %v282_v22 = vadd.f32 %v280_v14, %v240_v11 }
 0x167   : > { %v4011_v25 = vpop.permute.xlu1 %1024  ;;  %v303_v24 = vadd.f32 %v301_v46, %v262_v58  ;;  %v382_v27 = vrot.slane %v3606_v41, 1  ;;  %v1646_v39 = vmul.f32 %v3820_v12, %v1645_v9  ;;  %v372_v29 = vrot.slane %v3608_v43, 1 }
 0x168   : > { %v4017_v0 = vpop.permute.xlu0 %1014  ;;  %v1636_v30 = vmul.f32 %v3820_v12, %v1635_v15  ;;  %v1665_v2 = vstv %s4006_s15  ;;  %v323_v4 = vadd.f32 %v321_v8, %v282_v22  ;;  %v313_v18 = vadd.f32 %v311_v28, %v272_v10  ;;  %s4200_s15 = sld [smem:[#allocation6 + $0xab]] }
 0x169   : > { %1608 = vrot.lane.b32.xlu1 %v1606_v44, %s3259_s0  ;;  %v344_v32 = vadd.f32 %v342_v56, %v303_v24  ;;  %v1655_v21 = vstv %s4014_s23  ;;  %v362_v14 = vsel %vm249_vm0, %v3598_v35, %v361_v60  ;;  %v402_v58 = vrot.slane %v3614_v47, 1  ;;  %s4218_s23 = sld [smem:[#allocation6 + $0x6c]] }
 0x16a   : > { %1598 = vrot.lane.b32.xlu0 %v1596_v62, %s3259_s0  ;;  %v293_v62 = vadd.f32 %v291_v5, %v252_v63  ;;  %v332_v63 = vsel %vm249_vm0, %v3592_v31, %v331_v48  ;;  %v383_v10 = vsel %vm249_vm0, %v3606_v41, %v382_v27  ;;  %v423_v9 = vrot.slane %v3622_v53, 1 }
 0x16b   : > { %v4036_v19 = vpop.permute.xlu1 %1044  ;;  %v1666_v31 = vmul.f32 %v3877_v38, %v1665_v2  ;;  %v373_v35 = vsel %vm249_vm0, %v3608_v43, %v372_v29  ;;  %v1656_v5 = vmul.f32 %v3877_v38, %v1655_v21  ;;  %v1685_v8 = vstv %s4028_s24  ;;  %s4220_s24 = sld [smem:[#allocation6 + $0x2c]] }
 0x16c   : > { %v4046_v44 = vpop.permute.xlu0 %1034  ;;  %v334_v41 = vadd.f32 %v332_v63, %v293_v62  ;;  %v364_v28 = vadd.f32 %v362_v14, %v323_v4  ;;  %v443_v15 = vrot.slane %v3630_v59, 1  ;;  %v1675_v48 = vstv %s4039_s25  ;;  %s4234_s25 = sld [smem:[#allocation6 + $0xec]] }
 0x16d   : > { %1628 = vrot.lane.b32.xlu1 %v1626_v34, %s3259_s0  ;;  %v352_v34 = vsel %vm249_vm0, %v3600_v37, %v351_v17  ;;  %v412_v37 = vrot.slane %v3624_v55, 1  ;;  %v385_v60 = vadd.f32 %v383_v10, %v344_v32  ;;  %v403_v17 = vsel %vm249_vm0, %v3614_v47, %v402_v58 }
 0x16e   : > { %1618 = vrot.lane.b32.xlu0 %v1616_v52, %s3259_s0  ;;  %v392_v52 = vrot.slane %v3616_v49, 1  ;;  %v354_v43 = vadd.f32 %v352_v34, %v313_v18  ;;  %v433_v22 = vrot.slane %v3632_v61, 1  ;;  %v375_v27 = vadd.f32 %v373_v35, %v334_v41 }
 0x16f   : > { %v4057_v11 = vpop.permute.xlu1 %1065  ;;  %v424_v62 = vsel %vm413_vm1, %v3622_v53, %v423_v9  ;;  %v1686_v29 = vmul.f32 %v3877_v38, %v1685_v8  ;;  %v414_v47 = vsel %vm413_vm1, %v3624_v55, %v412_v37  ;;  %v1676_v2 = vmul.f32 %v3877_v38, %v1675_v48 }
 0x170   : > { %v4069_v46 = vpop.permute.xlu0 %1054  ;;  %v1706_v4 = vstv %s4055_s26  ;;  %v444_v53 = vsel %vm413_vm1, %v3630_v59, %v443_v15  ;;  %v453_v18 = vrot.slane %v3640_v6, 1  ;;  %v1695_v21 = vstv %s4060_s30  ;;  %s4236_s26 = sld [smem:[#allocation6 + $0xac]]  ;;  %s4254_s30 = sld [smem:[#allocation6 + $0x6d]] }
 0x171   : > { %1648 = vrot.lane.b32.xlu1 %v1646_v39, %s3259_s0  ;;  %v393_v39 = vsel %vm249_vm0, %v3616_v49, %v392_v52  ;;  %v405_v49 = vadd.f32 %v403_v17, %v364_v28  ;;  %v434_v55 = vsel %vm413_vm1, %v3632_v61, %v433_v22  ;;  %v483_v14 = vrot.slane %v3646_v13, 1 }
 0x172   : > { %1638 = vrot.lane.b32.xlu0 %v1636_v30, %s3259_s0  ;;  %v463_v30 = vrot.slane %v3638_v3, 1  ;;  %v395_v63 = vadd.f32 %v393_v39, %v354_v43  ;;  %v473_v34 = vrot.slane %v3648_v16, 1  ;;  %v426_v10 = vadd.f32 %v424_v62, %v385_v60 }
 0x173   : > { %v4086_v56 = vpop.permute.xlu1 %1085  ;;  %v416_v59 = vadd.f32 %v414_v47, %v375_v27  ;;  %v503_v52 = vrot.slane %v3654_v23, 1  ;;  %v1707_v9 = vmul.f32 %v3772_v1, %v1706_v4  ;;  %v446_v61 = vadd.f32 %v444_v53, %v405_v49 }
 0x174   : > { %v4094_v24 = vpop.permute.xlu0 %1075  ;;  %v1696_v35 = vmul.f32 %v3772_v1, %v1695_v21  ;;  %v1726_v37 = vstv %s4083_s3  ;;  %v454_v8 = vsel %vm413_vm1, %v3640_v6, %v453_v18  ;;  %v493_v41 = vrot.slane %v3656_v26, 1  ;;  %s4256_s3 = sld [smem:[#allocation6 + $0x2d]] }
 0x175   : > { %1668 = vrot.lane.b32.xlu1 %v1666_v31, %s3259_s0  ;;  %v464_v31 = vsel %vm413_vm1, %v3638_v3, %v463_v30  ;;  %v1716_v15 = vstv %s4089_s4  ;;  %v484_v48 = vsel %vm413_vm1, %v3646_v13, %v483_v14  ;;  %v474_v3 = vsel %vm413_vm1, %v3648_v16, %v473_v34  ;;  %s4269_s4 = sld [smem:[#allocation6 + $0xed]] }
 0x176   : > { %1658 = vrot.lane.b32.xlu0 %v1656_v5, %s3259_s0  ;;  %v436_v5 = vadd.f32 %v434_v55, %v395_v63  ;;  %v523_v43 = vrot.slane %v3662_v33, 1  ;;  %v513_v60 = vrot.slane %v3664_v36, 1  ;;  %v466_v6 = vadd.f32 %v464_v31, %v426_v10 }
 0x177   : > { %v4113_v32 = vpop.permute.xlu1 %1105  ;;  %v504_v22 = vsel %vm413_vm1, %v3654_v23, %v503_v52  ;;  %v1727_v13 = vmul.f32 %v3772_v1, %v1726_v37  ;;  %v1746_v16 = vstv %s4102_s20  ;;  %v456_v27 = vadd.f32 %v454_v8, %v416_v59  ;;  %s4271_s20 = sld [smem:[#allocation6 + $0xad]] }
 0x178   : > { %v4122_v58 = vpop.permute.xlu0 %1095  ;;  %v543_v39 = vrot.slane %v3670_v42, 1  ;;  %v533_v62 = vrot.slane %v3672_v45, 1  ;;  %v486_v23 = vadd.f32 %v484_v48, %v446_v61  ;;  %v476_v47 = vadd.f32 %v474_v3, %v436_v5  ;;  %v5577_v61 = vld [vmem:[#allocation12_spill] sm:$0xff] }
 0x179   : > { %1688 = vrot.lane.b32.xlu1 %v1686_v29, %s3259_s0  ;;  %v1717_v29 = vmul.f32 %v3772_v1, %v1716_v15  ;;  %v494_v30 = vsel %vm413_vm1, %v3656_v26, %v493_v41  ;;  %v1736_v4 = vstv %s4116_s6  ;;  %v506_v49 = vadd.f32 %v504_v22, %v466_v6  ;;  %v5579_v6 = vld [vmem:[#allocation14_spill] sm:$0xff]  ;;  %s4294_s6 = sld [smem:[#allocation6 + $0x6e]] }
 0x17a   : > { %1678 = vrot.lane.b32.xlu0 %v1676_v2, %s3259_s0  ;;  %s4163_s0 = sld [smem:[#allocation6 + $0xea]]  ;;  %v524_v53 = vsel %vm413_vm1, %v3662_v33, %v523_v43  ;;  %v514_v18 = vsel %vm413_vm1, %v3664_v36, %v513_v60  ;;  %v1747_v63 = vmul.f32 %v3791_v50, %v1746_v16  ;;  %v563_v55 = vrot.slane %v3678_v51, 1 }
 0x17b   : > { %v4139_v28 = vpop.permute.xlu1 %1125  ;;  %v553_v14 = vrot.slane %v3680_v54, 1  ;;  %v1766_v26 = vstv %s4127_s8  ;;  %v1756_v34 = vstv %s4129_s7  ;;  %v496_v33 = vadd.f32 %v494_v30, %v456_v27  ;;  %s4296_s8 = sld [smem:[#allocation6 + $0x2e]] }
 0x17c   : > { %v4148_v17 = vpop.permute.xlu0 %1115  ;;  %v544_v36 = vsel %vm413_vm1, %v3670_v42, %v543_v39  ;;  %v534_v10 = vsel %vm413_vm1, %v3672_v45, %v533_v62  ;;  %v1737_v59 = vmul.f32 %v3791_v50, %v1736_v4  ;;  %v526_v52 = vadd.f32 %v524_v53, %v486_v23  ;;  %v5581_v4 = vld [vmem:[#allocation16_spill] sm:$0xff]  ;;  %v5582_v53 = vld [vmem:[#allocation17_spill] sm:$0xff]  ;;  %s4312_s7 = sld [smem:[#allocation6 + $0xee]] }
 0x17d   : > { %1709 = vrot.lane.b32.xlu1 %v1707_v9, %s3260_s18  ;;  %v516_v9 = vadd.f32 %v514_v18, %v476_v47  ;;  %v584_v31 = vrot.slane %v5577_v61, 1  ;;  %v1767_v45 = vmul.f32 %v3791_v50, %v1766_v26  ;;  %v1757_v8 = vmul.f32 %v3791_v50, %v1756_v34 }
 0x17e   : > { %1698 = vrot.lane.b32.xlu0 %v1696_v35, %s3260_s18  ;;  %v5578_v35 = vld [vmem:[#allocation13_spill] sm:$0xff]  ;;  %v1786_v41 = vstv %s4150_s14  ;;  %v1776_v15 = vstv %s4152_s17  ;;  %v546_v48 = vadd.f32 %v544_v36, %v506_v49  ;;  %v536_v3 = vadd.f32 %v534_v10, %v496_v33  ;;  %s4314_s14 = sld [smem:[#allocation6 + $0xae]]  ;;  %s4337_s17 = sld [smem:[#allocation6 + $0x6f]] }
 0x17f   : > { %v4169_v2 = vpop.permute.xlu1 %1145  ;;  %v573_v37 = vrot.slane %v5578_v35, 1  ;;  %v564_v43 = vsel %vm413_vm1, %v3678_v51, %v563_v55  ;;  %v554_v60 = vsel %vm413_vm1, %v3680_v54, %v553_v14  ;;  %v604_v22 = vrot.slane %v5579_v6, 1 }
 0x180   : > { %v4176_v21 = vpop.permute.xlu0 %1135  ;;  %v1806_v27 = vstv %s4163_s0  ;;  %v1796_v39 = vstv %s4165_s1  ;;  %v585_v51 = vsel %vm574_vm2, %v5577_v61, %v584_v31  ;;  %v1777_v23 = vmul.f32 %v3820_v12, %v1776_v15  ;;  %v5585_v61 = vld [vmem:[#allocation19_spill] sm:$0xff]  ;;  %s4339_s0 = sld [smem:[#allocation6 + $0x2f]] }
 0x181   : > { %1729 = vrot.lane.b32.xlu1 %v1727_v13, %s3260_s18  ;;  %v5580_v13 = vld [vmem:[#allocation15_spill] sm:$0xff]  ;;  %v575_v54 = vsel %vm574_vm2, %v5578_v35, %v573_v37  ;;  %v566_v47 = vadd.f32 %v564_v43, %v526_v52  ;;  %v556_v30 = vadd.f32 %v554_v60, %v516_v9  ;;  %v624_v49 = vrot.slane %v5581_v4, 1  ;;  %v5584_v52 = vld [vmem:[#allocation18_spill] sm:$0xff]  ;;  %s4356_s1 = sld [smem:[#allocation6 + $0xef]] }
 0x182   : > { %1719 = vrot.lane.b32.xlu0 %v1717_v29, %s3260_s18  ;;  %v594_v16 = vrot.slane %v5580_v13, 1  ;;  %v1787_v29 = vmul.f32 %v3820_v12, %v1786_v41  ;;  %v614_v18 = vrot.slane %v5582_v53, 1  ;;  %v1807_v55 = vmul.f32 %v3820_v12, %v1806_v27 }
 0x183   : > { %v4196_v5 = vpop.permute.xlu1 %1165  ;;  %v1797_v14 = vmul.f32 %v3820_v12, %v1796_v39  ;;  %v1826_v26 = vstv %s4184_s28  ;;  %v1816_v34 = vstv %s4186_s27  ;;  %v587_v33 = vadd.f32 %v585_v51, %v546_v48  ;;  %s4358_s28 = sld [smem:[#allocation6 + $0xaf]]  ;;  %s4382_s27 = sld [smem:[#allocation6 + $0x70]] }
 0x184   : > { %v4202_v42 = vpop.permute.xlu0 %1155  ;;  %v577_v36 = vadd.f32 %v575_v54, %v536_v3  ;;  %v605_v10 = vsel %vm574_vm2, %v5579_v6, %v604_v22  ;;  %v644_v9 = vrot.slane %v5584_v52, 1  ;;  %v634_v31 = vrot.slane %v5585_v61, 1  ;;  %v5588_v6 = vld [vmem:[#allocation20_spill] sm:$0xff] }
 0x185   : > { %1749 = vrot.lane.b32.xlu1 %v1747_v63, %s3260_s18  ;;  %v1846_v37 = vstv %s4198_s22  ;;  %v625_v41 = vsel %vm574_vm2, %v5581_v4, %v624_v49  ;;  %v1827_v48 = vmul.f32 %v3877_v38, %v1826_v26  ;;  %v1817_v3 = vmul.f32 %v3877_v38, %v1816_v34  ;;  %s4384_s22 = sld [smem:[#allocation6 + $0x30]] }
 0x186   : > { %1739 = vrot.lane.b32.xlu0 %v1737_v59, %s3260_s18  ;;  %v595_v59 = vsel %vm574_vm2, %v5580_v13, %v594_v16  ;;  %v607_v43 = vadd.f32 %v605_v10, %v566_v47  ;;  %v664_v22 = vrot.slane %v5588_v6, 1  ;;  %v5589_v13 = vld [vmem:[#allocation21_spill] sm:$0xff]  ;;  %v4275_v27 = vmul.f32 %v3877_v38, %v1846_v37  ;;  %v5594_v37 = vld [vmem:[#allocation24_spill] sm:$0xff] }
 0x187   : > { %v4226_v62 = vpop.permute.xlu1 %1185  ;;  %v597_v60 = vadd.f32 %v595_v59, %v556_v30  ;;  %v654_v16 = vrot.slane %v5589_v13, 1  ;;  %v1867_v51 = vstv %s4218_s23  ;;  %v1856_v54 = vstv %s4220_s24  ;;  %s3261_s23 = smov 77   ;;  %s4428_s24 = sld [smem:[#allocation6 + $0x71]] }
 0x188   : > { %v4232_v63 = vpop.permute.xlu0 %1175  ;;  %v627_v47 = vadd.f32 %v625_v41, %v587_v33  ;;  %v635_v4 = vsel %vm574_vm2, %v5585_v61, %v634_v31  ;;  %v1887_v10 = vstv %s4234_s25  ;;  %v1877_v59 = vstv %s4236_s26  ;;  %v5595_v41 = vld [vmem:[#allocation25_spill] sm:$0xff]  ;;  %s4430_s25 = sld [smem:[#allocation6 + $0x31]] }
 0x189   : > { %5583 = vst [vmem:[#allocation12_spill] sm:$0xff] %v4232_v63  ;;  %1769 = vrot.lane.b32.xlu1 %v1767_v45, %s3260_s18  ;;  %v1836_v45 = vstv %s4200_s15  ;;  %v665_v33 = vsel %vm574_vm2, %v5588_v6, %v664_v22  ;;  %v637_v31 = vadd.f32 %v635_v4, %v597_v60  ;;  %v4319_v6 = vmul.f32 %v3772_v1, %v1887_v10  ;;  %s4404_s15 = sld [smem:[#allocation6 + $0xb0]]  ;;  %s4448_s26 = sld [smem:[#allocation6 + $0xf1]] }
 0x18a   : > { %1759 = vrot.lane.b32.xlu0 %v1757_v8, %s3260_s18  ;;  %v615_v8 = vsel %vm574_vm2, %v5582_v53, %v614_v18  ;;  %v4278_v39 = vmul.f32 %v3877_v38, %v1836_v45  ;;  %v5591_v53 = vld [vmem:[#allocation22_spill] sm:$0xff]  ;;  %v5592_v18 = vld [vmem:[#allocation23_spill] sm:$0xff]  ;;  %v704_v45 = vrot.slane %v5594_v37, 1  ;;  %v1907_v60 = vstv %s4254_s30  ;;  %s4450_s30 = sld [smem:[#allocation6 + $0xb1]] }
 0x18b   : > { %v4250_v35 = vpop.permute.xlu1 %1205  ;;  %v617_v30 = vadd.f32 %v615_v8, %v577_v36  ;;  %v674_v26 = vrot.slane %v5592_v18, 1  ;;  %v655_v36 = vsel %vm574_vm2, %v5589_v13, %v654_v16  ;;  %v694_v8 = vrot.slane %v5595_v41, 1 }
 0x18c   : > { %5586 = vst [vmem:[#allocation13_spill] sm:$0xff] %v4250_v35  ;;  %v4262_v15 = vpop.permute.xlu0 %1195  ;;  %v1897_v22 = vstv %s4256_s3  ;;  %v667_v13 = vadd.f32 %v665_v33, %v627_v47  ;;  %v705_v47 = vsel %vm574_vm2, %v5594_v37, %v704_v45  ;;  %v1937_v45 = vstv %s4296_s8  ;;  %s4468_s3 = sld [smem:[#allocation6 + $0x72]]  ;;  %s4517_s8 = sld [smem:[#allocation6 + $0x73]] }
 0x18d   : > { %5587 = vst [vmem:[#allocation14_spill] sm:$0xff] %v4262_v15  ;;  %1789 = vrot.lane.b32.xlu1 %v1787_v29, %s3260_s18  ;;  %v645_v29 = vsel %vm574_vm2, %v5584_v52, %v644_v9  ;;  %v4304_v52 = vmul.f32 %v3772_v1, %v1867_v51  ;;  %v4307_v9 = vmul.f32 %v3772_v1, %v1856_v54 }
 0x18e   : > { %1779 = vrot.lane.b32.xlu0 %v1777_v23, %s3260_s18  ;;  %v684_v23 = vrot.slane %v5591_v53, 1  ;;  %v647_v61 = vadd.f32 %v645_v29, %v607_v43  ;;  %v4322_v43 = vmul.f32 %v3772_v1, %v1877_v59  ;;  %v657_v16 = vadd.f32 %v655_v36, %v617_v30  ;;  %v5598_v29 = vld [vmem:[#allocation26_spill] sm:$0xff]  ;;  %v5601_v36 = vld [vmem:[#allocation29_spill] sm:$0xff] }
 0x18f   : > { %v4286_v49 = vpop.permute.xlu1 %1226  ;;  %v675_v51 = vsel %vm574_vm2, %v5592_v18, %v674_v26  ;;  %v724_v4 = vrot.slane %v5598_v29, 1  ;;  %v1927_v1 = vstv %s4269_s4  ;;  %v1917_v59 = vstv %s4271_s20  ;;  %v5600_v26 = vld [vmem:[#allocation28_spill] sm:$0xff]  ;;  %s4470_s4 = sld [smem:[#allocation6 + $0x32]] }
 0x190   : > { %5590 = vst [vmem:[#allocation15_spill] sm:$0xff] %v4286_v49  ;;  %v4290_v34 = vpop.permute.xlu0 %1215  ;;  %v695_v30 = vsel %vm574_vm2, %v5595_v41, %v694_v8  ;;  %v677_v18 = vadd.f32 %v675_v51, %v637_v31  ;;  %v745_v33 = vrot.slane %v5600_v26, 1  ;;  %v4363_v37 = vmul.f32 %v3791_v50, %v1927_v1  ;;  %v5605_v1 = vld [vmem:[#allocation31_spill] sm:$0xff]  ;;  %s4497_s20 = sld [smem:[#allocation6 + $0xf2]] }
 0x191   : > { %5593 = vst [vmem:[#allocation16_spill] sm:$0xff] %v4290_v34  ;;  %1809 = vrot.lane.b32.xlu1 %v1807_v55, %s3260_s18  ;;  %v1947_v31 = vstv %s4294_s6  ;;  %v707_v41 = vadd.f32 %v705_v47, %v667_v13  ;;  %v697_v8 = vadd.f32 %v695_v30, %v657_v16  ;;  %v5608_v30 = vld [vmem:[#allocation33_spill] sm:$0xff]  ;;  %s4509_s6 = sld [smem:[#allocation6 + $0xb2]] }
 0x192   : > { %1799 = vrot.lane.b32.xlu0 %v1797_v14, %s3260_s18  ;;  %v685_v14 = vsel %vm574_vm2, %v5591_v53, %v684_v23  ;;  %v4347_v53 = vmul.f32 %v3791_v50, %v1907_v60  ;;  %v725_v60 = vsel %vm574_vm2, %v5598_v29, %v724_v4  ;;  %v746_v13 = vsel %vm735_vm3, %v5600_v26, %v745_v33 }
 0x193   : > { %v4316_v55 = vpop.permute.xlu1 %1246  ;;  %v687_v23 = vadd.f32 %v685_v14, %v647_v61  ;;  %v4366_v61 = vmul.f32 %v3791_v50, %v1917_v59  ;;  %v5604_v14 = vld [vmem:[#allocation30_spill] sm:$0xff]  ;;  %v1957_v59 = vstv %s4314_s14  ;;  %v4393_v16 = vmul.f32 %v3820_v12, %v1947_v31  ;;  %s4548_s14 = sld [smem:[#allocation6 + $0xf3]] }
 0x194   : > { %5596 = vst [vmem:[#allocation17_spill] sm:$0xff] %v4316_v55  ;;  %v4330_v54 = vpop.permute.xlu0 %1236  ;;  %v5599_v55 = vld [vmem:[#allocation27_spill] sm:$0xff]  ;;  %v765_v51 = vrot.slane %v5604_v14, 1  ;;  %v1977_v33 = vstv %s4339_s0  ;;  %s4567_s0 = sld [smem:[#allocation6 + $0x74]] }
 0x195   : > { %5597 = vst [vmem:[#allocation18_spill] sm:$0xff] %v4330_v54  ;;  %v714_v10 = vrot.slane %v5599_v55, 1  ;;  %1829 = vrot.lane.b32.xlu1 %v1827_v48, %s3260_s18  ;;  %v4350_v48 = vmul.f32 %v3791_v50, %v1897_v22  ;;  %v734_v54 = vrot.slane %v5601_v36, 1  ;;  %v1967_v50 = vstv %s4312_s7  ;;  %s4525_s7 = sld [smem:[#allocation6 + $0x33]] }
 0x196   : > { %1819 = vrot.lane.b32.xlu0 %v1817_v3, %s3260_s18  ;;  %v727_v29 = vadd.f32 %v725_v60, %v687_v23  ;;  %v4412_v23 = vmul.f32 %v3820_v12, %v1957_v59  ;;  %v1997_v59 = vstv %s4358_s28  ;;  %s4604_s28 = sld [smem:[#allocation6 + $0xf4]] }
 0x197   : > { %v4354_v34 = vpop.permute.xlu1 %1266  ;;  %v715_v22 = vsel %vm574_vm2, %v5599_v55, %v714_v10  ;;  %v5607_v10 = vld [vmem:[#allocation32_spill] sm:$0xff] }
 0x198   : > { %5602 = vst [vmem:[#allocation19_spill] sm:$0xff] %v4354_v34  ;;  %v4360_v3 = vpop.permute.xlu0 %1256  ;;  %v717_v4 = vadd.f32 %v715_v22, %v677_v18  ;;  %v785_v47 = vrot.slane %v5607_v10, 1  ;;  %v775_v34 = vrot.slane %v5608_v30, 1  ;;  %v1987_v18 = vstv %s4337_s17  ;;  %s4558_s17 = sld [smem:[#allocation6 + $0xb3]] }
 0x199   : > { %5603 = vst [vmem:[#allocation20_spill] sm:$0xff] %v4360_v3  ;;  %1849 = vrot.lane.b32.xlu1 %v4275_v27, %s3260_s18  ;;  %v755_v3 = vrot.slane %v5605_v1, 1  ;;  %v736_v27 = vsel %vm735_vm3, %v5601_v36, %v734_v54  ;;  %v4409_v54 = vmul.f32 %v3820_v12, %v1967_v50  ;;  %v748_v36 = vadd.f32 %v746_v13, %v707_v41  ;;  %v5611_v50 = vld [vmem:[#allocation35_spill] sm:$0xff]  ;;  %v5614_v13 = vld [vmem:[#allocation36_spill] sm:$0xff] }
 0x19a   : > { %1839 = vrot.lane.b32.xlu0 %v4278_v39, %s3260_s18  ;;  %v4396_v39 = vmul.f32 %v3820_v12, %v1937_v45  ;;  %s4402_s18 = sld [smem:[#allocation6 + $0xf0]]  ;;  %v738_v31 = vadd.f32 %v736_v27, %v697_v8  ;;  %v766_v45 = vsel %vm735_vm3, %v5604_v14, %v765_v51  ;;  %v2007_v12 = vstv %s4356_s1  ;;  %s4569_s1 = sld [smem:[#allocation6 + $0x34]] }
 0x19b   : > { %v4390_v55 = vpop.permute.xlu1 %1286  ;;  %v756_v60 = vsel %vm735_vm3, %v5605_v1, %v755_v3  ;;  %v786_v41 = vsel %vm735_vm3, %v5607_v10, %v785_v47  ;;  %v4439_v8 = vmul.f32 %v3877_v38, %v1987_v18  ;;  %v4442_v14 = vmul.f32 %v3877_v38, %v1977_v33  ;;  %v5617_v33 = vld [vmem:[#allocation38_spill] sm:$0xff] }
 0x19c   : > { %5606 = vst [vmem:[#allocation21_spill] sm:$0xff] %v4390_v55  ;;  %v4400_v26 = vpop.permute.xlu0 %1276  ;;  %v768_v51 = vadd.f32 %v766_v45, %v727_v29  ;;  %v758_v1 = vadd.f32 %v756_v60, %v717_v4  ;;  %v825_v27 = vrot.slane %v5614_v13, 1  ;;  %v4458_v29 = vmul.f32 %v3877_v38, %v1997_v59  ;;  %v5618_v45 = vld [vmem:[#allocation39_spill] sm:$0xff] }
 0x19d   : > { %5609 = vst [vmem:[#allocation22_spill] sm:$0xff] %v4400_v26  ;;  %1870 = vrot.lane.b32.xlu1 %v4304_v52, %s3261_s23  ;;  %v5610_v52 = vld [vmem:[#allocation34_spill] sm:$0xff]  ;;  %v795_v26 = vrot.slane %v5611_v50, 1  ;;  %v2028_v4 = vstv %s4382_s27  ;;  %v2017_v10 = vstv %s4384_s22  ;;  %v788_v47 = vadd.f32 %v786_v41, %v748_v36  ;;  %s4606_s27 = sld [smem:[#allocation6 + $0xb4]]  ;;  %s4614_s22 = sld [smem:[#allocation6 + $0x75]] }
 0x19e   : > { %1859 = vrot.lane.b32.xlu0 %v4307_v9, %s3261_s23  ;;  %v805_v22 = vrot.slane %v5610_v52, 1  ;;  %v776_v9 = vsel %vm735_vm3, %v5608_v30, %v775_v34  ;;  %v4455_v34 = vmul.f32 %v3877_v38, %v2007_v12  ;;  %v845_v38 = vrot.slane %v5617_v33, 1 }
 0x19f   : > { %v4424_v55 = vpop.permute.xlu1 %1306  ;;  %v796_v18 = vsel %vm735_vm3, %v5611_v50, %v795_v26  ;;  %v835_v60 = vrot.slane %v5618_v45, 1  ;;  %v2038_v12 = vstv %s4404_s15  ;;  %s4653_s15 = sld [smem:[#allocation6 + $0xf5]] }
 0x1a0   : > { %5612 = vst [vmem:[#allocation23_spill] sm:$0xff] %v4424_v55  ;;  %v4436_v3 = vpop.permute.xlu0 %1296  ;;  %v5615_v55 = vld [vmem:[#allocation37_spill] sm:$0xff]  ;;  %v806_v30 = vsel %vm735_vm3, %v5610_v52, %v805_v22  ;;  %v826_v52 = vsel %vm735_vm3, %v5614_v13, %v825_v27 }
 0x1a1   : > { %5613 = vst [vmem:[#allocation24_spill] sm:$0xff] %v4436_v3  ;;  %v815_v49 = vrot.slane %v5615_v55, 1  ;;  %1890 = vrot.lane.b32.xlu1 %v4319_v6, %s3261_s23  ;;  %v778_v6 = vadd.f32 %v776_v9, %v738_v31  ;;  %v2048_v31 = vstv %s4402_s18  ;;  %v4485_v22 = vld [vmem:[%s3418_s19] ss:$4 sm:$0xf]  ;;  %v808_v41 = vadd.f32 %v806_v30, %v768_v51  ;;  %s4616_s18 = sld [smem:[#allocation6 + $0x35]] }
 0x1a2   : > { %1880 = vrot.lane.b32.xlu0 %v4322_v43, %s3261_s23  ;;  %5620 = vst [vmem:[#allocation27_spill] sm:$0xff] %v4485_v22  ;;  %v4488_v50 = vmul.f32 %v4485_v22, %v2028_v4  ;;  %v4491_v59 = vmul.f32 %v4485_v22, %v2017_v10  ;;  %v798_v9 = vadd.f32 %v796_v18, %v758_v1  ;;  %v5622_v13 = vld [vmem:[#allocation41_spill] sm:$0xff]  ;;  %v2068_v51 = vstv %s4428_s24  ;;  %s4655_s24 = sld [smem:[#allocation6 + $0xb5]] }
 0x1a3   : > { %v4466_v43 = vpop.permute.xlu1 %1326  ;;  %v816_v26 = vsel %vm735_vm3, %v5615_v55, %v815_v49  ;;  %v855_v27 = vrot.slane %v5622_v13, 1  ;;  %v4505_v55 = vmul.f32 %v4485_v22, %v2038_v12  ;;  %v2058_v1 = vstv %s4430_s25  ;;  %s4666_s25 = sld [smem:[#allocation6 + $0x76]] }
 0x1a4   : > { %5616 = vst [vmem:[#allocation25_spill] sm:$0xff] %v4466_v43  ;;  %v4474_v36 = vpop.permute.xlu0 %1316  ;;  %v828_v4 = vadd.f32 %v826_v52, %v788_v47  ;;  %v818_v10 = vadd.f32 %v816_v26, %v778_v6  ;;  %v836_v30 = vsel %vm735_vm3, %v5618_v45, %v835_v60  ;;  %v2088_v47 = vstv %s4448_s26  ;;  %v4534_v45 = vld [vmem:[%s3418_s19 + $0x1] ss:$4 sm:$0xf]  ;;  %s4676_s26 = sld [smem:[#allocation6 + $0x36]] }
 0x1a5   : > { %5619 = vst [vmem:[#allocation26_spill] sm:$0xff] %v4474_v36  ;;  %1910 = vrot.lane.b32.xlu1 %v4347_v53, %s3261_s23  ;;  %v5621_v36 = vld [vmem:[#allocation40_spill] sm:$0xff]  ;;  %v4502_v53 = vmul.f32 %v4485_v22, %v2048_v31  ;;  %v5625_v31 = vld [vmem:[#allocation42_spill] sm:$0xff]  ;;  %v2078_v6 = vstv %s4450_s30  ;;  %5627 = vst [vmem:[#allocation30_spill] sm:$0xff] %v4534_v45  ;;  %v4537_v60 = vmul.f32 %v4534_v45, %v2068_v51  ;;  %s3262_s30 = smov 56  }
 0x1a6   : > { %v865_v43 = vrot.slane %v5621_v36, 1  ;;  %1900 = vrot.lane.b32.xlu0 %v4350_v48, %s3261_s23  ;;  %v846_v48 = vsel %vm735_vm3, %v5617_v33, %v845_v38  ;;  %v885_v12 = vrot.slane %v5625_v31, 1  ;;  %v856_v38 = vsel %vm735_vm3, %v5622_v13, %v855_v27  ;;  %v5628_v52 = vld [vmem:[#allocation44_spill] sm:$0xff] }
 0x1a7   : > { %v4499_v49 = vpop.permute.xlu1 %1346  ;;  %v906_v26 = vrot.slane %v5628_v52, 1  ;;  %v838_v13 = vadd.f32 %v836_v30, %v798_v9  ;;  %v4553_v51 = vmul.f32 %v4534_v45, %v2088_v47  ;;  %v5633_v9 = vld [vmem:[#allocation46_spill] sm:$0xff]  ;;  %v858_v30 = vadd.f32 %v856_v38, %v818_v10  ;;  %v5637_v10 = vld [vmem:[#allocation47_spill] sm:$0xff] }
 0x1a8   : > { %5623 = vst [vmem:[#allocation28_spill] sm:$0xff] %v4499_v49  ;;  %v4515_v18 = vpop.permute.xlu0 %1336  ;;  %v5626_v49 = vld [vmem:[#allocation43_spill] sm:$0xff]  ;;  %v866_v33 = vsel %vm735_vm3, %v5621_v36, %v865_v43  ;;  %v2108_v43 = vstv %s4468_s3  ;;  %v2098_v36 = vstv %s4470_s4  ;;  %v916_v47 = vrot.slane %v5637_v10, 1  ;;  %s4730_s3 = sld [smem:[#allocation6 + $0xb6]]  ;;  %s4779_s4 = sld [smem:[#allocation6 + $0x77]] }
 0x1a9   : > { %5624 = vst [vmem:[#allocation29_spill] sm:$0xff] %v4515_v18  ;;  %v875_v3 = vrot.slane %v5626_v49, 1  ;;  %1930 = vrot.lane.b32.xlu1 %v4363_v37, %s3261_s23  ;;  %v4540_v37 = vmul.f32 %v4534_v45, %v2058_v1  ;;  %v5629_v18 = vld [vmem:[#allocation45_spill] sm:$0xff]  ;;  %v4556_v1 = vmul.f32 %v4534_v45, %v2078_v6  ;;  %v868_v63 = vadd.f32 %v866_v33, %v828_v4 }
 0x1aa   : > { %1920 = vrot.lane.b32.xlu0 %v4366_v61, %s3261_s23  ;;  %v895_v15 = vrot.slane %v5629_v18, 1  ;;  %v848_v61 = vadd.f32 %v846_v48, %v808_v41  ;;  %v926_v48 = vrot.slane %v5633_v9, 1  ;;  %v4574_v4 = vld [vmem:[%s3418_s19 + $0x2] ss:$4 sm:$0xf] }
 0x1ab   : > { %v4544_v35 = vpop.permute.xlu1 %1366  ;;  %5632 = vst [vmem:[#allocation33_spill] sm:$0xff] %v4556_v1  ;;  %v876_v41 = vsel %vm735_vm3, %v5626_v49, %v875_v3  ;;  %5634 = vst [vmem:[#allocation34_spill] sm:$0xff] %v4574_v4  ;;  %v4580_v3 = vmul.f32 %v4574_v4, %v2098_v36  ;;  %v2128_v49 = vstv %s4497_s20  ;;  %v2148_v36 = vstv %s4517_s8  ;;  %v5641_v1 = vld [vmem:[#allocation49_spill] sm:$0xff]  ;;  %s4804_s20 = sld [smem:[#allocation6 + $0x37]] }
 0x1ac   : > { %5630 = vst [vmem:[#allocation31_spill] sm:$0xff] %v4544_v35  ;;  %v4550_v27 = vpop.permute.xlu0 %1356  ;;  %v886_v35 = vsel %vm735_vm3, %v5625_v31, %v885_v12  ;;  %v4577_v31 = vmul.f32 %v4574_v4, %v2108_v43  ;;  %v897_v12 = vsel %vm896_vm4, %v5629_v18, %v895_v15  ;;  %v878_v38 = vadd.f32 %v876_v41, %v838_v13  ;;  %v5639_v43 = vld [vmem:[#allocation48_spill] sm:$0xff]  ;;  %s4872_s8 = sld [smem:[#allocation6 + $0xb7]] }
 0x1ad   : > { %5631 = vst [vmem:[#allocation32_spill] sm:$0xff] %v4550_v27  ;;  %1950 = vrot.lane.b32.xlu1 %v4393_v16, %s3261_s23  ;;  %5636 = vst [vmem:[#allocation36_spill] sm:$0xff] %v4580_v3  ;;  %v907_v16 = vsel %vm896_vm4, %v5628_v52, %v906_v26  ;;  %v888_v33 = vadd.f32 %v886_v35, %v848_v61  ;;  %v946_v27 = vrot.slane %v5639_v43, 1  ;;  %v936_v52 = vrot.slane %v5641_v1, 1  ;;  %v5642_v61 = vld [vmem:[#allocation50_spill] sm:$0xff] }
 0x1ae   : > { %1940 = vrot.lane.b32.xlu0 %v4396_v39, %s3261_s23  ;;  %5635 = vst [vmem:[#allocation35_spill] sm:$0xff] %v4577_v31  ;;  %v2118_v39 = vstv %s4509_s6  ;;  %v927_v3 = vsel %vm896_vm4, %v5633_v9, %v926_v48  ;;  %v4601_v15 = vmul.f32 %v4574_v4, %v2128_v49  ;;  %v2138_v35 = vstv %s4525_s7  ;;  %s4847_s6 = sld [smem:[#allocation6 + $0xf7]]  ;;  %s3263_s7 = smov 55  }
 0x1af   : > { %v4588_v6 = vpop.permute.xlu1 %1387  ;;  %v909_v18 = vadd.f32 %v907_v16, %v868_v63  ;;  %v899_v26 = vadd.f32 %v897_v12, %v858_v30  ;;  %v966_v13 = vrot.slane %v5642_v61, 1  ;;  %v4612_v41 = vmul.f32 %v4574_v4, %v2118_v39  ;;  %v5643_v63 = vld [vmem:[#allocation51_spill] sm:$0xff] }
 0x1b0   : > { %5638 = vst [vmem:[#allocation37_spill] sm:$0xff] %v4588_v6  ;;  %v4592_v31 = vpop.permute.xlu0 %1376  ;;  %v956_v9 = vrot.slane %v5643_v63, 1  ;;  %v4624_v30 = vld [vmem:[%s3418_s19 + $0x3] ss:$4 sm:$0xf]  ;;  %v2168_v49 = vstv %s4548_s14  ;;  %v929_v16 = vadd.f32 %v927_v3, %v888_v33  ;;  %v947_v12 = vsel %vm896_vm4, %v5639_v43, %v946_v27  ;;  %s4946_s14 = sld [smem:[#allocation6 + $0x78]] }
 0x1b1   : > { %5640 = vst [vmem:[#allocation38_spill] sm:$0xff] %v4592_v31  ;;  %1970 = vrot.lane.b32.xlu1 %v4409_v54, %s3261_s23  ;;  %v917_v54 = vsel %vm896_vm4, %v5637_v10, %v916_v47  ;;  %v4635_v31 = vmul.f32 %v4624_v30, %v2138_v35  ;;  %v2158_v10 = vstv %s4558_s17  ;;  %v937_v47 = vsel %vm896_vm4, %v5641_v1, %v936_v52  ;;  %s4973_s17 = sld [smem:[#allocation6 + $0x38]] }
 0x1b2   : > { %1960 = vrot.lane.b32.xlu0 %v4412_v23, %s3261_s23  ;;  %v4627_v23 = vmul.f32 %v4624_v30, %v2148_v36  ;;  %v2189_v36 = vstv %s4567_s0  ;;  %v2178_v6 = vstv %s4569_s1  ;;  %v919_v3 = vadd.f32 %v917_v54, %v878_v38  ;;  %s5061_s0 = sld [smem:[#allocation6 + $0xf8]] }
 0x1b3   : > { %v4621_v48 = vpop.permute.xlu1 %1407  ;;  %v967_v27 = vsel %vm896_vm4, %v5642_v61, %v966_v13  ;;  %v976_v33 = vrot.slane %v3973_v57, 1  ;;  %v4651_v43 = vmul.f32 %v4624_v30, %v2168_v49  ;;  %v1006_v1 = vrot.slane %v3986_v7, 1  ;;  %s5066_s1 = sld [smem:[#allocation6 + $0xb8]] }
 0x1b4   : > { %5644 = vst [vmem:[#allocation39_spill] sm:$0xff] %v4621_v48  ;;  %v4632_v39 = vpop.permute.xlu0 %1397  ;;  %v986_v48 = vrot.slane %v3967_v40, 1  ;;  %v996_v38 = vrot.slane %v3991_v20, 1  ;;  %v949_v35 = vadd.f32 %v947_v12, %v909_v18  ;;  %v939_v61 = vadd.f32 %v937_v47, %v899_v26 }
 0x1b5   : > { %1990 = vrot.lane.b32.xlu1 %v4439_v8, %s3261_s23  ;;  %v957_v8 = vsel %vm896_vm4, %v5643_v63, %v956_v9  ;;  %v4671_v54 = vmul.f32 %v4485_v22, %v2189_v36  ;;  %v4674_v63 = vmul.f32 %v4485_v22, %v2178_v6  ;;  %v969_v9 = vadd.f32 %v967_v27, %v929_v16 }
 0x1b6   : > { %1980 = vrot.lane.b32.xlu0 %v4442_v14, %s3261_s23  ;;  %v4664_v14 = vmul.f32 %v4624_v30, %v2158_v10  ;;  %v987_v49 = vsel %vm896_vm4, %v3967_v40, %v986_v48  ;;  %v2209_v18 = vstv %s4604_s28  ;;  %v2199_v26 = vstv %s4606_s27  ;;  %s5078_s28 = sld [smem:[#allocation6 + $0x79]] }
 0x1b7   : > { %v4661_v52 = vpop.permute.xlu1 %1427  ;;  %v959_v12 = vadd.f32 %v957_v8, %v919_v3  ;;  %v977_v10 = vsel %vm896_vm4, %v3973_v57, %v976_v33  ;;  %v2229_v6 = vstv %s4614_s22  ;;  %v2219_v47 = vstv %s4616_s18  ;;  %s5082_s27 = sld [smem:[#allocation6 + $0x39]] }
 0x1b8   : > { %v4668_v13 = vpop.permute.xlu0 %1417  ;;  %v1007_v16 = vsel %vm896_vm4, %v3986_v7, %v1006_v1  ;;  %v997_v40 = vsel %vm896_vm4, %v3991_v20, %v996_v38  ;;  %v1026_v48 = vrot.slane %v4011_v25, 1  ;;  %v989_v3 = vadd.f32 %v987_v49, %v949_v35  ;;  %s5096_s22 = sld [smem:[#allocation6 + $0xf9]] }
 0x1b9   : > { %2010 = vrot.lane.b32.xlu1 %v4455_v34, %s3261_s23  ;;  %v1016_v34 = vrot.slane %v4017_v0, 1  ;;  %v1046_v57 = vrot.slane %v4036_v19, 1  ;;  %v4702_v27 = vmul.f32 %v4485_v22, %v2209_v18  ;;  %v4705_v7 = vmul.f32 %v4485_v22, %v2199_v26  ;;  %s5100_s18 = sld [smem:[#allocation6 + $0xb9]] }
 0x1ba   : > { %2000 = vrot.lane.b32.xlu0 %v4458_v29, %s3261_s23  ;;  %s4707_s23 = sld [smem:[#allocation6 + $0xf6]]  ;;  %v979_v20 = vadd.f32 %v977_v10, %v939_v61  ;;  %v1036_v33 = vrot.slane %v4046_v44, 1  ;;  %v4713_v8 = vmul.f32 %v4534_v45, %v2229_v6  ;;  %v4716_v1 = vmul.f32 %v4534_v45, %v2219_v47 }
 0x1bb   : > { %v4696_v36 = vpop.permute.xlu1 %1447  ;;  %v1009_v38 = vadd.f32 %v1007_v16, %v969_v9  ;;  %v999_v35 = vadd.f32 %v997_v40, %v959_v12  ;;  %v2249_v49 = vstv %s4653_s15  ;;  %v2239_v61 = vstv %s4655_s24  ;;  %s3264_s15 = smov 54   ;;  %s5108_s24 = sld [smem:[#allocation6 + $0x7a]] }
 0x1bc   : > { %v4699_v29 = vpop.permute.xlu0 %1437  ;;  %5645 = vst [vmem:[#allocation40_spill] sm:$0xff] %v4716_v1  ;;  %v1027_v18 = vsel %vm896_vm4, %v4011_v25, %v1026_v48  ;;  %v1067_v26 = vrot.slane %v4057_v11, 1  ;;  %v2269_v6 = vstv %s4666_s25  ;;  %v1047_v9 = vsel %vm896_vm4, %v4036_v19, %v1046_v57  ;;  %s5112_s25 = sld [smem:[#allocation6 + $0x3a]] }
 0x1bd   : > { %2031 = vrot.lane.b32.xlu1 %v4488_v50, %s3262_s30  ;;  %v1017_v50 = vsel %vm896_vm4, %v4017_v0, %v1016_v34  ;;  %v1087_v12 = vrot.slane %v4086_v56, 1  ;;  %v2259_v25 = vstv %s4676_s26  ;;  %v1037_v0 = vsel %vm896_vm4, %v4046_v44, %v1036_v33  ;;  %s5120_s26 = sld [smem:[#allocation6 + $0xfa]] }
 0x1be   : > { %2020 = vrot.lane.b32.xlu0 %v4491_v59, %s3262_s30  ;;  %v1056_v59 = vrot.slane %v4069_v46, 1  ;;  %v1077_v16 = vrot.slane %v4094_v24, 1  ;;  %v1107_v40 = vrot.slane %v4113_v32, 1  ;;  %v4746_v48 = vmul.f32 %v4534_v45, %v2249_v49 }
 0x1bf   : > { %v4727_v10 = vpop.permute.xlu1 %1467  ;;  %v1029_v19 = vadd.f32 %v1027_v18, %v989_v3  ;;  %v1019_v34 = vadd.f32 %v1017_v50, %v979_v20  ;;  %v1097_v57 = vrot.slane %v4122_v58, 1  ;;  %v4752_v44 = vmul.f32 %v4534_v45, %v2239_v61 }
 0x1c0   : > { %v4736_v47 = vpop.permute.xlu0 %1457  ;;  %v1049_v33 = vadd.f32 %v1047_v9, %v1009_v38  ;;  %v1068_v22 = vsel %vm1057_vm5, %v4057_v11, %v1067_v26  ;;  %v4762_v3 = vmul.f32 %v4574_v4, %v2259_v25  ;;  %v1039_v20 = vadd.f32 %v1037_v0, %v999_v35 }
 0x1c1   : > { %2051 = vrot.lane.b32.xlu1 %v4502_v53, %s3262_s30  ;;  %v4759_v53 = vmul.f32 %v4574_v4, %v2269_v6  ;;  %v1058_v49 = vsel %vm1057_vm5, %v4069_v46, %v1056_v59  ;;  %v2289_v61 = vstv %s4707_s23  ;;  %v1078_v11 = vsel %vm1057_vm5, %v4094_v24, %v1077_v16  ;;  %s5124_s23 = sld [smem:[#allocation6 + $0xba]] }
 0x1c2   : > { %2041 = vrot.lane.b32.xlu0 %v4505_v55, %s3262_s30  ;;  %v1088_v55 = vsel %vm1057_vm5, %v4086_v56, %v1087_v12  ;;  %v1108_v18 = vsel %vm1057_vm5, %v4113_v32, %v1107_v40  ;;  %v1127_v50 = vrot.slane %v4139_v28, 1  ;;  %v1117_v35 = vrot.slane %v4148_v17, 1 }
 0x1c3   : > { %v4756_v1 = vpop.permute.xlu1 %1487  ;;  %v1070_v46 = vadd.f32 %v1068_v22, %v1029_v19  ;;  %v1098_v56 = vsel %vm1057_vm5, %v4122_v58, %v1097_v57  ;;  %v1147_v26 = vrot.slane %v4169_v2, 1  ;;  %v1137_v24 = vrot.slane %v4176_v21, 1 }
 0x1c4   : > { %v4768_v38 = vpop.permute.xlu0 %1477  ;;  %v1060_v32 = vadd.f32 %v1058_v49, %v1019_v34  ;;  %v1167_v6 = vrot.slane %v4196_v5, 1  ;;  %v1157_v9 = vrot.slane %v4202_v42, 1  ;;  %v1090_v12 = vadd.f32 %v1088_v55, %v1049_v33  ;;  %v5646_v33 = vld [vmem:[#allocation12_spill] sm:$0xff]  ;;  %v5647_v49 = vld [vmem:[#allocation13_spill] sm:$0xff] }
 0x1c5   : > { %2071 = vrot.lane.b32.xlu1 %v4537_v60, %s3262_s30  ;;  %v2279_v60 = vstv %s4730_s3  ;;  %v1080_v22 = vadd.f32 %v1078_v11, %v1039_v20  ;;  %v1110_v25 = vadd.f32 %v1108_v18, %v1070_v46  ;;  %v4795_v58 = vmul.f32 %v4574_v4, %v2289_v61  ;;  %v5648_v55 = vld [vmem:[#allocation33_spill] sm:$0xff]  ;;  %v5649_v61 = vld [vmem:[#allocation14_spill] sm:$0xff]  ;;  %v5651_v46 = vld [vmem:[#allocation16_spill] sm:$0xff]  ;;  %s5136_s3 = sld [smem:[#allocation6 + $0x3b]] }
 0x1c6   : > { %2061 = vrot.lane.b32.xlu0 %v4540_v37, %s3262_s30  ;;  %v1100_v16 = vadd.f32 %v1098_v56, %v1060_v32  ;;  %v1128_v37 = vsel %vm1057_vm5, %v4139_v28, %v1127_v50  ;;  %v1118_v40 = vsel %vm1057_vm5, %v4148_v17, %v1117_v35  ;;  %v1187_v19 = vrot.slane %v4226_v62, 1 }
 0x1c7   : > { %v4789_v59 = vpop.permute.xlu1 %1507  ;;  %v1148_v34 = vsel %vm1057_vm5, %v4169_v2, %v1147_v26  ;;  %v1138_v57 = vsel %vm1057_vm5, %v4176_v21, %v1137_v24  ;;  %v1177_v20 = vrot.slane %v5646_v33, 1  ;;  %v1207_v28 = vrot.slane %v5647_v49, 1  ;;  %v5650_v2 = vld [vmem:[#allocation15_spill] sm:$0xff] }
 0x1c8   : > { %v4792_v0 = vpop.permute.xlu0 %1497  ;;  %v1168_v17 = vsel %vm1057_vm5, %v4196_v5, %v1167_v6  ;;  %v1197_v11 = vrot.slane %v5649_v61, 1  ;;  %v1228_v18 = vrot.slane %v5650_v2, 1  ;;  %v1130_v21 = vadd.f32 %v1128_v37, %v1090_v12  ;;  %v5653_v6 = vld [vmem:[#allocation35_spill] sm:$0xff] }
 0x1c9   : > { %2091 = vrot.lane.b32.xlu1 %v4553_v51, %s3262_s30  ;;  %v1158_v51 = vsel %vm1057_vm5, %v4202_v42, %v1157_v9  ;;  %v1120_v35 = vadd.f32 %v1118_v40, %v1080_v22  ;;  %v1217_v56 = vrot.slane %v5651_v46, 1  ;;  %v4826_v24 = vmul.f32 %v4574_v4, %v2279_v60  ;;  %v5654_v60 = vld [vmem:[#allocation36_spill] sm:$0xff]  ;;  %v5656_v40 = vld [vmem:[#allocation18_spill] sm:$0xff] }
 0x1ca   : > { %2081 = vrot.lane.b32.xlu0 %v5648_v55, %s3262_s30  ;;  %v1150_v32 = vadd.f32 %v1148_v34, %v1110_v25  ;;  %v1140_v5 = vadd.f32 %v1138_v57, %v1100_v16  ;;  %v1188_v42 = vsel %vm1057_vm5, %v4226_v62, %v1187_v19  ;;  %v2309_v9 = vstv %s4779_s4  ;;  %v5655_v16 = vld [vmem:[#allocation17_spill] sm:$0xff]  ;;  %s5144_s4 = sld [smem:[#allocation6 + $0xfb]] }
 0x1cb   : > { %v4820_v50 = vpop.permute.xlu1 %1527  ;;  %5652 = vst [vmem:[#allocation41_spill] sm:$0xff] %v4826_v24  ;;  %v1170_v55 = vadd.f32 %v1168_v17, %v1130_v21  ;;  %v1160_v45 = vadd.f32 %v1158_v51, %v1120_v35  ;;  %v1178_v12 = vsel %vm1057_vm5, %v5646_v33, %v1177_v20  ;;  %v1208_v22 = vsel %vm1057_vm5, %v5647_v49, %v1207_v28  ;;  %v5657_v20 = vld [vmem:[#allocation19_spill] sm:$0xff]  ;;  %v5658_v28 = vld [vmem:[#allocation20_spill] sm:$0xff] }
 0x1cc   : > { %v4823_v26 = vpop.permute.xlu0 %1517  ;;  %v1198_v25 = vsel %vm1057_vm5, %v5649_v61, %v1197_v11  ;;  %v1229_v62 = vsel %vm1218_vm6, %v5650_v2, %v1228_v18  ;;  %v1248_v37 = vrot.slane %v5655_v16, 1  ;;  %v1238_v19 = vrot.slane %v5656_v40, 1  ;;  %v5659_v11 = vld [vmem:[#allocation21_spill] sm:$0xff]  ;;  %v5660_v18 = vld [vmem:[#allocation22_spill] sm:$0xff] }
 0x1cd   : > { %2111 = vrot.lane.b32.xlu1 %v5653_v6, %s3262_s30  ;;  %v1190_v57 = vadd.f32 %v1188_v42, %v1150_v32  ;;  %v1219_v33 = vsel %vm1218_vm6, %v5651_v46, %v1217_v56  ;;  %v1268_v49 = vrot.slane %v5657_v20, 1  ;;  %v1258_v17 = vrot.slane %v5658_v28, 1 }
 0x1ce   : > { %2101 = vrot.lane.b32.xlu0 %v5654_v60, %s3262_s30  ;;  %v1180_v61 = vadd.f32 %v1178_v12, %v1140_v5  ;;  %v1288_v2 = vrot.slane %v5659_v11, 1  ;;  %v1278_v21 = vrot.slane %v5660_v18, 1  ;;  %v2299_v35 = vstv %s4804_s20  ;;  %v5662_v60 = vld [vmem:[#allocation23_spill] sm:$0xff]  ;;  %s5148_s20 = sld [smem:[#allocation6 + $0xbb]] }
 0x1cf   : > { %v4845_v34 = vpop.permute.xlu1 %1548  ;;  %v1210_v6 = vadd.f32 %v1208_v22, %v1170_v55  ;;  %v1200_v32 = vadd.f32 %v1198_v25, %v1160_v45  ;;  %v1231_v42 = vadd.f32 %v1229_v62, %v1190_v57  ;;  %v4863_v46 = vmul.f32 %v4624_v30, %v2309_v9  ;;  %v5663_v9 = vld [vmem:[#allocation24_spill] sm:$0xff]  ;;  %v5664_v22 = vld [vmem:[#allocation25_spill] sm:$0xff] }
 0x1d0   : > { %v4853_v51 = vpop.permute.xlu0 %1537  ;;  %v1221_v56 = vadd.f32 %v1219_v33, %v1180_v61  ;;  %v1249_v5 = vsel %vm1218_vm6, %v5655_v16, %v1248_v37  ;;  %v1239_v12 = vsel %vm1218_vm6, %v5656_v40, %v1238_v19  ;;  %v1308_v4 = vrot.slane %v5662_v60, 1  ;;  %v5665_v40 = vld [vmem:[#allocation26_spill] sm:$0xff]  ;;  %v5666_v57 = vld [vmem:[#allocation28_spill] sm:$0xff] }
 0x1d1   : > { %2131 = vrot.lane.b32.xlu1 %v4601_v15, %s3262_s30  ;;  %5661 = vst [vmem:[#allocation42_spill] sm:$0xff] %v4863_v46  ;;  %v1269_v45 = vsel %vm1218_vm6, %v5657_v20, %v1268_v49  ;;  %v1298_v55 = vrot.slane %v5663_v9, 1  ;;  %v1328_v25 = vrot.slane %v5664_v22, 1  ;;  %v1289_v16 = vsel %vm1218_vm6, %v5659_v11, %v1288_v2 }
 0x1d2   : > { %2121 = vrot.lane.b32.xlu0 %v4612_v41, %s3262_s30  ;;  %v1259_v41 = vsel %vm1218_vm6, %v5658_v28, %v1258_v17  ;;  %v1279_v37 = vsel %vm1218_vm6, %v5660_v18, %v1278_v21  ;;  %v1318_v19 = vrot.slane %v5665_v40, 1  ;;  %v1348_v33 = vrot.slane %v5666_v57, 1  ;;  %v5667_v28 = vld [vmem:[#allocation29_spill] sm:$0xff] }
 0x1d3   : > { %v4870_v15 = vpop.permute.xlu1 %1568  ;;  %v1251_v20 = vadd.f32 %v1249_v5, %v1210_v6  ;;  %v1241_v49 = vadd.f32 %v1239_v12, %v1200_v32  ;;  %v1338_v17 = vrot.slane %v5667_v28, 1  ;;  %v4894_v61 = vmul.f32 %v4624_v30, %v2299_v35  ;;  %v5669_v5 = vld [vmem:[#allocation32_spill] sm:$0xff] }
 0x1d4   : > { %v4880_v62 = vpop.permute.xlu0 %1558  ;;  %v1271_v11 = vadd.f32 %v1269_v45, %v1231_v42  ;;  %v1261_v2 = vadd.f32 %v1259_v41, %v1221_v56  ;;  %v1309_v18 = vsel %vm1218_vm6, %v5662_v60, %v1308_v4  ;;  %v2329_v46 = vstv %s4847_s6  ;;  %v5668_v42 = vld [vmem:[#allocation31_spill] sm:$0xff]  ;;  %v5670_v41 = vld [vmem:[#allocation37_spill] sm:$0xff]  ;;  %s5156_s6 = sld [smem:[#allocation6 + $0x7c]] }
 0x1d5   : > { %2151 = vrot.lane.b32.xlu1 %v4627_v23, %s3262_s30  ;;  %v1291_v24 = vadd.f32 %v1289_v16, %v1251_v20  ;;  %v1281_v23 = vadd.f32 %v1279_v37, %v1241_v49  ;;  %v1299_v6 = vsel %vm1218_vm6, %v5663_v9, %v1298_v55  ;;  %v1329_v32 = vsel %vm1218_vm6, %v5664_v22, %v1328_v25  ;;  %v5671_v55 = vld [vmem:[#allocation38_spill] sm:$0xff]  ;;  %v5672_v16 = vld [vmem:[#allocation39_spill] sm:$0xff] }
 0x1d6   : > { %2141 = vrot.lane.b32.xlu0 %v4635_v31, %s3262_s30  ;;  %v1319_v35 = vsel %vm1218_vm6, %v5665_v40, %v1318_v19  ;;  %v1349_v4 = vsel %vm1218_vm6, %v5666_v57, %v1348_v33  ;;  %v1368_v56 = vrot.slane %v5668_v42, 1  ;;  %v1358_v12 = vrot.slane %v5669_v5, 1 }
 0x1d7   : > { %v4898_v21 = vpop.permute.xlu1 %1588  ;;  %v1311_v60 = vadd.f32 %v1309_v18, %v1271_v11  ;;  %v1339_v45 = vsel %vm1218_vm6, %v5667_v28, %v1338_v17  ;;  %v1389_v9 = vrot.slane %v5670_v41, 1  ;;  %v1378_v22 = vrot.slane %v5671_v55, 1 }
 0x1d8   : > { %v4905_v31 = vpop.permute.xlu0 %1578  ;;  %v1301_v25 = vadd.f32 %v1299_v6, %v1261_v2  ;;  %v1409_v37 = vrot.slane %v5672_v16, 1  ;;  %v1399_v40 = vrot.slane %v4632_v39, 1  ;;  %v2319_v57 = vstv %s4872_s8  ;;  %s5160_s8 = sld [smem:[#allocation6 + $0x3c]] }
 0x1d9   : > { %2171 = vrot.lane.b32.xlu1 %v4651_v43, %s3262_s30  ;;  %v1331_v43 = vadd.f32 %v1329_v32, %v1291_v24  ;;  %v1321_v33 = vadd.f32 %v1319_v35, %v1281_v23  ;;  %v1351_v20 = vadd.f32 %v1349_v4, %v1311_v60  ;;  %v4929_v28 = vmul.f32 %v4624_v30, %v2329_v46 }
 0x1da   : > { %2161 = vrot.lane.b32.xlu0 %v4664_v14, %s3262_s30  ;;  %v1341_v17 = vadd.f32 %v1339_v45, %v1301_v25  ;;  %v1369_v14 = vsel %vm1218_vm6, %v5668_v42, %v1368_v56  ;;  %v1359_v11 = vsel %vm1218_vm6, %v5669_v5, %v1358_v12  ;;  %v1429_v2 = vrot.slane %v4661_v52, 1  ;;  %s5132_s30 = sld [smem:[#allocation6 + $0x7b]] }
 0x1db   : > { %v4923_v19 = vpop.permute.xlu1 %1608  ;;  %v1390_v24 = vsel %vm1379_vm7, %v5670_v41, %v1389_v9  ;;  %v1380_v46 = vsel %vm1379_vm7, %v5671_v55, %v1378_v22  ;;  %v1419_v18 = vrot.slane %v4668_v13, 1  ;;  %v1449_v23 = vrot.slane %v4696_v36, 1 }
 0x1dc   : > { %v4926_v49 = vpop.permute.xlu0 %1598  ;;  %v1410_v6 = vsel %vm1379_vm7, %v5672_v16, %v1409_v37  ;;  %v1439_v32 = vrot.slane %v4699_v29, 1  ;;  %v1469_v35 = vrot.slane %v4727_v10, 1  ;;  %v1371_v42 = vadd.f32 %v1369_v14, %v1331_v43 }
 0x1dd   : > { %2192 = vrot.lane.b32.xlu1 %v4671_v54, %s3263_s7  ;;  %v1400_v54 = vsel %vm1379_vm7, %v4632_v39, %v1399_v40  ;;  %v1361_v56 = vadd.f32 %v1359_v11, %v1321_v33  ;;  %v1459_v5 = vrot.slane %v4736_v47, 1  ;;  %v1392_v60 = vadd.f32 %v1390_v24, %v1351_v20  ;;  %v5673_v11 = vld [vmem:[#allocation40_spill] sm:$0xff] }
 0x1de   : > { %2181 = vrot.lane.b32.xlu0 %v4674_v63, %s3263_s7  ;;  %v4960_v63 = vmul.f32 %v4624_v30, %v2319_v57  ;;  %v1382_v45 = vadd.f32 %v1380_v46, %v1341_v17  ;;  %v1430_v39 = vsel %vm1379_vm7, %v4661_v52, %v1429_v2  ;;  %v1489_v41 = vrot.slane %v4756_v1, 1 }
 0x1df   : > { %v4954_v4 = vpop.permute.xlu1 %1628  ;;  %v1412_v9 = vadd.f32 %v1410_v6, %v1371_v42  ;;  %v1402_v55 = vadd.f32 %v1400_v54, %v1361_v56  ;;  %v1420_v22 = vsel %vm1379_vm7, %v4668_v13, %v1419_v18  ;;  %v1450_v25 = vsel %vm1379_vm7, %v4696_v36, %v1449_v23 }
 0x1e0   : > { %v4957_v12 = vpop.permute.xlu0 %1618  ;;  %v1440_v52 = vsel %vm1379_vm7, %v4699_v29, %v1439_v32  ;;  %v1470_v16 = vsel %vm1379_vm7, %v4727_v10, %v1469_v35  ;;  %v1509_v37 = vrot.slane %v4789_v59, 1  ;;  %v1432_v40 = vadd.f32 %v1430_v39, %v1392_v60 }
 0x1e1   : > { %2212 = vrot.lane.b32.xlu1 %v4702_v27, %s3263_s7  ;;  %v1479_v27 = vrot.slane %v4768_v38, 1  ;;  %v1460_v36 = vsel %vm1379_vm7, %v4736_v47, %v1459_v5  ;;  %v1529_v57 = vrot.slane %v4820_v50, 1  ;;  %v1422_v29 = vadd.f32 %v1420_v22, %v1382_v45 }
 0x1e2   : > { %2202 = vrot.lane.b32.xlu0 %v4705_v7, %s3263_s7  ;;  %v1499_v7 = vrot.slane %v4792_v0, 1  ;;  %v1490_v10 = vsel %vm1379_vm7, %v4756_v1, %v1489_v41  ;;  %v1519_v33 = vrot.slane %v4823_v26, 1  ;;  %v1550_v20 = vrot.slane %v4845_v34, 1 }
 0x1e3   : > { %v4981_v13 = vpop.permute.xlu1 %1648  ;;  %v1452_v17 = vadd.f32 %v1450_v25, %v1412_v9  ;;  %v1442_v14 = vadd.f32 %v1440_v52, %v1402_v55  ;;  %v1472_v47 = vadd.f32 %v1470_v16, %v1432_v40  ;;  %v2350_v2 = vstv %s4946_s14  ;;  %s5172_s14 = sld [smem:[#allocation6 + $0xbc]] }
 0x1e4   : > { %v4987_v43 = vpop.permute.xlu0 %1638  ;;  %v1462_v24 = vadd.f32 %v1460_v36, %v1422_v29  ;;  %v1480_v46 = vsel %vm1379_vm7, %v4768_v38, %v1479_v27  ;;  %v1510_v1 = vsel %vm1379_vm7, %v4789_v59, %v1509_v37  ;;  %v1539_v18 = vrot.slane %v4853_v51, 1 }
 0x1e5   : > { %2232 = vrot.lane.b32.xlu1 %v4713_v8, %s3263_s7  ;;  %v1492_v8 = vadd.f32 %v1490_v10, %v1452_v17  ;;  %v1500_v6 = vsel %vm1379_vm7, %v4792_v0, %v1499_v7  ;;  %v1530_v54 = vsel %vm1379_vm7, %v4820_v50, %v1529_v57  ;;  %v1570_v32 = vrot.slane %v4870_v15, 1 }
 0x1e6   : > { %2222 = vrot.lane.b32.xlu0 %v5673_v11, %s3263_s7  ;;  %v1520_v38 = vsel %vm1379_vm7, %v4823_v26, %v1519_v33  ;;  %v1551_v59 = vsel %vm1540_vm8, %v4845_v34, %v1550_v20  ;;  %v1560_v42 = vrot.slane %v4880_v62, 1  ;;  %v1590_v56 = vrot.slane %v4898_v21, 1 }
 0x1e7   : > { %v5003_v23 = vpop.permute.xlu1 %1668  ;;  %v1482_v0 = vadd.f32 %v1480_v46, %v1442_v14  ;;  %v1512_v5 = vadd.f32 %v1510_v1, %v1472_v47  ;;  %v1610_v50 = vrot.slane %v4923_v19, 1  ;;  %v2339_v60 = vstv %s4973_s17  ;;  %s5180_s17 = sld [smem:[#allocation6 + $0x7d]] }
 0x1e8   : > { %v5010_v35 = vpop.permute.xlu0 %1658  ;;  %v1502_v45 = vadd.f32 %v1500_v6, %v1462_v24  ;;  %v1532_v26 = vadd.f32 %v1530_v54, %v1492_v8  ;;  %v1541_v34 = vsel %vm1540_vm8, %v4853_v51, %v1539_v18  ;;  %v1600_v39 = vrot.slane %v4926_v49, 1  ;;  %v5674_v24 = vld [vmem:[#allocation41_spill] sm:$0xff] }
 0x1e9   : > { %2252 = vrot.lane.b32.xlu1 %v4746_v48, %s3263_s7  ;;  %v1522_v9 = vadd.f32 %v1520_v38, %v1482_v0  ;;  %v1553_v55 = vadd.f32 %v1551_v59, %v1512_v5  ;;  %v1571_v48 = vsel %vm1540_vm8, %v4870_v15, %v1570_v32  ;;  %v1650_v22 = vrot.slane %v4981_v13, 1 }
 0x1ea   : > { %2242 = vrot.lane.b32.xlu0 %v4752_v44, %s3263_s7  ;;  %v1561_v44 = vsel %vm1540_vm8, %v4880_v62, %v1560_v42  ;;  %v1591_v52 = vsel %vm1540_vm8, %v4898_v21, %v1590_v56  ;;  %v1580_v51 = vrot.slane %v4905_v31, 1  ;;  %v1640_v16 = vrot.slane %v4987_v43, 1  ;;  %v5675_v42 = vld [vmem:[#allocation42_spill] sm:$0xff] }
 0x1eb   : > { %v1689_v41 = vpop.permute.xlu1 %1688  ;;  %v1543_v27 = vadd.f32 %v1541_v34, %v1502_v45  ;;  %v1611_v15 = vsel %vm1540_vm8, %v4923_v19, %v1610_v50  ;;  %v1630_v37 = vrot.slane %v4954_v4, 1  ;;  %v1573_v62 = vadd.f32 %v1571_v48, %v1532_v26 }
 0x1ec   : > { %v1679_v25 = vpop.permute.xlu0 %1678  ;;  %v1690_v40 = vrot.slane %v1689_v41, 1  ;;  %v1601_v21 = vsel %vm1540_vm8, %v4926_v49, %v1600_v39  ;;  %v1620_v36 = vrot.slane %v4957_v12, 1  ;;  %v1563_v29 = vadd.f32 %v1561_v44, %v1522_v9 }
 0x1ed   : > { %2272 = vrot.lane.b32.xlu1 %v4759_v53, %s3263_s7  ;;  %v1680_v7 = vrot.slane %v1679_v25, 1  ;;  %v1593_v53 = vadd.f32 %v1591_v52, %v1553_v55  ;;  %v1651_v10 = vsel %vm1540_vm8, %v4981_v13, %v1650_v22  ;;  %v1670_v19 = vrot.slane %v5003_v23, 1  ;;  %v5676_v22 = vld [vmem:[#allocation27_spill] sm:$0xff] }
 0x1ee   : > { %2262 = vrot.lane.b32.xlu0 %v4762_v3, %s3263_s7  ;;  %v1581_v20 = vsel %vm1540_vm8, %v4905_v31, %v1580_v51  ;;  %v1613_v3 = vadd.f32 %v1611_v15, %v1573_v62  ;;  %v1641_v17 = vsel %vm1540_vm8, %v4987_v43, %v1640_v16  ;;  %v1660_v49 = vrot.slane %v5010_v35, 1 }
 0x1ef   : > { %v1710_v57 = vpop.permute.xlu1 %1709  ;;  %v1603_v14 = vadd.f32 %v1601_v21, %v1563_v29  ;;  %v1631_v47 = vsel %vm1540_vm8, %v4954_v4, %v1630_v37  ;;  %v1691_v13 = vsel %vm1540_vm8, %v1689_v41, %v1690_v40  ;;  %v1621_v31 = vsel %vm1540_vm8, %v4957_v12, %v1620_v36 }
 0x1f0   : > { %v1699_v33 = vpop.permute.xlu0 %1698  ;;  %v1711_v11 = vrot.slane %v1710_v57, 1  ;;  %v1653_v43 = vadd.f32 %v1651_v10, %v1613_v3  ;;  %v1681_v46 = vsel %vm1540_vm8, %v1679_v25, %v1680_v7  ;;  %v1583_v18 = vadd.f32 %v1581_v20, %v1543_v27 }
 0x1f1   : > { %2292 = vrot.lane.b32.xlu1 %v4795_v58, %s3263_s7  ;;  %v1700_v1 = vrot.slane %v1699_v33, 1  ;;  %v1643_v4 = vadd.f32 %v1641_v17, %v1603_v14  ;;  %v1671_v8 = vsel %vm1540_vm8, %v5003_v23, %v1670_v19  ;;  %v1633_v32 = vadd.f32 %v1631_v47, %v1593_v53  ;;  %v5677_v17 = vld [vmem:[#allocation30_spill] sm:$0xff] }
 0x1f2   : > { %2282 = vrot.lane.b32.xlu0 %v5674_v24, %s3263_s7  ;;  %v1661_v38 = vsel %vm1540_vm8, %v5010_v35, %v1660_v49  ;;  %v1693_v59 = vadd.f32 %v1691_v13, %v1653_v43  ;;  %v1623_v56 = vadd.f32 %v1621_v31, %v1583_v18  ;;  %v1712_v5 = vsel %vm1701_vm9, %v1710_v57, %v1711_v11 }
 0x1f3   : > { %v1730_v58 = vpop.permute.xlu1 %1729  ;;  %v1683_v0 = vadd.f32 %v1681_v46, %v1643_v4  ;;  %v1673_v23 = vadd.f32 %v1671_v8, %v1633_v32  ;;  %v1702_v35 = vsel %vm1701_vm9, %v1699_v33, %v1700_v1  ;;  %v2351_v25 = vmul.f32 %v5676_v22, %v2350_v2 }
 0x1f4   : > { %v1731_v6 = vrot.slane %v1730_v58, 1  ;;  %v1720_v54 = vpop.permute.xlu0 %1719  ;;  %v1663_v39 = vadd.f32 %v1661_v38, %v1623_v56  ;;  %v2340_v51 = vmul.f32 %v5676_v22, %v2339_v60  ;;  %v2370_v16 = vstv %s5061_s0  ;;  %s5184_s0 = sld [smem:[#allocation6 + $0x3d]] }
 0x1f5   : > { %v1721_v12 = vrot.slane %v1720_v54, 1  ;;  %2312 = vrot.lane.b32.xlu1 %v5675_v42, %s3263_s7  ;;  %v1714_v48 = vadd.f32 %v1712_v5, %v1673_v23  ;;  %v2360_v37 = vstv %s5066_s1  ;;  %v2390_v7 = vstv %s5078_s28  ;;  %s5191_s1 = sld [smem:[#allocation6 + $0xfd]] }
 0x1f6   : > { %v1732_v50 = vsel %vm1701_vm9, %v1730_v58, %v1731_v6  ;;  %2302 = vrot.lane.b32.xlu0 %v4894_v61, %s3263_s7  ;;  %v1704_v44 = vadd.f32 %v1702_v35, %v1663_v39  ;;  %v2361_v36 = vmul.f32 %v5676_v22, %v2360_v37  ;;  %v2380_v10 = vstv %s5082_s27  ;;  %s5195_s28 = sld [smem:[#allocation6 + $0xbd]]  ;;  %s3265_s27 = smov 53  }
 0x1f7   : > { %v1734_v45 = vadd.f32 %v1732_v50, %v1693_v59  ;;  %v1722_v26 = vsel %vm1701_vm9, %v1720_v54, %v1721_v12  ;;  %v1750_v34 = vpop.permute.xlu1 %1749  ;;  %v2391_v49 = vmul.f32 %v5677_v17, %v2390_v7  ;;  %v2381_v47 = vmul.f32 %v5677_v17, %v2380_v10  ;;  %v5678_v50 = vld [vmem:[#allocation34_spill] sm:$0xff] }
 0x1f8   : > { %v1724_v41 = vadd.f32 %v1722_v26, %v1683_v0  ;;  %v1751_v9 = vrot.slane %v1750_v34, 1  ;;  %v1740_v55 = vpop.permute.xlu0 %1739  ;;  %v2410_v13 = vstv %s5096_s22  ;;  %v2400_v43 = vstv %s5100_s18  ;;  %s5201_s22 = sld [smem:[#allocation6 + $0x7e]] }
 0x1f9   : > { %v1741_v61 = vrot.slane %v1740_v55, 1  ;;  %2332 = vrot.lane.b32.xlu1 %v4929_v28, %s3263_s7  ;;  %v2411_v4 = vmul.f32 %v5677_v17, %v2410_v13  ;;  %v2401_v6 = vmul.f32 %v5677_v17, %v2400_v43  ;;  %v2430_v54 = vstv %s5108_s24  ;;  %s5205_s18 = sld [smem:[#allocation6 + $0x3e]] }
 0x1fa   : > { %v1752_v52 = vsel %vm1701_vm9, %v1750_v34, %v1751_v9  ;;  %2322 = vrot.lane.b32.xlu0 %v4960_v63, %s3263_s7  ;;  %v2371_v63 = vmul.f32 %v5676_v22, %v2370_v16  ;;  %v2420_v12 = vstv %s5112_s25  ;;  %v2431_v23 = vmul.f32 %v5678_v50, %v2430_v54  ;;  %s5168_s7 = sld [smem:[#allocation6 + $0xfc]]  ;;  %s5216_s24 = sld [smem:[#allocation6 + $0xbe]] }
 0x1fb   : > { %v1754_v27 = vadd.f32 %v1752_v52, %v1714_v48  ;;  %v1742_v15 = vsel %vm1701_vm9, %v1740_v55, %v1741_v61  ;;  %v1770_v28 = vpop.permute.xlu1 %1769  ;;  %v2450_v26 = vstv %s5120_s26  ;;  %v2440_v9 = vstv %s5124_s23  ;;  %s5222_s25 = sld [smem:[#allocation6 + $0x7f]] }
 0x1fc   : > { %v1744_v2 = vadd.f32 %v1742_v15, %v1704_v44  ;;  %v1771_v40 = vrot.slane %v1770_v28, 1  ;;  %v1760_v62 = vpop.permute.xlu0 %1759  ;;  %v2441_v52 = vmul.f32 %v5678_v50, %v2440_v9  ;;  %s5226_s26 = sld [smem:[#allocation6 + $0x3f]] }
 0x1fd   : > { %v1761_v21 = vrot.slane %v1760_v62, 1  ;;  %2353 = vrot.lane.b32.xlu1 %v2351_v25, %s3264_s15  ;;  %v2451_v25 = vmul.f32 %v5678_v50, %v2450_v26  ;;  %s5233_s23 = sld [smem:[#allocation6 + $0xff]] }
 0x1fe   : > { %v1772_v60 = vsel %vm1701_vm9, %v1770_v28, %v1771_v40  ;;  %2342 = vrot.lane.b32.xlu0 %v2340_v51, %s3264_s15  ;;  %v2470_v51 = vstv %s5132_s30  ;;  %v2460_v28 = vstv %s5136_s3  ;;  %s5237_s30 = sld [smem:[#allocation6 + $0xbf]]  ;;  %s3047_s3 = smul.u32 192, %s3303_s13 }
 0x1ff   : > { %v1774_v57 = vadd.f32 %v1772_v60, %v1734_v45  ;;  %v1762_v29 = vsel %vm1701_vm9, %v1760_v62, %v1761_v21  ;;  %v1790_v53 = vpop.permute.xlu1 %1789  ;;  %v2421_v45 = vmul.f32 %v5678_v50, %v2420_v12  ;;  %v2471_v21 = vmul.f32 %v4624_v30, %v2470_v51 }
 0x200   : > { %v1764_v19 = vadd.f32 %v1762_v29, %v1724_v41  ;;  %v1791_v33 = vrot.slane %v1790_v53, 1  ;;  %v1780_v20 = vpop.permute.xlu0 %1779  ;;  %v2461_v60 = vmul.f32 %v4624_v30, %v2460_v28 }
 0x201   : > { %v1781_v3 = vrot.slane %v1780_v20, 1  ;;  %2373 = vrot.lane.b32.xlu1 %v2371_v63, %s3264_s15 }
 0x202   : > { %v1792_v14 = vsel %vm1701_vm9, %v1790_v53, %v1791_v33  ;;  %2363 = vrot.lane.b32.xlu0 %v2361_v36, %s3264_s15  ;;  %v2490_v36 = vstv %s5144_s4  ;;  %v2480_v53 = vstv %s5148_s20 }
 0x203   : > { %v1794_v11 = vadd.f32 %v1792_v14, %v1754_v27  ;;  %v1782_v24 = vsel %vm1701_vm9, %v1780_v20, %v1781_v3  ;;  %v1810_v31 = vpop.permute.xlu1 %1809  ;;  %v2491_v3 = vmul.f32 %v4624_v30, %v2490_v36  ;;  %v2511_v14 = vstv %s5156_s6 }
 0x204   : > { %v1784_v46 = vadd.f32 %v1782_v24, %v1744_v2  ;;  %v1811_v1 = vrot.slane %v1810_v31, 1  ;;  %v1800_v58 = vpop.permute.xlu0 %1799  ;;  %v2500_v24 = vstv %s5160_s8  ;;  %s5399_s8 = scalar_lea.hbm %s5449_s2, %s3047_s3 }
 0x205   : > { %v1801_v18 = vrot.slane %v1800_v58, 1  ;;  %2393 = vrot.lane.b32.xlu1 %v2391_v49, %s3264_s15  ;;  %v2481_v49 = vmul.f32 %v4624_v30, %v2480_v53 }
 0x206   : > { %v1812_v8 = vsel %vm1701_vm9, %v1810_v31, %v1811_v1  ;;  %2383 = vrot.lane.b32.xlu0 %v2381_v47, %s3264_s15 }
 0x207   : > { %v1814_v32 = vadd.f32 %v1812_v8, %v1774_v57  ;;  %v1802_v38 = vsel %vm1701_vm9, %v1800_v58, %v1801_v18  ;;  %v1830_v59 = vpop.permute.xlu1 %1829  ;;  %v3128_v58 = vld [vmem:[%s3418_s19] ss:$4 sm:$0xf]  ;;  %v2531_v8 = vstv %s5168_s7  ;;  %s2672_s7 = scalar_lea.sflag [#allocation4], %s3414_s5 }
 0x208   : > { %v1804_v42 = vadd.f32 %v1802_v38, %v1764_v19  ;;  %v1831_v56 = vrot.slane %v1830_v59, 1  ;;  %v1820_v0 = vpop.permute.xlu0 %1819  ;;  %v2512_v30 = vmul.f32 %v3128_v58, %v2511_v14  ;;  %v2521_v38 = vstv %s5172_s14 }
 0x209   : > { %v1821_v5 = vrot.slane %v1820_v0, 1  ;;  %2413 = vrot.lane.b32.xlu1 %v2411_v4, %s3264_s15  ;;  %v2501_v4 = vmul.f32 %v3128_v58, %v2500_v24  ;;  %v2522_v50 = vmul.f32 %v3128_v58, %v2521_v38 }
 0x20a   : > { %v1832_v35 = vsel %vm1701_vm9, %v1830_v59, %v1831_v56  ;;  %2403 = vrot.lane.b32.xlu0 %v2401_v6, %s3264_s15 }
 0x20b   : > { %v1834_v34 = vadd.f32 %v1832_v35, %v1794_v11  ;;  %v1822_v39 = vsel %vm1701_vm9, %v1820_v0, %v1821_v5  ;;  %v1850_v41 = vpop.permute.xlu1 %1849  ;;  %v2532_v0 = vmul.f32 %v3128_v58, %v2531_v8 }
 0x20c   : > { %v1824_v55 = vadd.f32 %v1822_v39, %v1784_v46  ;;  %v1851_v48 = vrot.slane %v1850_v41, 1  ;;  %v1840_v61 = vpop.permute.xlu0 %1839 }
 0x20d   : > { %v1841_v22 = vrot.slane %v1840_v61, 1  ;;  %2433 = vrot.lane.b32.xlu1 %v2431_v23, %s3264_s15  ;;  %v2551_v23 = vstv %s5180_s17  ;;  %s3266_s17 = smov [#allocation7]  }
 0x20e   : > { %v1852_v44 = vsel %vm1701_vm9, %v1850_v41, %v1851_v48  ;;  %2423 = vrot.lane.b32.xlu0 %v2421_v45, %s3264_s15  ;;  %v3129_v48 = vld [vmem:[%s3418_s19 + $0x1] ss:$4 sm:$0xf] }
 0x20f   : > { %v1854_v16 = vadd.f32 %v1852_v44, %v1814_v32  ;;  %v1842_v27 = vsel %vm1701_vm9, %v1840_v61, %v1841_v22  ;;  %v1871_v15 = vpop.permute.xlu1 %1870  ;;  %v2552_v61 = vmul.f32 %v3129_v48, %v2551_v23  ;;  %v2571_v44 = vstv %s5191_s1 }
 0x210   : > { %v1844_v37 = vadd.f32 %v1842_v27, %v1804_v42  ;;  %v1872_v2 = vrot.slane %v1871_v15, 1  ;;  %v1860_v40 = vpop.permute.xlu0 %1859  ;;  %v2561_v27 = vstv %s5195_s28 }
 0x211   : > { %v1861_v62 = vrot.slane %v1860_v40, 1  ;;  %2453 = vrot.lane.b32.xlu1 %v2451_v25, %s3264_s15 }
 0x212   : > { %v1873_v63 = vsel %vm1862_vm10, %v1871_v15, %v1872_v2  ;;  %2443 = vrot.lane.b32.xlu0 %v2441_v52, %s3264_s15 }
 0x213   : > { %v1875_v7 = vadd.f32 %v1873_v63, %v1834_v34  ;;  %v1863_v57 = vsel %vm1862_vm10, %v1860_v40, %v1861_v62  ;;  %v1891_v29 = vpop.permute.xlu1 %1890  ;;  %v2541_v34 = vstv %s5184_s0  ;;  %v2572_v40 = vmul.f32 %v3129_v48, %v2571_v44  ;;  %s3181_s0 = sshll.u32 %s3266_s17, 4  ;;  %s3182_s0 = int_to_ptr.vmem [resolvable:$false] %s3181_s0 }
 0x214   : > { %v1865_v10 = vadd.f32 %v1863_v57, %v1824_v55  ;;  %v1892_v19 = vrot.slane %v1891_v29, 1  ;;  %v1881_v33 = vpop.permute.xlu0 %1880  ;;  %v2542_v25 = vmul.f32 %v3129_v48, %v2541_v34  ;;  %v2591_v63 = vstv %s5201_s22  ;;  %s3183_s1 = scalar_lea.vmem %s3182_s0, 384 }
 0x215   : > { %v1882_v20 = vrot.slane %v1881_v33, 1  ;;  %2473 = vrot.lane.b32.xlu1 %v2471_v21, %s3264_s15  ;;  %v2562_v21 = vmul.f32 %v3129_v48, %v2561_v27  ;;  %v2581_v57 = vstv %s5205_s18 }
 0x216   : > { %v1893_v17 = vsel %vm1862_vm10, %v1891_v29, %v1892_v19  ;;  %2463 = vrot.lane.b32.xlu0 %v2461_v60, %s3264_s15 }
 0x217   : > { %v1895_v47 = vadd.f32 %v1893_v17, %v1854_v16  ;;  %v1883_v13 = vsel %vm1862_vm10, %v1881_v33, %v1882_v20  ;;  %v1911_v11 = vpop.permute.xlu1 %1910  ;;  %v3130_v33 = vld [vmem:[%s3418_s19 + $0x2] ss:$4 sm:$0xf] }
 0x218   : > { %v1885_v31 = vadd.f32 %v1883_v13, %v1844_v37  ;;  %v1912_v43 = vrot.slane %v1911_v11, 1  ;;  %v1901_v46 = vpop.permute.xlu0 %1900  ;;  %v2592_v20 = vmul.f32 %v3130_v33, %v2591_v63  ;;  %v2582_v17 = vmul.f32 %v3130_v33, %v2581_v57 }
 0x219   : > { %v1902_v1 = vrot.slane %v1901_v46, 1  ;;  %2493 = vrot.lane.b32.xlu1 %v2491_v3, %s3264_s15 }
 0x21a   : > { %v1913_v18 = vsel %vm1862_vm10, %v1911_v11, %v1912_v43  ;;  %2483 = vrot.lane.b32.xlu0 %v2481_v49, %s3264_s15  ;;  %s5212_s15 = sld [smem:[#allocation6 + $0xfe]]  ;;  %v2601_v11 = vstv %s5216_s24 }
 0x21b   : > { %v1915_v6 = vadd.f32 %v1913_v18, %v1875_v7  ;;  %v1903_v54 = vsel %vm1862_vm10, %v1901_v46, %v1902_v1  ;;  %v1931_v32 = vpop.permute.xlu1 %1930  ;;  %v2631_v18 = vstv %s5222_s25 }
 0x21c   : > { %v1905_v59 = vadd.f32 %v1903_v54, %v1865_v10  ;;  %v1932_v12 = vrot.slane %v1931_v32, 1  ;;  %v1921_v42 = vpop.permute.xlu0 %1920  ;;  %v2621_v54 = vstv %s5226_s26 }
 0x21d   : > { %v1922_v56 = vrot.slane %v1921_v42, 1  ;;  %2514 = vrot.lane.b32.xlu1 %v2512_v30, %s3265_s27  ;;  %v2602_v30 = vmul.f32 %v3130_v33, %v2601_v11 }
 0x21e   : > { %v1933_v5 = vsel %vm1862_vm10, %v1931_v32, %v1932_v12  ;;  %2503 = vrot.lane.b32.xlu0 %v2501_v4, %s3265_s27 }
 0x21f   : > { %v1935_v35 = vadd.f32 %v1933_v5, %v1895_v47  ;;  %v1923_v45 = vsel %vm1862_vm10, %v1921_v42, %v1922_v56  ;;  %v1951_v26 = vpop.permute.xlu1 %1950  ;;  %v3131_v42 = vld [vmem:[%s3418_s19 + $0x3] ss:$4 sm:$0xf]  ;;  %s3046_s19 = smul.u32 12, %s3414_s5 }
 0x220   : > { %v1925_v39 = vadd.f32 %v1923_v45, %v1885_v31  ;;  %v1952_v41 = vrot.slane %v1951_v26, 1  ;;  %v1941_v9 = vpop.permute.xlu0 %1940  ;;  %v2611_v49 = vstv %s5212_s15  ;;  %v2632_v56 = vmul.f32 %v3131_v42, %v2631_v18 }
 0x221   : > { %v1942_v55 = vrot.slane %v1941_v9, 1  ;;  %2534 = vrot.lane.b32.xlu1 %v2532_v0, %s3265_s27  ;;  %v2612_v1 = vmul.f32 %v3130_v33, %v2611_v49  ;;  %v2622_v5 = vmul.f32 %v3131_v42, %v2621_v54  ;;  %s173_s4 = scalar_lea.vmem [#allocation7], %s3046_s19 }
 0x222   : > { %v1953_v22 = vsel %vm1862_vm10, %v1951_v26, %v1952_v41  ;;  %2524 = vrot.lane.b32.xlu0 %v2522_v50, %s3265_s27  ;;  %v2651_v50 = vstv %s5233_s23  ;;  %v2641_v26 = vstv %s5237_s30  ;;  %s2686_s20 = sshll.u32 %s173_s4, 4  ;;  %s5401_s20 = int_to_ptr.vmem [resolvable:$true] %s2686_s20 }
 0x223   : > { %v1955_v52 = vadd.f32 %v1953_v22, %v1915_v6  ;;  %v1943_v51 = vsel %vm1862_vm10, %v1941_v9, %v1942_v55  ;;  %v1971_v16 = vpop.permute.xlu1 %1970  ;;  %v2652_v55 = vmul.f32 %v3131_v42, %v2651_v50  ;;  %s3177_s14 = scalar_lea.vmem %s5401_s20, 192  ;;  %p3184_p0 = scmp.lt.s32.totalorder %s5401_s20, %s3182_s0 }
 0x224   : > { %v1945_v15 = vadd.f32 %v1943_v51, %v1905_v59  ;;  %v1972_v28 = vrot.slane %v1971_v16, 1  ;;  %v1961_v37 = vpop.permute.xlu0 %1960  ;;  %p3178_p9 = scmp.ne.s32.totalorder %s5401_s20, %s3177_s14  ;;  %p3185_p3 = scmp.lt.s32.totalorder %s3183_s1, %s3177_s14 }
 0x225   : > { %v1962_v2 = vrot.slane %v1961_v37, 1  ;;  %2554 = vrot.lane.b32.xlu1 %v2552_v61, %s3265_s27  ;;  %v2642_v61 = vmul.f32 %v3131_v42, %v2641_v26 }
 0x226   : > { %v1973_v62 = vsel %vm1862_vm10, %v1971_v16, %v1972_v28  ;;  %2544 = vrot.lane.b32.xlu0 %v2542_v25, %s3265_s27  ;;  %p3179_p13 = pnand %p3178_p9, %p5681_p11  ;;  %p3186_p12 = por %p3185_p3, %p3184_p0 }
 0x227   : > { %v1975_v60 = vadd.f32 %v1973_v62, %v1935_v35  ;;  %v1963_v36 = vsel %vm1862_vm10, %v1961_v37, %v1962_v2  ;;  %v1991_v7 = vpop.permute.xlu1 %1990 }
 0x228   : > { %v1965_v29 = vadd.f32 %v1963_v36, %v1925_v39  ;;  %v1992_v53 = vrot.slane %v1991_v7, 1  ;;  %v1981_v10 = vpop.permute.xlu0 %1980  ;;  %p3180_p7 = pneg %p3179_p13 }
 0x229   : > { %v1982_v19 = vrot.slane %v1981_v10, 1  ;;  %2574 = vrot.lane.b32.xlu1 %v2572_v40, %s3265_s27 }
 0x22a   : > { %v1993_v3 = vsel %vm1862_vm10, %v1991_v7, %v1992_v53  ;;  %2564 = vrot.lane.b32.xlu0 %v2562_v21, %s3265_s27  ;;  %p3187_p5 = pnand %p3186_p12, %p3180_p7 }
 0x22b   : > { %v1995_v14 = vadd.f32 %v1993_v3, %v1955_v52  ;;  %v1983_v47 = vsel %vm1862_vm10, %v1981_v10, %v1982_v19  ;;  %v2011_v13 = vpop.permute.xlu1 %2010 }
 0x22c   : > { %v1985_v24 = vadd.f32 %v1983_v47, %v1945_v15  ;;  %v2012_v31 = vrot.slane %v2011_v13, 1  ;;  %v2001_v43 = vpop.permute.xlu0 %2000 }
 0x22d   : > { %v2002_v46 = vrot.slane %v2001_v43, 1  ;;  %2594 = vrot.lane.b32.xlu1 %v2592_v20, %s3265_s27 }
 0x22e   : > { %v2013_v58 = vsel %vm1862_vm10, %v2011_v13, %v2012_v31  ;;  %2584 = vrot.lane.b32.xlu0 %v2582_v17, %s3265_s27 }
 0x22f   : > { %v2015_v4 = vadd.f32 %v2013_v58, %v1975_v60  ;;  %v2003_v8 = vsel %vm1862_vm10, %v2001_v43, %v2002_v46  ;;  %v2032_v6 = vpop.permute.xlu1 %2031 }
 0x230   : > { %v2005_v32 = vadd.f32 %v2003_v8, %v1965_v29  ;;  %v2033_v38 = vrot.slane %v2032_v6, 1  ;;  %v2021_v59 = vpop.permute.xlu0 %2020 }
 0x231   : > { %v2022_v12 = vrot.slane %v2021_v59, 1  ;;  %2614 = vrot.lane.b32.xlu1 %v2612_v1, %s3265_s27 }
 0x232   : > { %v2034_v0 = vsel %vm2023_vm11, %v2032_v6, %v2033_v38  ;;  %2604 = vrot.lane.b32.xlu0 %v2602_v30, %s3265_s27 }
 0x233   : > { %v2036_v23 = vadd.f32 %v2034_v0, %v1995_v14  ;;  %v2024_v35 = vsel %vm2023_vm11, %v2021_v59, %v2022_v12  ;;  %v2052_v45 = vpop.permute.xlu1 %2051 }
 0x234   : > { %v2026_v34 = vadd.f32 %v2024_v35, %v1985_v24  ;;  %v2053_v39 = vrot.slane %v2052_v45, 1  ;;  %v2042_v41 = vpop.permute.xlu0 %2041 }
 0x235   : > { %v2043_v9 = vrot.slane %v2042_v41, 1  ;;  %2634 = vrot.lane.b32.xlu1 %v2632_v56, %s3265_s27 }
 0x236   : > { %v2054_v48 = vsel %vm2023_vm11, %v2052_v45, %v2053_v39  ;;  %2624 = vrot.lane.b32.xlu0 %v2622_v5, %s3265_s27 }
 0x237   : > { %v2056_v22 = vadd.f32 %v2054_v48, %v2015_v4  ;;  %v2044_v25 = vsel %vm2023_vm11, %v2042_v41, %v2043_v9  ;;  %v2072_v44 = vpop.permute.xlu1 %2071 }
 0x238   : > { %v2046_v52 = vadd.f32 %v2044_v25, %v2005_v32  ;;  %v2073_v51 = vrot.slane %v2072_v44, 1  ;;  %v2062_v16 = vpop.permute.xlu0 %2061 }
 0x239   : > { %v2063_v27 = vrot.slane %v2062_v16, 1  ;;  %2654 = vrot.lane.b32.xlu1 %v2652_v55, %s3265_s27 }
 0x23a   : > { %v2074_v15 = vsel %vm2023_vm11, %v2072_v44, %v2073_v51  ;;  %2644 = vrot.lane.b32.xlu0 %v2642_v61, %s3265_s27 }
 0x23b   : > { %v2076_v28 = vadd.f32 %v2074_v15, %v2036_v23  ;;  %v2064_v37 = vsel %vm2023_vm11, %v2062_v16, %v2063_v27  ;;  %v2092_v2 = vpop.permute.xlu1 %2091 }
 0x23c   : > { %v2066_v40 = vadd.f32 %v2064_v37, %v2026_v34  ;;  %v2093_v62 = vrot.slane %v2092_v2, 1  ;;  %v2082_v21 = vpop.permute.xlu0 %2081 }
 0x23d   : > { %v2083_v63 = vrot.slane %v2082_v21, 1 }
 0x23e   : > { %v2094_v60 = vsel %vm2023_vm11, %v2092_v2, %v2093_v62 }
 0x23f   : > { %v2096_v36 = vadd.f32 %v2094_v60, %v2056_v22  ;;  %v2084_v7 = vsel %vm2023_vm11, %v2082_v21, %v2083_v63  ;;  %v2112_v57 = vpop.permute.xlu1 %2111 }
 0x240   : > { %v2086_v29 = vadd.f32 %v2084_v7, %v2046_v52  ;;  %v2113_v53 = vrot.slane %v2112_v57, 1  ;;  %v2102_v10 = vpop.permute.xlu0 %2101 }
 0x241   : > { %v2103_v19 = vrot.slane %v2102_v10, 1 }
 0x242   : > { %v2114_v33 = vsel %vm2023_vm11, %v2112_v57, %v2113_v53 }
 0x243   : > { %v2116_v20 = vadd.f32 %v2114_v33, %v2076_v28  ;;  %v2104_v3 = vsel %vm2023_vm11, %v2102_v10, %v2103_v19  ;;  %v2132_v17 = vpop.permute.xlu1 %2131 }
 0x244   : > { %v2106_v49 = vadd.f32 %v2104_v3, %v2066_v40  ;;  %v2133_v14 = vrot.slane %v2132_v17, 1  ;;  %v2122_v47 = vpop.permute.xlu0 %2121 }
 0x245   : > { %v2123_v13 = vrot.slane %v2122_v47, 1 }
 0x246   : > { %v2134_v11 = vsel %vm2023_vm11, %v2132_v17, %v2133_v14 }
 0x247   : > { %v2136_v24 = vadd.f32 %v2134_v11, %v2096_v36  ;;  %v2124_v31 = vsel %vm2023_vm11, %v2122_v47, %v2123_v13  ;;  %v2152_v43 = vpop.permute.xlu1 %2151 }
 0x248   : > { %v2126_v46 = vadd.f32 %v2124_v31, %v2086_v29  ;;  %v2153_v1 = vrot.slane %v2152_v43, 1  ;;  %v2142_v58 = vpop.permute.xlu0 %2141 }
 0x249   : > { %v2143_v30 = vrot.slane %v2142_v58, 1 }
 0x24a   : > { %v2154_v18 = vsel %vm2023_vm11, %v2152_v43, %v2153_v1 }
 0x24b   : > { %v2156_v4 = vadd.f32 %v2154_v18, %v2116_v20  ;;  %v2144_v8 = vsel %vm2023_vm11, %v2142_v58, %v2143_v30  ;;  %v2172_v6 = vpop.permute.xlu1 %2171 }
 0x24c   : > { %v2146_v54 = vadd.f32 %v2144_v8, %v2106_v49  ;;  %v2173_v32 = vrot.slane %v2172_v6, 1  ;;  %v2162_v38 = vpop.permute.xlu0 %2161 }
 0x24d   : > { %v2163_v59 = vrot.slane %v2162_v38, 1 }
 0x24e   : > { %v2174_v12 = vsel %vm2023_vm11, %v2172_v6, %v2173_v32 }
 0x24f   : > { %v2176_v42 = vadd.f32 %v2174_v12, %v2136_v24  ;;  %v2164_v56 = vsel %vm2023_vm11, %v2162_v38, %v2163_v59  ;;  %v2193_v0 = vpop.permute.xlu1 %2192 }
 0x250   : > { %v2166_v5 = vadd.f32 %v2164_v56, %v2126_v46  ;;  %v2194_v50 = vrot.slane %v2193_v0, 1  ;;  %v2182_v23 = vpop.permute.xlu0 %2181 }
 0x251   : > { %v2183_v35 = vrot.slane %v2182_v23, 1 }
 0x252   : > { %v2195_v45 = vsel %vm2184_vm12, %v2193_v0, %v2194_v50 }
 0x253   : > { %v2197_v26 = vadd.f32 %v2195_v45, %v2156_v4  ;;  %v2185_v34 = vsel %vm2184_vm12, %v2182_v23, %v2183_v35  ;;  %v2213_v39 = vpop.permute.xlu1 %2212 }
 0x254   : > { %v2187_v41 = vadd.f32 %v2185_v34, %v2146_v54  ;;  %v2214_v9 = vrot.slane %v2213_v39, 1  ;;  %v2203_v55 = vpop.permute.xlu0 %2202 }
 0x255   : > { %v2204_v48 = vrot.slane %v2203_v55, 1 }
 0x256   : > { %v2215_v61 = vsel %vm2184_vm12, %v2213_v39, %v2214_v9 }
 0x257   : > { %v2217_v22 = vadd.f32 %v2215_v61, %v2176_v42  ;;  %v2205_v25 = vsel %vm2184_vm12, %v2203_v55, %v2204_v48  ;;  %v2233_v44 = vpop.permute.xlu1 %2232 }
 0x258   : > { %v2207_v52 = vadd.f32 %v2205_v25, %v2166_v5  ;;  %v2223_v51 = vpop.permute.xlu0 %2222  ;;  %v2234_v14 = vrot.slane %v2233_v44, 1 }
 0x259   : > { %v2224_v13 = vrot.slane %v2223_v51, 1 }
 0x25a   : > { %v2235_v43 = vsel %vm2184_vm12, %v2233_v44, %v2234_v14 }
 0x25b   : > { %v2253_v16 = vpop.permute.xlu1 %2252  ;;  %v2225_v1 = vsel %vm2184_vm12, %v2223_v51, %v2224_v13  ;;  %v2237_v59 = vadd.f32 %v2235_v43, %v2197_v26 }
 0x25c   : > { %v2243_v27 = vpop.permute.xlu0 %2242  ;;  %v2254_v11 = vrot.slane %v2253_v16, 1  ;;  %v2227_v12 = vadd.f32 %v2225_v1, %v2187_v41 }
 0x25d   : > { %v2244_v24 = vrot.slane %v2243_v27, 1 }
 0x25e   : > { %v2255_v58 = vsel %vm2184_vm12, %v2253_v16, %v2254_v11 }
 0x25f   : > { %v2273_v15 = vpop.permute.xlu1 %2272  ;;  %v2245_v4 = vsel %vm2184_vm12, %v2243_v27, %v2244_v24  ;;  %v2257_v42 = vadd.f32 %v2255_v58, %v2217_v22 }
 0x260   : > { %v2263_v28 = vpop.permute.xlu0 %2262  ;;  %v2274_v30 = vrot.slane %v2273_v15, 1  ;;  %v2247_v0 = vadd.f32 %v2245_v4, %v2207_v52 }
 0x261   : > { %v2264_v18 = vrot.slane %v2263_v28, 1 }
 0x262   : > { %v2275_v5 = vsel %vm2184_vm12, %v2273_v15, %v2274_v30 }
 0x263   : > { %v2293_v37 = vpop.permute.xlu1 %2292  ;;  %v2265_v50 = vsel %vm2184_vm12, %v2263_v28, %v2264_v18  ;;  %v2277_v61 = vadd.f32 %v2275_v5, %v2237_v59 }
 0x264   : > { %v2283_v2 = vpop.permute.xlu0 %2282  ;;  %v2294_v8 = vrot.slane %v2293_v37, 1  ;;  %v2267_v22 = vadd.f32 %v2265_v50, %v2227_v12 }
 0x265   : > { %v2284_v6 = vrot.slane %v2283_v2, 1 }
 0x266   : > { %v2295_v35 = vsel %vm2184_vm12, %v2293_v37, %v2294_v8 }
 0x267   : > { %v2313_v40 = vpop.permute.xlu1 %2312  ;;  %v2285_v45 = vsel %vm2184_vm12, %v2283_v2, %v2284_v6  ;;  %v2297_v52 = vadd.f32 %v2295_v35, %v2257_v42 }
 0x268   : > { %v2303_v62 = vpop.permute.xlu0 %2302  ;;  %v2314_v54 = vrot.slane %v2313_v40, 1  ;;  %v2287_v51 = vadd.f32 %v2285_v45, %v2247_v0  ;;  %v2660_v45 = vlaneseq }
 0x269   : > { %v2304_v32 = vrot.slane %v2303_v62, 1 }
 0x26a   : > { %v2315_v9 = vsel %vm2184_vm12, %v2313_v40, %v2314_v54  ;;  %vm5365_vm15 = vcmp.lt.s32.totalorder %v2660_v45, 384 }
 0x26b   : > { %v2333_v21 = vpop.permute.xlu1 %2332  ;;  %v2305_v26 = vsel %vm2184_vm12, %v2303_v62, %v2304_v32  ;;  %v2317_v15 = vadd.f32 %v2315_v9, %v2277_v61 }
 0x26c   : > { %v2323_v63 = vpop.permute.xlu0 %2322  ;;  %v2334_v23 = vrot.slane %v2333_v21, 1  ;;  %v2307_v28 = vadd.f32 %v2305_v26, %v2267_v22 }
 0x26d   : > { %v2324_v34 = vrot.slane %v2323_v63, 1 }
 0x26e   : > { %v2335_v16 = vsel %vm2184_vm12, %v2333_v21, %v2334_v23 }
 0x26f   : > { %v2354_v60 = vpop.permute.xlu1 %2353  ;;  %v2325_v37 = vsel %vm2184_vm12, %v2323_v63, %v2324_v34  ;;  %v2337_v24 = vadd.f32 %v2335_v16, %v2297_v52 }
 0x270   : > { %v2343_v36 = vpop.permute.xlu0 %2342  ;;  %v2355_v39 = vrot.slane %v2354_v60, 1  ;;  %v2327_v58 = vadd.f32 %v2325_v37, %v2287_v51 }
 0x271   : > { %v2344_v41 = vrot.slane %v2343_v36, 1 }
 0x272   : > { %v2356_v2 = vsel %vm2345_vm13, %v2354_v60, %v2355_v39 }
 0x273   : > { %v2374_v7 = vpop.permute.xlu1 %2373  ;;  %v2346_v40 = vsel %vm2345_vm13, %v2343_v36, %v2344_v41  ;;  %v2358_v30 = vadd.f32 %v2356_v2, %v2317_v15 }
 0x274   : > { %v5274_v57 = vpop.permute.xlu0 %2363  ;;  %v2375_v55 = vrot.slane %v2374_v7, 1  ;;  %v2348_v18 = vadd.f32 %v2346_v40, %v2307_v28 }
 0x275   : > { %v2365_v25 = vrot.slane %v5274_v57, 1 }
 0x276   : > { %v2376_v62 = vsel %vm2345_vm13, %v2374_v7, %v2375_v55 }
 0x277   : > { %v5276_v29 = vpop.permute.xlu1 %2393  ;;  %v2366_v21 = vsel %vm2345_vm13, %v5274_v57, %v2365_v25  ;;  %v2378_v4 = vadd.f32 %v2376_v62, %v2337_v24 }
 0x278   : > { %v5278_v53 = vpop.permute.xlu0 %2383  ;;  %v2395_v27 = vrot.slane %v5276_v29, 1  ;;  %v2368_v8 = vadd.f32 %v2366_v21, %v2327_v58 }
 0x279   : > { %v2385_v14 = vrot.slane %v5278_v53, 1 }
 0x27a   : > { %v2396_v60 = vsel %vm2345_vm13, %v5276_v29, %v2395_v27 }
 0x27b   : > { %v5280_v10 = vpop.permute.xlu1 %2413  ;;  %v2386_v57 = vsel %vm2345_vm13, %v5278_v53, %v2385_v14  ;;  %v2398_v59 = vadd.f32 %v2396_v60, %v2358_v30 }
 0x27c   : > { %v5282_v19 = vpop.permute.xlu0 %2403  ;;  %v2415_v13 = vrot.slane %v5280_v10, 1  ;;  %v2388_v23 = vadd.f32 %v2386_v57, %v2348_v18 }
 0x27d   : > { %v2405_v43 = vrot.slane %v5282_v19, 1 }
 0x27e   : > { %v2416_v6 = vsel %vm2345_vm13, %v5280_v10, %v2415_v13 }
 0x27f   : > { %v5284_v33 = vpop.permute.xlu1 %2433  ;;  %v2406_v29 = vsel %vm2345_vm13, %v5282_v19, %v2405_v43  ;;  %v2418_v35 = vadd.f32 %v2416_v6, %v2378_v4 }
 0x280   : > { %v5286_v20 = vpop.permute.xlu0 %2423  ;;  %v2435_v1 = vrot.slane %v5284_v33, 1  ;;  %v2408_v34 = vadd.f32 %v2406_v29, %v2368_v8 }
 0x281   : > { %v2425_v36 = vrot.slane %v5286_v20, 1 }
 0x282   : > { %v2436_v12 = vsel %vm2345_vm13, %v5284_v33, %v2435_v1 }
 0x283   : > { %v5288_v3 = vpop.permute.xlu1 %2453  ;;  %v2426_v5 = vsel %vm2345_vm13, %v5286_v20, %v2425_v36  ;;  %v2438_v33 = vadd.f32 %v2436_v12, %v2398_v59 }
 0x284   : > { %v5290_v17 = vpop.permute.xlu0 %2443  ;;  %v2455_v7 = vrot.slane %v5288_v3, 1  ;;  %v2428_v26 = vadd.f32 %v2426_v5, %v2388_v23 }
 0x285   : > { %v2445_v54 = vrot.slane %v5290_v17, 1 }
 0x286   : > { %v2456_v53 = vsel %vm2345_vm13, %v5288_v3, %v2455_v7 }
 0x287   : > { %v5292_v49 = vpop.permute.xlu1 %2473  ;;  %v2446_v39 = vsel %vm2345_vm13, %v5290_v17, %v2445_v54  ;;  %v2458_v41 = vadd.f32 %v2456_v53, %v2418_v35 }
 0x288   : > { %v5294_v47 = vpop.permute.xlu0 %2463  ;;  %v2475_v42 = vrot.slane %v5292_v49, 1  ;;  %v2448_v17 = vadd.f32 %v2446_v39, %v2408_v34 }
 0x289   : > { %v2465_v10 = vrot.slane %v5294_v47, 1 }
 0x28a   : > { %v2476_v3 = vsel %vm2345_vm13, %v5292_v49, %v2475_v42 }
 0x28b   : > { %v5296_v31 = vpop.permute.xlu1 %2493  ;;  %v2466_v22 = vsel %vm2345_vm13, %v5294_v47, %v2465_v10  ;;  %v2478_v28 = vadd.f32 %v2476_v3, %v2438_v33 }
 0x28c   : > { %v5299_v46 = vpop.permute.xlu0 %2483  ;;  %v2495_v50 = vrot.slane %v5296_v31, 1  ;;  %v2468_v40 = vadd.f32 %v2466_v22, %v2428_v26 }
 0x28d   : > { %v2485_v52 = vrot.slane %v5299_v46, 1 }
 0x28e   : > { %v2496_v25 = vsel %vm2345_vm13, %v5296_v31, %v2495_v50 }
 0x28f   : > { %v5304_v38 = vpop.permute.xlu1 %2514  ;;  %v2498_v62 = vadd.f32 %v2496_v25, %v2458_v41  ;;  %v2486_v24 = vsel %vm2345_vm13, %v5299_v46, %v2485_v52 }
 0x290   : > { %v5306_v56 = vpop.permute.xlu0 %2503  ;;  %v2516_v19 = vrot.slane %v5304_v38, 1  ;;  %v2488_v4 = vadd.f32 %v2486_v24, %v2448_v17 }
 0x291   : > { %v2505_v9 = vrot.slane %v5306_v56, 1 }
 0x292   : > { %v2517_v16 = vsel %vm2506_vm14, %v5304_v38, %v2516_v19 }
 0x293   : > { %v5314_v48 = vpop.permute.xlu1 %2534  ;;  %v2507_v47 = vsel %vm2506_vm14, %v5306_v56, %v2505_v9  ;;  %v2519_v21 = vadd.f32 %v2517_v16, %v2478_v28 }
 0x294   : > { %v5317_v44 = vpop.permute.xlu0 %2524  ;;  %v2536_v27 = vrot.slane %v5314_v48, 1  ;;  %v2509_v58 = vadd.f32 %v2507_v47, %v2468_v40 }
 0x295   : > { %v2526_v31 = vrot.slane %v5317_v44, 1 }
 0x296   : > { %v2537_v56 = vsel %vm2506_vm14, %v5314_v48, %v2536_v27 }
 0x297   : > { %v2555_v11 = vpop.permute.xlu1 %2554  ;;  %v2539_v54 = vadd.f32 %v2537_v56, %v2498_v62 }
 0x298   : > { %v2545_v63 = vpop.permute.xlu0 %2544  ;;  %v2556_v55 = vrot.slane %v2555_v11, 1 }
 0x299   : > { %v2546_v51 = vrot.slane %v2545_v63, 1 }
 0x29a   : > { %v2557_v38 = vsel %vm2506_vm14, %v2555_v11, %v2556_v55  ;;  %v2527_v11 = vsel %vm2506_vm14, %v5317_v44, %v2526_v31 }
 0x29b   : > { %v2575_v32 = vpop.permute.xlu1 %2574  ;;  %v2547_v43 = vsel %vm2506_vm14, %v2545_v63, %v2546_v51  ;;  %v2559_v7 = vadd.f32 %v2557_v38, %v2519_v21  ;;  %v2529_v12 = vadd.f32 %v2527_v11, %v2488_v4 }
 0x29c   : > { %v2565_v0 = vpop.permute.xlu0 %2564  ;;  %v2576_v14 = vrot.slane %v2575_v32, 1  ;;  %v2549_v8 = vadd.f32 %v2547_v43, %v2509_v58 }
 0x29d   : > { %v2566_v1 = vrot.slane %v2565_v0, 1 }
 0x29e   : > { %v2577_v63 = vsel %vm2506_vm14, %v2575_v32, %v2576_v14 }
 0x29f   : > { %v2595_v20 = vpop.permute.xlu1 %2594  ;;  %v2567_v48 = vsel %vm2506_vm14, %v2565_v0, %v2566_v1  ;;  %v2579_v53 = vadd.f32 %v2577_v63, %v2539_v54 }
 0x2a0   : > { %v2585_v61 = vpop.permute.xlu0 %2584  ;;  %v2596_v15 = vrot.slane %v2595_v20, 1  ;;  %v2569_v35 = vadd.f32 %v2567_v48, %v2529_v12 }
 0x2a1   : > { %v2586_v37 = vrot.slane %v2585_v61, 1 }
 0x2a2   : > { %v2597_v60 = vsel %vm2506_vm14, %v2595_v20, %v2596_v15 }
 0x2a3   : > { %v2615_v2 = vpop.permute.xlu1 %2614  ;;  %v2587_v30 = vsel %vm2506_vm14, %v2585_v61, %v2586_v37  ;;  %v2599_v59 = vadd.f32 %v2597_v60, %v2559_v7 }
 0x2a4   : > { %v2605_v13 = vpop.permute.xlu0 %2604  ;;  %v2616_v36 = vrot.slane %v2615_v2, 1  ;;  %v2589_v42 = vadd.f32 %v2587_v30, %v2549_v8 }
 0x2a5   : > { %v2606_v18 = vrot.slane %v2605_v13, 1 }
 0x2a6   : > { %v2617_v44 = vsel %vm2506_vm14, %v2615_v2, %v2616_v36 }
 0x2a7   : > { %v2635_v46 = vpop.permute.xlu1 %2634  ;;  %v2607_v10 = vsel %vm2506_vm14, %v2605_v13, %v2606_v18  ;;  %v2619_v34 = vadd.f32 %v2617_v44, %v2579_v53 }
 0x2a8   : > { %v2636_v57 = vrot.slane %v2635_v46, 1  ;;  %v2625_v6 = vpop.permute.xlu0 %2624  ;;  %v2609_v39 = vadd.f32 %v2607_v10, %v2569_v35 }
 0x2a9   : > { %v2626_v29 = vrot.slane %v2625_v6, 1 }
 0x2aa   : > { %v2637_v5 = vsel %vm2506_vm14, %v2635_v46, %v2636_v57 }
 0x2ab   : > { %v2639_v50 = vadd.f32 %v2637_v5, %v2599_v59  ;;  %v2627_v32 = vsel %vm2506_vm14, %v2625_v6, %v2626_v29  ;;  %v2655_v23 = vpop.permute.xlu1 %2654 }
 0x2ac   : > { %v2629_v19 = vadd.f32 %v2627_v32, %v2589_v42  ;;  %v2656_v45 = vrot.slane %v2655_v23, 1  ;;  %v2645_v0 = vpop.permute.xlu0 %2644 }
 0x2ad   : > { %3039 = vst.msk [vmem:[%s173_s4 + $0x1] ss:$4 sm:$0x7] %vm5365_vm15, %v2639_v50  ;;  %v2646_v33 = vrot.slane %v2645_v0, 1 }
 0x2ae   : > { %2664 = vst.msk [vmem:[%s173_s4] ss:$4 sm:$0x7] %vm5365_vm15, %v2629_v19  ;;  %v2657_v9 = vsel %vm2506_vm14, %v2655_v23, %v2656_v45 }
 0x2af   : > { %v2659_v20 = vadd.f32 %v2657_v9, %v2619_v34  ;;  %v2647_v26 = vsel %vm2506_vm14, %v2645_v0, %v2646_v33 }
 0x2b0   : > { %v2649_v41 = vadd.f32 %v2647_v26, %v2609_v39 }
 0x2b1   : > { %3041 = vst.msk [vmem:[%s173_s4 + $0x3] ss:$4 sm:$0x7] %vm5365_vm15, %v2659_v20 }
 0x2b2   : > { %3040 = vst.msk [vmem:[%s173_s4 + $0x2] ss:$4 sm:$0x7] %vm5365_vm15, %v2649_v41 }
 0x2b3   : > { %3190 = shalt.err (!%p3187_p5)
}
 0x2b4   : > { %s3191_s5 = scalar_lea.hbm %s5399_s8, 192  ;;  %s3195_s22 = scalar_lea.hbm %s5449_s2, 384 }
 0x2b5   : > { %p3192_p10 = scmp.ne.s32.totalorder %s5399_s8, %s3191_s5  ;;  %p3196_p4 = scmp.lt.u32.totalorder %s5399_s8, %s5449_s2 }
 0x2b6   : > { %p3197_p6 = scmp.lt.u32.totalorder %s3195_s22, %s3191_s5  ;;  %p3199_p9 = scmp.lt.u32.totalorder %s3191_s5, %s5399_s8 }
 0x2b7   : > { %p3193_p2 = pnand %p3192_p10, %p5681_p11 }
 0x2b8   : > { %p3198_p8 = por %p3197_p6, %p3196_p4 }
 0x2b9   : > { %p3194_p1 = pneg %p3193_p2 }
 0x2ba   : > { %p3200_p13 = por %p3199_p9, %p3198_p8 }
 0x2bc   : > { %p3201_p7 = pnand %p3200_p13, %p3194_p1 }
 0x2be   : > { %3204 = shalt.err (!%p3201_p7)
}
 0x2bf   : > { %3054 = dma.vmem_to_hbm [thread:$0]  (%p5681_p11), %s5401_s20, 192, %s5399_s8, %s2672_s7  }
 0x2c0 PF: > { %s2698_s24 = sand.u32 1, %s3235_s9   ;;  %p5682_p0 = scmp.ne.s32.totalorder %s5524_s16, 0 }
 0x2c1   : > { %p5683_p3 = scmp.ge.s32.totalorder %s3247_s12, 2  ;;  %s2699_s25 = scalar_lea.sflag [#allocation4], %s2698_s24 }
 0x2c3   : > { %p3065_p12 = pnand %p5683_p3, %p5682_p0 }
 0x2c5   : > { %3230 = dma.done.wait (!%p3065_p12), %s2699_s25, 192  }
 0x2c6   : > { %3232 = vsyncadd (!%p3065_p12), %s2699_s25, 4294967104  ;;  %s5684_s26 = sld [smem:[#allocation11_spill]]  ;;  %p16_p5 = scmp.ge.s32.totalorder %s3333_s21, 4  }
 0x2c7   : > { %s5685_s9 = smov %s3239_s10  ;;  %s5686_s10 = smov %s3243_s11 }
 0x2c8   : > { %s5688_s12 = smov %s3333_s21  ;;  %18 = sbr.rel (!%p16_p5) target bundleno = 9 (0x9), region = 84 }
 0x2cc   : > { %s5687_s11 = smov %s5684_s26 }
 0x2cf   :  { %2704 = vsyncpa [#allocation3], 1 }
 0x2d0   :  { %2706 = vsyncpa [#allocation3 + $0x1], 1 }
 0x2d1   :  { %2707 = vsyncpa [#allocation4], 1 }
 0x2d2   :  { %2709 = vsyncpa [#allocation4 + $0x1], 1 }
 0x2d3   :  { %2710 = vsyncpa [#allocation5], 1 }
 0x2d4   :  { %2712 = vsyncpa [#allocation5 + $0x1], 1 }

</bundles_post_ra>
